<compile_context>
chip_gen: v6e
topology: v6e:2x2x1
jax: 0.10.0
libtpu: 0.0.40
codegen_flags: <defaults>
</compile_context>

<pallas_src>
from functools import partial

import jax
import jax.numpy as jnp
from jax.experimental import pallas as pl
from jax.experimental.pallas import tpu as pltpu


# ----------------------------------------------------------------------------
# Fused head kernel: depthwise 5x5 + BN + ReLU -> 1x1 + BN + ReLU -> 1x1 (cls)
#                    -> bilinear x4 upsample, written as NCHW row tiles.
# ----------------------------------------------------------------------------
def _head_kernel(x_ref, wdw_ref, s1_ref, b1_ref, wpw_ref, s2_ref, b2_ref,
                 wcls_ref, ah_ref, awt_ref, o_ref, pred_ref,
                 *, H, W, C, CH, K, KS):
    t = pl.program_id(1)

    @pl.when(t == 0)
    def _compute_pred():
        # --- depthwise KSxKS conv + folded BN + ReLU (VPU, f32) ---------------
        # kw (sublane) shift hoisted out of the kh loop: only KS-1 shifted slices;
        # the kh shift is along the untiled leading dim (free address offset).
        acc = jnp.zeros((H, W, C), jnp.float32)
        for kw in range(KS):
            x_kw = x_ref[0, :, kw:kw + W, :]                  # (H+KS-1, W, C)
            for kh in range(KS):
                acc = acc + x_kw[kh:kh + H] * wdw_ref[kh, kw]
        h1 = jnp.maximum(acc * s1_ref[0] + b1_ref[0], 0.0)

        # --- 1x1 conv (C -> CH) + folded BN + ReLU: one MXU matmul ------------
        # bf16 operands, f32 accumulation (v6e/v7x native MXU rate; v5e-safe).
        h1f = h1.reshape(H * W, C).astype(jnp.bfloat16)
        y = jnp.dot(h1f, wpw_ref[...].astype(jnp.bfloat16),
                    preferred_element_type=jnp.float32)       # (H*W, CH)
        y = jnp.maximum(y * s2_ref[...] + b2_ref[...], 0.0)
        y3 = y.reshape(H, W, CH)

        # --- 1x1 class conv (CH -> K), K is tiny: per-class lane reduction ----
        for k in range(K):
            pred_ref[k] = jnp.sum(y3 * wcls_ref[k], axis=-1)  # (H, W)

    # --- bilinear x4 upsample of this output-row tile: A_h[tile] @ pred @ A_w^T
    for k in range(K):
        tk = jnp.dot(ah_ref[...], pred_ref[k],
                     preferred_element_type=jnp.float32)      # (TILE, W)
        o_ref[0, k] = jnp.dot(tk, awt_ref[...],
                              preferred_element_type=jnp.float32).astype(o_ref.dtype)


def instance_center_head(x_nchw, params, A_h, A_wT, *, tile_ho=16):
    """Fused depthwise-separable head + x4 bilinear upsample. NCHW in, NCHW out."""
    w_dw, s1, b1, w_pw, s2, b2, w_cls = params
    B, C, H, W = x_nchw.shape
    KS = w_dw.shape[0]
    CH = w_pw.shape[1]
    K = w_cls.shape[0]
    Ho, Wo = A_h.shape[0], A_wT.shape[1]
    assert A_h.shape[1] == H and A_wT.shape[0] == W
    assert Ho % tile_ho == 0
    NT = Ho // tile_ho
    p = KS // 2

    # NCHW -> NHWC plus 2-pixel halo pad, fused into a single XLA copy.
    x_pad = jnp.pad(jnp.transpose(x_nchw, (0, 2, 3, 1)),
                    ((0, 0), (p, p), (p, p), (0, 0)))

    flops = B * (H * W * C * KS * KS * 2          # depthwise conv
                 + H * W * C * CH * 2             # 1x1 conv
                 + H * W * CH * K * 2             # class conv
                 + K * (Ho * H * W + O_flops(Ho, Wo, W)))
    bytes_accessed = (x_pad.size + B * K * Ho * Wo) * 4 + \
        (w_dw.size + s1.size + b1.size + w_pw.size + s2.size + b2.size
         + w_cls.size + A_h.size + A_wT.size) * 4

    kernel = partial(_head_kernel, H=H, W=W, C=C, CH=CH, K=K, KS=KS)
    return pl.pallas_call(
        kernel,
        out_shape=jax.ShapeDtypeStruct((B, K, Ho, Wo), jnp.float32),
        grid=(B, NT),
        in_specs=[
            pl.BlockSpec((1, H + 2 * p, W + 2 * p, C), lambda b, t: (b, 0, 0, 0)),
            pl.BlockSpec((KS, KS, C), lambda b, t: (0, 0, 0)),
            pl.BlockSpec((1, C), lambda b, t: (0, 0)),
            pl.BlockSpec((1, C), lambda b, t: (0, 0)),
            pl.BlockSpec((C, CH), lambda b, t: (0, 0)),
            pl.BlockSpec((1, CH), lambda b, t: (0, 0)),
            pl.BlockSpec((1, CH), lambda b, t: (0, 0)),
            pl.BlockSpec((K, CH), lambda b, t: (0, 0)),
            pl.BlockSpec((tile_ho, H), lambda b, t: (t, 0)),   # A_h row tile
            pl.BlockSpec((W, Wo), lambda b, t: (0, 0)),        # A_w^T
        ],
        out_specs=pl.BlockSpec((1, K, tile_ho, Wo), lambda b, t: (b, 0, t, 0)),
        scratch_shapes=[pltpu.VMEM((K, H, W), jnp.float32)],
        compiler_params=pltpu.CompilerParams(
            dimension_semantics=("parallel", "arbitrary")),
        cost_estimate=pl.CostEstimate(flops=flops, transcendentals=0,
                                      bytes_accessed=bytes_accessed),
    )(x_pad, w_dw, s1, b1, w_pw, s2, b2, w_cls, A_h, A_wT)


def O_flops(Ho, Wo, W):
    return 2 * Ho * Wo * W


# ----------------------------------------------------------------------------
# Bilinear interpolation matrix (PyTorch F.interpolate, align_corners=False)
# ----------------------------------------------------------------------------
def bilinear_matrix(in_size, scale):
    out_size = in_size * scale
    dst = jnp.arange(out_size, dtype=jnp.float32)
    src = (dst + 0.5) / scale - 0.5
    src = jnp.maximum(src, 0.0)
    i0 = jnp.floor(src).astype(jnp.int32)
    frac = src - i0.astype(jnp.float32)
    i0 = jnp.minimum(i0, in_size - 1)
    i1 = jnp.minimum(i0 + 1, in_size - 1)
    A = jnp.zeros((out_size, in_size), jnp.float32)
    rows = jnp.arange(out_size)
    A = A.at[rows, i0].add(1.0 - frac)
    A = A.at[rows, i1].add(frac)
    return A


def fold_bn(gamma, beta, mean, var, eps=1e-5):
    scale = gamma / jnp.sqrt(var + eps)
    bias = beta - mean * scale
    return scale[None, :], bias[None, :]


# ----------------------------------------------------------------------------
# Pure-JAX reference for verification
# ----------------------------------------------------------------------------
def reference_head(x_nchw, params, A_h, A_wT):
    w_dw, s1, b1, w_pw, s2, b2, w_cls = params
    B, C, H, W = x_nchw.shape
    KS = w_dw.shape[0]
    dw_kernel = jnp.transpose(w_dw, (2, 0, 1))[:, None, :, :]        # (C,1,KS,KS) OIHW
    h = jax.lax.conv_general_dilated(
        x_nchw, dw_kernel, window_strides=(1, 1),
        padding=((KS // 2, KS // 2), (KS // 2, KS // 2)),
        feature_group_count=C, dimension_numbers=("NCHW", "OIHW", "NCHW"))
    h = jnp.maximum(h * s1[0][None, :, None, None] + b1[0][None, :, None, None], 0.0)
    y = jnp.einsum("bchw,cd->bdhw", h, w_pw)
    y = jnp.maximum(y * s2[0][None, :, None, None] + b2[0][None, :, None, None], 0.0)
    pred = jnp.einsum("bdhw,kd->bkhw", y, w_cls)
    return jnp.einsum("ip,bkpq,qj->bkij", A_h, pred, A_wT)


if __name__ == "__main__":
    # Module-consistent small shapes: decoder_channel=128, head_channel=32,
    # prediction head num_class=1, regression head num_class=2, 16x16 spatial, batch 2.
    B, C_DEC, C_HEAD, H, W = 2, 128, 32, 16, 16
    key = jax.random.PRNGKey(0)
    ks = jax.random.split(key, 20)

    x = jax.random.normal(ks[0], (B, C_DEC, H, W), jnp.float32)

    def make_head_params(keys, num_class):
        w_dw = 0.1 * jax.random.normal(keys[0], (5, 5, C_DEC), jnp.float32)
        s1, b1 = fold_bn(1.0 + 0.1 * jax.random.normal(keys[1], (C_DEC,)),
                         0.1 * jax.random.normal(keys[2], (C_DEC,)),
                         0.05 * jax.random.normal(keys[3], (C_DEC,)),
                         jnp.abs(1.0 + 0.1 * jax.random.normal(keys[4], (C_DEC,))))
        w_pw = 0.1 * jax.random.normal(keys[5], (C_DEC, C_HEAD), jnp.float32)
        s2, b2 = fold_bn(1.0 + 0.1 * jax.random.normal(keys[6], (C_HEAD,)),
                         0.1 * jax.random.normal(keys[7], (C_HEAD,)),
                         jnp.zeros((C_HEAD,)), jnp.ones((C_HEAD,)))
        w_cls = 0.1 * jax.random.normal(keys[8], (num_class, C_HEAD), jnp.float32)
        return (w_dw, s1, b1, w_pw, s2, b2, w_cls)

    params_pre = make_head_params(ks[1:10], num_class=1)    # center prediction head
    params_reg = make_head_params(ks[10:19], num_class=2)   # center regression head

    A_h = bilinear_matrix(H, 4)
    A_wT = bilinear_matrix(W, 4).T        # precomputed once, no per-call transpose

    head_fn = jax.jit(instance_center_head)
    center_pred = jax.block_until_ready(head_fn(x, params_pre, A_h, A_wT))
    center_reg = jax.block_until_ready(head_fn(x, params_reg, A_h, A_wT))
    assert center_pred.shape == (B, 1, 4 * H, 4 * W), center_pred.shape
    assert center_reg.shape == (B, 2, 4 * H, 4 * W), center_reg.shape

    ref_pred = jax.block_until_ready(reference_head(x, params_pre, A_h, A_wT))
    ref_reg = jax.block_until_ready(reference_head(x, params_reg, A_h, A_wT))

    # bf16 is used on the MXU (1x1-conv) path, so tolerance is looser than pure f32.
    err_p = float(jnp.max(jnp.abs(center_pred - ref_pred)))
    err_r = float(jnp.max(jnp.abs(center_reg - ref_reg)))
    assert jnp.allclose(center_pred, ref_pred, rtol=2e-2, atol=2e-2), err_p
    assert jnp.allclose(center_reg, ref_reg, rtol=2e-2, atol=2e-2), err_r

    print("KERNEL_OK")
</pallas_src>

<mosaic_0001>
module attributes {stable_mosaic.version = 11 : i64} {
  func.func @_head_kernel(%arg0: i32, %arg1: i32, %arg2: memref<1x20x20x128xf32, #tpu.memory_space<vmem>>, %arg3: memref<5x5x128xf32, #tpu.memory_space<vmem>>, %arg4: memref<1x128xf32, #tpu.memory_space<vmem>>, %arg5: memref<1x128xf32, #tpu.memory_space<vmem>>, %arg6: memref<128x32xf32, #tpu.memory_space<vmem>>, %arg7: memref<1x32xf32, #tpu.memory_space<vmem>>, %arg8: memref<1x32xf32, #tpu.memory_space<vmem>>, %arg9: memref<1x32xf32, #tpu.memory_space<vmem>>, %arg10: memref<16x16xf32, #tpu.memory_space<vmem>>, %arg11: memref<16x64xf32, #tpu.memory_space<vmem>>, %arg12: memref<1x1x16x64xf32, #tpu.memory_space<vmem>>, %arg13: memref<1x16x16xf32, #tpu.memory_space<vmem>>) attributes {dimension_semantics = [#tpu.dimension_semantics<parallel>, #tpu.dimension_semantics<arbitrary>], iteration_bounds = array<i64: 2, 4>, scalar_prefetch = 0 : i64, scratch_operands = 1 : i64, tpu.core_type = #tpu.core_type<tc>, window_params = [{transform_indices = @transform_0, window_bounds = array<i64: 1, 20, 20, 128>}, {pipeline_mode = #tpu.pipeline_mode<synchronous>, transform_indices = @transform_1, window_bounds = array<i64: 5, 5, 128>}, {pipeline_mode = #tpu.pipeline_mode<synchronous>, transform_indices = @transform_2, window_bounds = array<i64: 1, 128>}, {pipeline_mode = #tpu.pipeline_mode<synchronous>, transform_indices = @transform_3, window_bounds = array<i64: 1, 128>}, {pipeline_mode = #tpu.pipeline_mode<synchronous>, transform_indices = @transform_4, window_bounds = array<i64: 128, 32>}, {pipeline_mode = #tpu.pipeline_mode<synchronous>, transform_indices = @transform_5, window_bounds = array<i64: 1, 32>}, {pipeline_mode = #tpu.pipeline_mode<synchronous>, transform_indices = @transform_6, window_bounds = array<i64: 1, 32>}, {pipeline_mode = #tpu.pipeline_mode<synchronous>, transform_indices = @transform_7, window_bounds = array<i64: 1, 32>}, {transform_indices = @transform_8, window_bounds = array<i64: 16, 16>}, {pipeline_mode = #tpu.pipeline_mode<synchronous>, transform_indices = @transform_9, window_bounds = array<i64: 16, 64>}, {transform_indices = @transform_10, window_bounds = array<i64: 1, 1, 16, 64>}]} {
    %c0_i32 = arith.constant 0 : i32
    %0 = arith.cmpi eq, %arg1, %c0_i32 : i32
    %1 = arith.extui %0 : i1 to i32
    %c0_i32_0 = arith.constant 0 : i32
    %2 = arith.cmpi ne, %1, %c0_i32_0 : i32
    scf.if %2 {
      %cst_12 = arith.constant 0.000000e+00 : f32
      %12 = vector.broadcast %cst_12 : f32 to vector<16x16x128xf32>
      %c0_13 = arith.constant 0 : index
      %c0_14 = arith.constant 0 : index
      %c0_15 = arith.constant 0 : index
      %c0_16 = arith.constant 0 : index
      %13 = vector.load %arg2[%c0_13, %c0_14, %c0_15, %c0_16] : memref<1x20x20x128xf32, #tpu.memory_space<vmem>>, vector<1x20x16x128xf32>
      %14 = vector.shape_cast %13 : vector<1x20x16x128xf32> to vector<20x16x128xf32>
      %15 = vector.extract_strided_slice %14 {offsets = [0, 0, 0], sizes = [16, 16, 128], strides = [1, 1, 1]} : vector<20x16x128xf32> to vector<16x16x128xf32>
      %c0_17 = arith.constant 0 : index
      %c0_18 = arith.constant 0 : index
      %c0_19 = arith.constant 0 : index
      %16 = vector.load %arg3[%c0_17, %c0_18, %c0_19] : memref<5x5x128xf32, #tpu.memory_space<vmem>>, vector<1x1x128xf32>
      %17 = vector.shape_cast %16 : vector<1x1x128xf32> to vector<128xf32>
      %18 = vector.shape_cast %17 : vector<128xf32> to vector<1x1x128xf32>
      %19 = vector.broadcast %18 : vector<1x1x128xf32> to vector<16x16x128xf32>
      %20 = arith.mulf %15, %19 : vector<16x16x128xf32>
      %21 = arith.addf %12, %20 : vector<16x16x128xf32>
      %22 = vector.extract_strided_slice %14 {offsets = [1, 0, 0], sizes = [16, 16, 128], strides = [1, 1, 1]} : vector<20x16x128xf32> to vector<16x16x128xf32>
      %c1 = arith.constant 1 : index
      %c0_20 = arith.constant 0 : index
      %c0_21 = arith.constant 0 : index
      %23 = vector.load %arg3[%c1, %c0_20, %c0_21] : memref<5x5x128xf32, #tpu.memory_space<vmem>>, vector<1x1x128xf32>
      %24 = vector.shape_cast %23 : vector<1x1x128xf32> to vector<128xf32>
      %25 = vector.shape_cast %24 : vector<128xf32> to vector<1x1x128xf32>
      %26 = vector.broadcast %25 : vector<1x1x128xf32> to vector<16x16x128xf32>
      %27 = arith.mulf %22, %26 : vector<16x16x128xf32>
      %28 = arith.addf %21, %27 : vector<16x16x128xf32>
      %29 = vector.extract_strided_slice %14 {offsets = [2, 0, 0], sizes = [16, 16, 128], strides = [1, 1, 1]} : vector<20x16x128xf32> to vector<16x16x128xf32>
      %c2 = arith.constant 2 : index
      %c0_22 = arith.constant 0 : index
      %c0_23 = arith.constant 0 : index
      %30 = vector.load %arg3[%c2, %c0_22, %c0_23] : memref<5x5x128xf32, #tpu.memory_space<vmem>>, vector<1x1x128xf32>
      %31 = vector.shape_cast %30 : vector<1x1x128xf32> to vector<128xf32>
      %32 = vector.shape_cast %31 : vector<128xf32> to vector<1x1x128xf32>
      %33 = vector.broadcast %32 : vector<1x1x128xf32> to vector<16x16x128xf32>
      %34 = arith.mulf %29, %33 : vector<16x16x128xf32>
      %35 = arith.addf %28, %34 : vector<16x16x128xf32>
      %36 = vector.extract_strided_slice %14 {offsets = [3, 0, 0], sizes = [16, 16, 128], strides = [1, 1, 1]} : vector<20x16x128xf32> to vector<16x16x128xf32>
      %c3 = arith.constant 3 : index
      %c0_24 = arith.constant 0 : index
      %c0_25 = arith.constant 0 : index
      %37 = vector.load %arg3[%c3, %c0_24, %c0_25] : memref<5x5x128xf32, #tpu.memory_space<vmem>>, vector<1x1x128xf32>
      %38 = vector.shape_cast %37 : vector<1x1x128xf32> to vector<128xf32>
      %39 = vector.shape_cast %38 : vector<128xf32> to vector<1x1x128xf32>
      %40 = vector.broadcast %39 : vector<1x1x128xf32> to vector<16x16x128xf32>
      %41 = arith.mulf %36, %40 : vector<16x16x128xf32>
      %42 = arith.addf %35, %41 : vector<16x16x128xf32>
      %43 = vector.extract_strided_slice %14 {offsets = [4, 0, 0], sizes = [16, 16, 128], strides = [1, 1, 1]} : vector<20x16x128xf32> to vector<16x16x128xf32>
      %c4 = arith.constant 4 : index
      %c0_26 = arith.constant 0 : index
      %c0_27 = arith.constant 0 : index
      %44 = vector.load %arg3[%c4, %c0_26, %c0_27] : memref<5x5x128xf32, #tpu.memory_space<vmem>>, vector<1x1x128xf32>
      %45 = vector.shape_cast %44 : vector<1x1x128xf32> to vector<128xf32>
      %46 = vector.shape_cast %45 : vector<128xf32> to vector<1x1x128xf32>
      %47 = vector.broadcast %46 : vector<1x1x128xf32> to vector<16x16x128xf32>
      %48 = arith.mulf %43, %47 : vector<16x16x128xf32>
      %49 = arith.addf %42, %48 : vector<16x16x128xf32>
      %c0_28 = arith.constant 0 : index
      %c0_29 = arith.constant 0 : index
      %c1_30 = arith.constant 1 : index
      %c0_31 = arith.constant 0 : index
      %50 = vector.load %arg2[%c0_28, %c0_29, %c1_30, %c0_31] : memref<1x20x20x128xf32, #tpu.memory_space<vmem>>, vector<1x20x16x128xf32>
      %51 = vector.shape_cast %50 : vector<1x20x16x128xf32> to vector<20x16x128xf32>
      %52 = vector.extract_strided_slice %51 {offsets = [0, 0, 0], sizes = [16, 16, 128], strides = [1, 1, 1]} : vector<20x16x128xf32> to vector<16x16x128xf32>
      %c0_32 = arith.constant 0 : index
      %c1_33 = arith.constant 1 : index
      %c0_34 = arith.constant 0 : index
      %53 = vector.load %arg3[%c0_32, %c1_33, %c0_34] : memref<5x5x128xf32, #tpu.memory_space<vmem>>, vector<1x1x128xf32>
      %54 = vector.shape_cast %53 : vector<1x1x128xf32> to vector<128xf32>
      %55 = vector.shape_cast %54 : vector<128xf32> to vector<1x1x128xf32>
      %56 = vector.broadcast %55 : vector<1x1x128xf32> to vector<16x16x128xf32>
      %57 = arith.mulf %52, %56 : vector<16x16x128xf32>
      %58 = arith.addf %49, %57 : vector<16x16x128xf32>
      %59 = vector.extract_strided_slice %51 {offsets = [1, 0, 0], sizes = [16, 16, 128], strides = [1, 1, 1]} : vector<20x16x128xf32> to vector<16x16x128xf32>
      %c1_35 = arith.constant 1 : index
      %c1_36 = arith.constant 1 : index
      %c0_37 = arith.constant 0 : index
      %60 = vector.load %arg3[%c1_35, %c1_36, %c0_37] : memref<5x5x128xf32, #tpu.memory_space<vmem>>, vector<1x1x128xf32>
      %61 = vector.shape_cast %60 : vector<1x1x128xf32> to vector<128xf32>
      %62 = vector.shape_cast %61 : vector<128xf32> to vector<1x1x128xf32>
      %63 = vector.broadcast %62 : vector<1x1x128xf32> to vector<16x16x128xf32>
      %64 = arith.mulf %59, %63 : vector<16x16x128xf32>
      %65 = arith.addf %58, %64 : vector<16x16x128xf32>
      %66 = vector.extract_strided_slice %51 {offsets = [2, 0, 0], sizes = [16, 16, 128], strides = [1, 1, 1]} : vector<20x16x128xf32> to vector<16x16x128xf32>
      %c2_38 = arith.constant 2 : index
      %c1_39 = arith.constant 1 : index
      %c0_40 = arith.constant 0 : index
      %67 = vector.load %arg3[%c2_38, %c1_39, %c0_40] : memref<5x5x128xf32, #tpu.memory_space<vmem>>, vector<1x1x128xf32>
      %68 = vector.shape_cast %67 : vector<1x1x128xf32> to vector<128xf32>
      %69 = vector.shape_cast %68 : vector<128xf32> to vector<1x1x128xf32>
      %70 = vector.broadcast %69 : vector<1x1x128xf32> to vector<16x16x128xf32>
      %71 = arith.mulf %66, %70 : vector<16x16x128xf32>
      %72 = arith.addf %65, %71 : vector<16x16x128xf32>
      %73 = vector.extract_strided_slice %51 {offsets = [3, 0, 0], sizes = [16, 16, 128], strides = [1, 1, 1]} : vector<20x16x128xf32> to vector<16x16x128xf32>
      %c3_41 = arith.constant 3 : index
      %c1_42 = arith.constant 1 : index
      %c0_43 = arith.constant 0 : index
      %74 = vector.load %arg3[%c3_41, %c1_42, %c0_43] : memref<5x5x128xf32, #tpu.memory_space<vmem>>, vector<1x1x128xf32>
      %75 = vector.shape_cast %74 : vector<1x1x128xf32> to vector<128xf32>
      %76 = vector.shape_cast %75 : vector<128xf32> to vector<1x1x128xf32>
      %77 = vector.broadcast %76 : vector<1x1x128xf32> to vector<16x16x128xf32>
      %78 = arith.mulf %73, %77 : vector<16x16x128xf32>
      %79 = arith.addf %72, %78 : vector<16x16x128xf32>
      %80 = vector.extract_strided_slice %51 {offsets = [4, 0, 0], sizes = [16, 16, 128], strides = [1, 1, 1]} : vector<20x16x128xf32> to vector<16x16x128xf32>
      %c4_44 = arith.constant 4 : index
      %c1_45 = arith.constant 1 : index
      %c0_46 = arith.constant 0 : index
      %81 = vector.load %arg3[%c4_44, %c1_45, %c0_46] : memref<5x5x128xf32, #tpu.memory_space<vmem>>, vector<1x1x128xf32>
      %82 = vector.shape_cast %81 : vector<1x1x128xf32> to vector<128xf32>
      %83 = vector.shape_cast %82 : vector<128xf32> to vector<1x1x128xf32>
      %84 = vector.broadcast %83 : vector<1x1x128xf32> to vector<16x16x128xf32>
      %85 = arith.mulf %80, %84 : vector<16x16x128xf32>
      %86 = arith.addf %79, %85 : vector<16x16x128xf32>
      %c0_47 = arith.constant 0 : index
      %c0_48 = arith.constant 0 : index
      %c2_49 = arith.constant 2 : index
      %c0_50 = arith.constant 0 : index
      %87 = vector.load %arg2[%c0_47, %c0_48, %c2_49, %c0_50] : memref<1x20x20x128xf32, #tpu.memory_space<vmem>>, vector<1x20x16x128xf32>
      %88 = vector.shape_cast %87 : vector<1x20x16x128xf32> to vector<20x16x128xf32>
      %89 = vector.extract_strided_slice %88 {offsets = [0, 0, 0], sizes = [16, 16, 128], strides = [1, 1, 1]} : vector<20x16x128xf32> to vector<16x16x128xf32>
      %c0_51 = arith.constant 0 : index
      %c2_52 = arith.constant 2 : index
      %c0_53 = arith.constant 0 : index
      %90 = vector.load %arg3[%c0_51, %c2_52, %c0_53] : memref<5x5x128xf32, #tpu.memory_space<vmem>>, vector<1x1x128xf32>
      %91 = vector.shape_cast %90 : vector<1x1x128xf32> to vector<128xf32>
      %92 = vector.shape_cast %91 : vector<128xf32> to vector<1x1x128xf32>
      %93 = vector.broadcast %92 : vector<1x1x128xf32> to vector<16x16x128xf32>
      %94 = arith.mulf %89, %93 : vector<16x16x128xf32>
      %95 = arith.addf %86, %94 : vector<16x16x128xf32>
      %96 = vector.extract_strided_slice %88 {offsets = [1, 0, 0], sizes = [16, 16, 128], strides = [1, 1, 1]} : vector<20x16x128xf32> to vector<16x16x128xf32>
      %c1_54 = arith.constant 1 : index
      %c2_55 = arith.constant 2 : index
      %c0_56 = arith.constant 0 : index
      %97 = vector.load %arg3[%c1_54, %c2_55, %c0_56] : memref<5x5x128xf32, #tpu.memory_space<vmem>>, vector<1x1x128xf32>
      %98 = vector.shape_cast %97 : vector<1x1x128xf32> to vector<128xf32>
      %99 = vector.shape_cast %98 : vector<128xf32> to vector<1x1x128xf32>
      %100 = vector.broadcast %99 : vector<1x1x128xf32> to vector<16x16x128xf32>
      %101 = arith.mulf %96, %100 : vector<16x16x128xf32>
      %102 = arith.addf %95, %101 : vector<16x16x128xf32>
      %103 = vector.extract_strided_slice %88 {offsets = [2, 0, 0], sizes = [16, 16, 128], strides = [1, 1, 1]} : vector<20x16x128xf32> to vector<16x16x128xf32>
      %c2_57 = arith.constant 2 : index
      %c2_58 = arith.constant 2 : index
      %c0_59 = arith.constant 0 : index
      %104 = vector.load %arg3[%c2_57, %c2_58, %c0_59] : memref<5x5x128xf32, #tpu.memory_space<vmem>>, vector<1x1x128xf32>
      %105 = vector.shape_cast %104 : vector<1x1x128xf32> to vector<128xf32>
      %106 = vector.shape_cast %105 : vector<128xf32> to vector<1x1x128xf32>
      %107 = vector.broadcast %106 : vector<1x1x128xf32> to vector<16x16x128xf32>
      %108 = arith.mulf %103, %107 : vector<16x16x128xf32>
      %109 = arith.addf %102, %108 : vector<16x16x128xf32>
      %110 = vector.extract_strided_slice %88 {offsets = [3, 0, 0], sizes = [16, 16, 128], strides = [1, 1, 1]} : vector<20x16x128xf32> to vector<16x16x128xf32>
      %c3_60 = arith.constant 3 : index
      %c2_61 = arith.constant 2 : index
      %c0_62 = arith.constant 0 : index
      %111 = vector.load %arg3[%c3_60, %c2_61, %c0_62] : memref<5x5x128xf32, #tpu.memory_space<vmem>>, vector<1x1x128xf32>
      %112 = vector.shape_cast %111 : vector<1x1x128xf32> to vector<128xf32>
      %113 = vector.shape_cast %112 : vector<128xf32> to vector<1x1x128xf32>
      %114 = vector.broadcast %113 : vector<1x1x128xf32> to vector<16x16x128xf32>
      %115 = arith.mulf %110, %114 : vector<16x16x128xf32>
      %116 = arith.addf %109, %115 : vector<16x16x128xf32>
      %117 = vector.extract_strided_slice %88 {offsets = [4, 0, 0], sizes = [16, 16, 128], strides = [1, 1, 1]} : vector<20x16x128xf32> to vector<16x16x128xf32>
      %c4_63 = arith.constant 4 : index
      %c2_64 = arith.constant 2 : index
      %c0_65 = arith.constant 0 : index
      %118 = vector.load %arg3[%c4_63, %c2_64, %c0_65] : memref<5x5x128xf32, #tpu.memory_space<vmem>>, vector<1x1x128xf32>
      %119 = vector.shape_cast %118 : vector<1x1x128xf32> to vector<128xf32>
      %120 = vector.shape_cast %119 : vector<128xf32> to vector<1x1x128xf32>
      %121 = vector.broadcast %120 : vector<1x1x128xf32> to vector<16x16x128xf32>
      %122 = arith.mulf %117, %121 : vector<16x16x128xf32>
      %123 = arith.addf %116, %122 : vector<16x16x128xf32>
      %c0_66 = arith.constant 0 : index
      %c0_67 = arith.constant 0 : index
      %c3_68 = arith.constant 3 : index
      %c0_69 = arith.constant 0 : index
      %124 = vector.load %arg2[%c0_66, %c0_67, %c3_68, %c0_69] : memref<1x20x20x128xf32, #tpu.memory_space<vmem>>, vector<1x20x16x128xf32>
      %125 = vector.shape_cast %124 : vector<1x20x16x128xf32> to vector<20x16x128xf32>
      %126 = vector.extract_strided_slice %125 {offsets = [0, 0, 0], sizes = [16, 16, 128], strides = [1, 1, 1]} : vector<20x16x128xf32> to vector<16x16x128xf32>
      %c0_70 = arith.constant 0 : index
      %c3_71 = arith.constant 3 : index
      %c0_72 = arith.constant 0 : index
      %127 = vector.load %arg3[%c0_70, %c3_71, %c0_72] : memref<5x5x128xf32, #tpu.memory_space<vmem>>, vector<1x1x128xf32>
      %128 = vector.shape_cast %127 : vector<1x1x128xf32> to vector<128xf32>
      %129 = vector.shape_cast %128 : vector<128xf32> to vector<1x1x128xf32>
      %130 = vector.broadcast %129 : vector<1x1x128xf32> to vector<16x16x128xf32>
      %131 = arith.mulf %126, %130 : vector<16x16x128xf32>
      %132 = arith.addf %123, %131 : vector<16x16x128xf32>
      %133 = vector.extract_strided_slice %125 {offsets = [1, 0, 0], sizes = [16, 16, 128], strides = [1, 1, 1]} : vector<20x16x128xf32> to vector<16x16x128xf32>
      %c1_73 = arith.constant 1 : index
      %c3_74 = arith.constant 3 : index
      %c0_75 = arith.constant 0 : index
      %134 = vector.load %arg3[%c1_73, %c3_74, %c0_75] : memref<5x5x128xf32, #tpu.memory_space<vmem>>, vector<1x1x128xf32>
      %135 = vector.shape_cast %134 : vector<1x1x128xf32> to vector<128xf32>
      %136 = vector.shape_cast %135 : vector<128xf32> to vector<1x1x128xf32>
      %137 = vector.broadcast %136 : vector<1x1x128xf32> to vector<16x16x128xf32>
      %138 = arith.mulf %133, %137 : vector<16x16x128xf32>
      %139 = arith.addf %132, %138 : vector<16x16x128xf32>
      %140 = vector.extract_strided_slice %125 {offsets = [2, 0, 0], sizes = [16, 16, 128], strides = [1, 1, 1]} : vector<20x16x128xf32> to vector<16x16x128xf32>
      %c2_76 = arith.constant 2 : index
      %c3_77 = arith.constant 3 : index
      %c0_78 = arith.constant 0 : index
      %141 = vector.load %arg3[%c2_76, %c3_77, %c0_78] : memref<5x5x128xf32, #tpu.memory_space<vmem>>, vector<1x1x128xf32>
      %142 = vector.shape_cast %141 : vector<1x1x128xf32> to vector<128xf32>
      %143 = vector.shape_cast %142 : vector<128xf32> to vector<1x1x128xf32>
      %144 = vector.broadcast %143 : vector<1x1x128xf32> to vector<16x16x128xf32>
      %145 = arith.mulf %140, %144 : vector<16x16x128xf32>
      %146 = arith.addf %139, %145 : vector<16x16x128xf32>
      %147 = vector.extract_strided_slice %125 {offsets = [3, 0, 0], sizes = [16, 16, 128], strides = [1, 1, 1]} : vector<20x16x128xf32> to vector<16x16x128xf32>
      %c3_79 = arith.constant 3 : index
      %c3_80 = arith.constant 3 : index
      %c0_81 = arith.constant 0 : index
      %148 = vector.load %arg3[%c3_79, %c3_80, %c0_81] : memref<5x5x128xf32, #tpu.memory_space<vmem>>, vector<1x1x128xf32>
      %149 = vector.shape_cast %148 : vector<1x1x128xf32> to vector<128xf32>
      %150 = vector.shape_cast %149 : vector<128xf32> to vector<1x1x128xf32>
      %151 = vector.broadcast %150 : vector<1x1x128xf32> to vector<16x16x128xf32>
      %152 = arith.mulf %147, %151 : vector<16x16x128xf32>
      %153 = arith.addf %146, %152 : vector<16x16x128xf32>
      %154 = vector.extract_strided_slice %125 {offsets = [4, 0, 0], sizes = [16, 16, 128], strides = [1, 1, 1]} : vector<20x16x128xf32> to vector<16x16x128xf32>
      %c4_82 = arith.constant 4 : index
      %c3_83 = arith.constant 3 : index
      %c0_84 = arith.constant 0 : index
      %155 = vector.load %arg3[%c4_82, %c3_83, %c0_84] : memref<5x5x128xf32, #tpu.memory_space<vmem>>, vector<1x1x128xf32>
      %156 = vector.shape_cast %155 : vector<1x1x128xf32> to vector<128xf32>
      %157 = vector.shape_cast %156 : vector<128xf32> to vector<1x1x128xf32>
      %158 = vector.broadcast %157 : vector<1x1x128xf32> to vector<16x16x128xf32>
      %159 = arith.mulf %154, %158 : vector<16x16x128xf32>
      %160 = arith.addf %153, %159 : vector<16x16x128xf32>
      %c0_85 = arith.constant 0 : index
      %c0_86 = arith.constant 0 : index
      %c4_87 = arith.constant 4 : index
      %c0_88 = arith.constant 0 : index
      %161 = vector.load %arg2[%c0_85, %c0_86, %c4_87, %c0_88] : memref<1x20x20x128xf32, #tpu.memory_space<vmem>>, vector<1x20x16x128xf32>
      %162 = vector.shape_cast %161 : vector<1x20x16x128xf32> to vector<20x16x128xf32>
      %163 = vector.extract_strided_slice %162 {offsets = [0, 0, 0], sizes = [16, 16, 128], strides = [1, 1, 1]} : vector<20x16x128xf32> to vector<16x16x128xf32>
      %c0_89 = arith.constant 0 : index
      %c4_90 = arith.constant 4 : index
      %c0_91 = arith.constant 0 : index
      %164 = vector.load %arg3[%c0_89, %c4_90, %c0_91] : memref<5x5x128xf32, #tpu.memory_space<vmem>>, vector<1x1x128xf32>
      %165 = vector.shape_cast %164 : vector<1x1x128xf32> to vector<128xf32>
      %166 = vector.shape_cast %165 : vector<128xf32> to vector<1x1x128xf32>
      %167 = vector.broadcast %166 : vector<1x1x128xf32> to vector<16x16x128xf32>
      %168 = arith.mulf %163, %167 : vector<16x16x128xf32>
      %169 = arith.addf %160, %168 : vector<16x16x128xf32>
      %170 = vector.extract_strided_slice %162 {offsets = [1, 0, 0], sizes = [16, 16, 128], strides = [1, 1, 1]} : vector<20x16x128xf32> to vector<16x16x128xf32>
      %c1_92 = arith.constant 1 : index
      %c4_93 = arith.constant 4 : index
      %c0_94 = arith.constant 0 : index
      %171 = vector.load %arg3[%c1_92, %c4_93, %c0_94] : memref<5x5x128xf32, #tpu.memory_space<vmem>>, vector<1x1x128xf32>
      %172 = vector.shape_cast %171 : vector<1x1x128xf32> to vector<128xf32>
      %173 = vector.shape_cast %172 : vector<128xf32> to vector<1x1x128xf32>
      %174 = vector.broadcast %173 : vector<1x1x128xf32> to vector<16x16x128xf32>
      %175 = arith.mulf %170, %174 : vector<16x16x128xf32>
      %176 = arith.addf %169, %175 : vector<16x16x128xf32>
      %177 = vector.extract_strided_slice %162 {offsets = [2, 0, 0], sizes = [16, 16, 128], strides = [1, 1, 1]} : vector<20x16x128xf32> to vector<16x16x128xf32>
      %c2_95 = arith.constant 2 : index
      %c4_96 = arith.constant 4 : index
      %c0_97 = arith.constant 0 : index
      %178 = vector.load %arg3[%c2_95, %c4_96, %c0_97] : memref<5x5x128xf32, #tpu.memory_space<vmem>>, vector<1x1x128xf32>
      %179 = vector.shape_cast %178 : vector<1x1x128xf32> to vector<128xf32>
      %180 = vector.shape_cast %179 : vector<128xf32> to vector<1x1x128xf32>
      %181 = vector.broadcast %180 : vector<1x1x128xf32> to vector<16x16x128xf32>
      %182 = arith.mulf %177, %181 : vector<16x16x128xf32>
      %183 = arith.addf %176, %182 : vector<16x16x128xf32>
      %184 = vector.extract_strided_slice %162 {offsets = [3, 0, 0], sizes = [16, 16, 128], strides = [1, 1, 1]} : vector<20x16x128xf32> to vector<16x16x128xf32>
      %c3_98 = arith.constant 3 : index
      %c4_99 = arith.constant 4 : index
      %c0_100 = arith.constant 0 : index
      %185 = vector.load %arg3[%c3_98, %c4_99, %c0_100] : memref<5x5x128xf32, #tpu.memory_space<vmem>>, vector<1x1x128xf32>
      %186 = vector.shape_cast %185 : vector<1x1x128xf32> to vector<128xf32>
      %187 = vector.shape_cast %186 : vector<128xf32> to vector<1x1x128xf32>
      %188 = vector.broadcast %187 : vector<1x1x128xf32> to vector<16x16x128xf32>
      %189 = arith.mulf %184, %188 : vector<16x16x128xf32>
      %190 = arith.addf %183, %189 : vector<16x16x128xf32>
      %191 = vector.extract_strided_slice %162 {offsets = [4, 0, 0], sizes = [16, 16, 128], strides = [1, 1, 1]} : vector<20x16x128xf32> to vector<16x16x128xf32>
      %c4_101 = arith.constant 4 : index
      %c4_102 = arith.constant 4 : index
      %c0_103 = arith.constant 0 : index
      %192 = vector.load %arg3[%c4_101, %c4_102, %c0_103] : memref<5x5x128xf32, #tpu.memory_space<vmem>>, vector<1x1x128xf32>
      %193 = vector.shape_cast %192 : vector<1x1x128xf32> to vector<128xf32>
      %194 = vector.shape_cast %193 : vector<128xf32> to vector<1x1x128xf32>
      %195 = vector.broadcast %194 : vector<1x1x128xf32> to vector<16x16x128xf32>
      %196 = arith.mulf %191, %195 : vector<16x16x128xf32>
      %197 = arith.addf %190, %196 : vector<16x16x128xf32>
      %c0_104 = arith.constant 0 : index
      %c0_105 = arith.constant 0 : index
      %198 = vector.load %arg4[%c0_104, %c0_105] : memref<1x128xf32, #tpu.memory_space<vmem>>, vector<1x128xf32>
      %199 = vector.shape_cast %198 : vector<1x128xf32> to vector<128xf32>
      %200 = vector.shape_cast %199 : vector<128xf32> to vector<1x1x128xf32>
      %201 = vector.broadcast %200 : vector<1x1x128xf32> to vector<16x16x128xf32>
      %202 = arith.mulf %197, %201 : vector<16x16x128xf32>
      %c0_106 = arith.constant 0 : index
      %c0_107 = arith.constant 0 : index
      %203 = vector.load %arg5[%c0_106, %c0_107] : memref<1x128xf32, #tpu.memory_space<vmem>>, vector<1x128xf32>
      %204 = vector.shape_cast %203 : vector<1x128xf32> to vector<128xf32>
      %205 = vector.shape_cast %204 : vector<128xf32> to vector<1x1x128xf32>
      %206 = vector.broadcast %205 : vector<1x1x128xf32> to vector<16x16x128xf32>
      %207 = arith.addf %202, %206 : vector<16x16x128xf32>
      %cst_108 = arith.constant 0.000000e+00 : f32
      %208 = vector.broadcast %cst_108 : f32 to vector<16x16x128xf32>
      %209 = arith.maximumf %207, %208 : vector<16x16x128xf32>
      %210 = vector.shape_cast %209 : vector<16x16x128xf32> to vector<256x128xf32>
      %211 = arith.truncf %210 : vector<256x128xf32> to vector<256x128xbf16>
      %c0_109 = arith.constant 0 : index
      %c0_110 = arith.constant 0 : index
      %212 = vector.load %arg6[%c0_109, %c0_110] : memref<128x32xf32, #tpu.memory_space<vmem>>, vector<128x32xf32>
      %213 = arith.truncf %212 : vector<128x32xf32> to vector<128x32xbf16>
      %cst_111 = arith.constant dense<0.000000e+00> : vector<256x32xf32>
      %214 = tpu.matmul %211, %213, %cst_111 {dimension_numbers = #tpu.dot_dimension_numbers<[1], [0], [0], [1], [0, 0, 1, 1], [], []>} : vector<256x128xbf16>, vector<128x32xbf16>, vector<256x32xf32> -> vector<256x32xf32>
      %c0_112 = arith.constant 0 : index
      %c0_113 = arith.constant 0 : index
      %215 = vector.load %arg7[%c0_112, %c0_113] : memref<1x32xf32, #tpu.memory_space<vmem>>, vector<1x32xf32>
      %216 = vector.broadcast %215 : vector<1x32xf32> to vector<256x32xf32>
      %217 = arith.mulf %214, %216 : vector<256x32xf32>
      %c0_114 = arith.constant 0 : index
      %c0_115 = arith.constant 0 : index
      %218 = vector.load %arg8[%c0_114, %c0_115] : memref<1x32xf32, #tpu.memory_space<vmem>>, vector<1x32xf32>
      %219 = vector.broadcast %218 : vector<1x32xf32> to vector<256x32xf32>
      %220 = arith.addf %217, %219 : vector<256x32xf32>
      %cst_116 = arith.constant 0.000000e+00 : f32
      %221 = vector.broadcast %cst_116 : f32 to vector<256x32xf32>
      %222 = arith.maximumf %220, %221 : vector<256x32xf32>
      %223 = vector.shape_cast %222 : vector<256x32xf32> to vector<16x16x32xf32>
      %c0_117 = arith.constant 0 : index
      %c0_118 = arith.constant 0 : index
      %224 = vector.load %arg9[%c0_117, %c0_118] : memref<1x32xf32, #tpu.memory_space<vmem>>, vector<1x32xf32>
      %225 = vector.shape_cast %224 : vector<1x32xf32> to vector<32xf32>
      %226 = vector.shape_cast %225 : vector<32xf32> to vector<1x1x32xf32>
      %227 = vector.broadcast %226 : vector<1x1x32xf32> to vector<16x16x32xf32>
      %228 = arith.mulf %223, %227 : vector<16x16x32xf32>
      %cst_119 = arith.constant dense<0.000000e+00> : vector<16x16xf32>
      %229 = vector.multi_reduction <add>, %228, %cst_119 [2] : vector<16x16x32xf32> to vector<16x16xf32>
      %c0_120 = arith.constant 0 : index
      %c0_121 = arith.constant 0 : index
      %c0_122 = arith.constant 0 : index
      %230 = vector.load %arg13[%c0_120, %c0_121, %c0_122] : memref<1x16x16xf32, #tpu.memory_space<vmem>>, vector<1x16x16xf32>
      %231 = vector.shape_cast %230 : vector<1x16x16xf32> to vector<16x16xf32>
      %232 = vector.shape_cast %229 : vector<16x16xf32> to vector<1x16x16xf32>
      tpu.vector_store %arg13[%c0_120, %c0_121, %c0_122], %232 {strides = array<i32>} : memref<1x16x16xf32, #tpu.memory_space<vmem>>, vector<1x16x16xf32>,
    } else {
    }
    %c0 = arith.constant 0 : index
    %c0_1 = arith.constant 0 : index
    %3 = vector.load %arg10[%c0, %c0_1] : memref<16x16xf32, #tpu.memory_space<vmem>>, vector<16x16xf32>
    %c0_2 = arith.constant 0 : index
    %c0_3 = arith.constant 0 : index
    %c0_4 = arith.constant 0 : index
    %4 = vector.load %arg13[%c0_2, %c0_3, %c0_4] : memref<1x16x16xf32, #tpu.memory_space<vmem>>, vector<1x16x16xf32>
    %5 = vector.shape_cast %4 : vector<1x16x16xf32> to vector<16x16xf32>
    %cst = arith.constant dense<0.000000e+00> : vector<16x16xf32>
    %6 = tpu.matmul %3, %5, %cst {dimension_numbers = #tpu.dot_dimension_numbers<[1], [0], [0], [1], [0, 0, 1, 1], [], []>} : vector<16x16xf32>, vector<16x16xf32>, vector<16x16xf32> -> vector<16x16xf32>
    %c0_5 = arith.constant 0 : index
    %c0_6 = arith.constant 0 : index
    %7 = vector.load %arg11[%c0_5, %c0_6] : memref<16x64xf32, #tpu.memory_space<vmem>>, vector<16x64xf32>
    %cst_7 = arith.constant dense<0.000000e+00> : vector<16x64xf32>
    %8 = tpu.matmul %6, %7, %cst_7 {dimension_numbers = #tpu.dot_dimension_numbers<[1], [0], [0], [1], [0, 0, 1, 1], [], []>} : vector<16x16xf32>, vector<16x64xf32>, vector<16x64xf32> -> vector<16x64xf32>
    %c0_8 = arith.constant 0 : index
    %c0_9 = arith.constant 0 : index
    %c0_10 = arith.constant 0 : index
    %c0_11 = arith.constant 0 : index
    %9 = vector.load %arg12[%c0_8, %c0_9, %c0_10, %c0_11] : memref<1x1x16x64xf32, #tpu.memory_space<vmem>>, vector<1x1x16x64xf32>
    %10 = vector.shape_cast %9 : vector<1x1x16x64xf32> to vector<16x64xf32>
    %11 = vector.shape_cast %8 : vector<16x64xf32> to vector<1x1x16x64xf32>
    tpu.vector_store %arg12[%c0_8, %c0_9, %c0_10, %c0_11], %11 {strides = array<i32>} : memref<1x1x16x64xf32, #tpu.memory_space<vmem>>, vector<1x1x16x64xf32>,
    return
  }
  func.func @transform_0(%arg0: i32, %arg1: i32) -> (i32, i32, i32, i32) {
    %c0_i32 = arith.constant 0 : i32
    %c0_i32_0 = arith.constant 0 : i32
    %c0_i32_1 = arith.constant 0 : i32
    %c0_i32_2 = arith.constant 0 : i32
    return %arg0, %c0_i32, %c0_i32_0, %c0_i32_1 : i32, i32, i32, i32
  }
  func.func @transform_1(%arg0: i32, %arg1: i32) -> (i32, i32, i32) {
    %c0_i32 = arith.constant 0 : i32
    %c0_i32_0 = arith.constant 0 : i32
    %c0_i32_1 = arith.constant 0 : i32
    %c0_i32_2 = arith.constant 0 : i32
    return %c0_i32, %c0_i32_0, %c0_i32_1 : i32, i32, i32
  }
  func.func @transform_2(%arg0: i32, %arg1: i32) -> (i32, i32) {
    %c0_i32 = arith.constant 0 : i32
    %c0_i32_0 = arith.constant 0 : i32
    %c0_i32_1 = arith.constant 0 : i32
    return %c0_i32, %c0_i32_0 : i32, i32
  }
  func.func @transform_3(%arg0: i32, %arg1: i32) -> (i32, i32) {
    %c0_i32 = arith.constant 0 : i32
    %c0_i32_0 = arith.constant 0 : i32
    %c0_i32_1 = arith.constant 0 : i32
    return %c0_i32, %c0_i32_0 : i32, i32
  }
  func.func @transform_4(%arg0: i32, %arg1: i32) -> (i32, i32) {
    %c0_i32 = arith.constant 0 : i32
    %c0_i32_0 = arith.constant 0 : i32
    %c0_i32_1 = arith.constant 0 : i32
    return %c0_i32, %c0_i32_0 : i32, i32
  }
  func.func @transform_5(%arg0: i32, %arg1: i32) -> (i32, i32) {
    %c0_i32 = arith.constant 0 : i32
    %c0_i32_0 = arith.constant 0 : i32
    %c0_i32_1 = arith.constant 0 : i32
    return %c0_i32, %c0_i32_0 : i32, i32
  }
  func.func @transform_6(%arg0: i32, %arg1: i32) -> (i32, i32) {
    %c0_i32 = arith.constant 0 : i32
    %c0_i32_0 = arith.constant 0 : i32
    %c0_i32_1 = arith.constant 0 : i32
    return %c0_i32, %c0_i32_0 : i32, i32
  }
  func.func @transform_7(%arg0: i32, %arg1: i32) -> (i32, i32) {
    %c0_i32 = arith.constant 0 : i32
    %c0_i32_0 = arith.constant 0 : i32
    %c0_i32_1 = arith.constant 0 : i32
    return %c0_i32, %c0_i32_0 : i32, i32
  }
  func.func @transform_8(%arg0: i32, %arg1: i32) -> (i32, i32) {
    %c0_i32 = arith.constant 0 : i32
    %c0_i32_0 = arith.constant 0 : i32
    return %arg1, %c0_i32 : i32, i32
  }
  func.func @transform_9(%arg0: i32, %arg1: i32) -> (i32, i32) {
    %c0_i32 = arith.constant 0 : i32
    %c0_i32_0 = arith.constant 0 : i32
    %c0_i32_1 = arith.constant 0 : i32
    return %c0_i32, %c0_i32_0 : i32, i32
  }
  func.func @transform_10(%arg0: i32, %arg1: i32) -> (i32, i32, i32, i32) {
    %c0_i32 = arith.constant 0 : i32
    %c0_i32_0 = arith.constant 0 : i32
    %c0_i32_1 = arith.constant 0 : i32
    return %arg0, %c0_i32, %arg1, %c0_i32_0 : i32, i32, i32, i32
  }
}

</mosaic_0001>

<bundles_post_ra>
// kernel: instance_center_head.1
= control target key start
LH: loop header
LB: loop body
LE: loop exit
PB: predicated region body
PF: predicated region fallthrough
CT: control target
= control target key end

     0   :  { %15 = vsyncpa [#allocation4], 0  ;;  %s7862_s0 = inlined_call_operand.vmem [shape: f32[2,20,20,128], index: 0, kind: input, shape index: {}]   ;;  %s7863_s1 = inlined_call_operand.vmem [shape: f32[5,5,128], index: 1, kind: input, shape index: {}]   ;;  %s7864_s2 = inlined_call_operand.vmem [shape: f32[1,128], index: 2, kind: input, shape index: {}]   ;;  %s7865_s3 = inlined_call_operand.vmem [shape: f32[1,128], index: 3, kind: input, shape index: {}]   ;;  %s7866_s4 = inlined_call_operand.vmem [shape: f32[128,32], index: 4, kind: input, shape index: {}]   ;;  %s7867_s5 = inlined_call_operand.vmem [shape: f32[1,32], index: 5, kind: input, shape index: {}]   ;;  %s7868_s6 = inlined_call_operand.vmem [shape: f32[1,32], index: 6, kind: input, shape index: {}]   ;;  %s7869_s7 = inlined_call_operand.vmem [shape: f32[1,32], index: 7, kind: input, shape index: {}]   ;;  %s7870_s8 = inlined_call_operand.vmem [shape: f32[64,16], index: 8, kind: input, shape index: {}]   ;;  %s7871_s9 = inlined_call_operand.vmem [shape: f32[16,64], index: 9, kind: input, shape index: {}]   ;;  %s7872_s10 = inlined_call_operand.hbm [shape: f32[2,1,64,64], index: 10, kind: output, shape index: {}]  }
   0x1   :  { %17 = vsyncpa [#allocation4 + $0x1], 0  ;;  %s4017_s13 = smov 0   ;;  %s4019_s14 = smov 0  }
   0x2   :  { %s4021_s15 = smov 0   ;;  %s4023_s16 = smov 0  }
   0x3   :  { %s4025_s17 = smov 0   ;;  %s4027_s18 = smov 0  }
   0x4   :  { %s4029_s19 = smov 0   ;;  %s4031_s20 = smov 0  }
   0x5 LB: > { %8291 = sst [smem:[#allocation6_spill]] %s3929_s13  ;;  %s3368_s21 = sadd.s32 4294967295, %s3957_s20   ;;  %s3957_s20 = sphi %s4031_s20, %s23_s20   ;;  %s3953_s19 = sphi %s4029_s19, %s8948_s19   ;;  %s3949_s18 = sphi %s4027_s18, %s8947_s18   ;;  %s3945_s17 = sphi %s4025_s17, %s8946_s17   ;;  %s3941_s16 = sphi %s4023_s16, %s8945_s16   ;;  %s3937_s15 = sphi %s4021_s15, %s8944_s15   ;;  %s3933_s14 = sphi %s4019_s14, %s8950_s14   ;;  %s3929_s13 = sphi %s4017_s13, %s8949_s13  }
   0x6   : > { %8292 = sst [smem:[#allocation7_spill]] %s3937_s15  ;;  %s3369_s22 = sadd.s32 4294967294, %s3957_s20  }
   0x7   : > { %8293 = sst [smem:[#allocation8_spill]] %s3949_s18  ;;  %s32_s23 = sadd.s32 1, %s3949_s18 }
   0x8   : > { %8294 = sst [smem:[#allocation9_spill]] %s3953_s19  ;;  %p33_p0 = scmp.ge.s32.totalorder %s32_s23, 4 }
   0x9   : > { %s35_s24 = sadd.s32 1, %s3953_s19  ;;  %p274_p1 = scmp.ne.s32.totalorder %s3937_s15, %s3933_s14 }
   0xa   : > { %p275_p2 = scmp.eq.s32.totalorder %s3368_s21, 7  ;;  %s8952_s23 = smov (%p33_p0, %s32_s23), 0 }
   0xb   : > { %8295 = sst [smem:[#allocation10_spill]] %s8952_s23  ;;  %s8954_s24 = smov (!%p33_p0, %s35_s24), %s3953_s19 }
   0xc   : > { %s260_s25 = ssub.s32 %s3949_s18, %s8952_s23  ;;  %p4068_p3 = por %p275_p2, %p274_p1 }
   0xd   : > { %p37_p4 = scmp.ge.s32.totalorder %s8954_s24, 2  ;;  %p280_p5 = scmp.ne.s32.totalorder %s3933_s14, %s3929_s13 }
   0xe   : > { %p281_p6 = scmp.eq.s32.totalorder %s3369_s22, 7  ;;  %p3372_p7 = scmp.ge.s32.totalorder %s3957_s20, 1 }
   0xf   : > { %s8956_s24 = smov (%p37_p4, %s8954_s24), 0  ;;  %p340_p9 = scmp.lt.s32.totalorder %s3957_s20, 9 }
  0x10   : > { %8297 = sst [smem:[#allocation11_spill]] %s8956_s24  ;;  %p4077_p8 = por %p281_p6, %p280_p5 }
  0x11   : > { %s259_s28 = ssub.s32 %s3953_s19, %s8956_s24  ;;  %s264_s29 = sadd.s32 1, %s3937_s15 }
  0x12   : > { %s8298_s27 = scalar_select %p4077_p8, 1, 0 }
  0x13   : > { %s261_s30 = sor.u32 %s260_s25, %s259_s28  ;;  %p341_p10 = pnand %p3372_p7, %p340_p9 }
  0x14   : > { %8299 = sst [smem:[#allocation12_spill]] %s8298_s27  ;;  %p262_p11 = scmp.eq.s32.totalorder %s261_s30, 0 }
  0x15   : > { %344 = sbr.rel (%p341_p10) target bundleno = 1276 (0x4fc), region = 60  ;;  %s7878_s12 = sand.u32 (!%p341_p10), 1, %s3933_s14  }
  0x16   : > { %s4086_s11 = scalar_select %p262_p11, %s3937_s15, %s264_s29  }
  0x17   : > { %p383_p12 = scmp.lt.s32.totalorder (!%p341_p10), %s3945_s17, 1  ;;  %s3373_s21 = sshll.u32 (!%p341_p10), %s7878_s12, 4 }
  0x18   : > { %8300 = sst [smem:[#allocation13_spill]] %s4086_s11  ;;  %s4093_s22 = sshll.u32 (!%p341_p10), %s3941_s16, 1 }
  0x19   : > { %p389_p13 = scmp.lt.s32.totalorder (!%p341_p10), %s4093_s22, 7  ;;  %s4108_s12 = scalar_lea.vmem (!%p341_p10), [#allocation3], %s3373_s21 }
  0x1a   : > { %s384_s25 = scalar_select %p383_p12, %s3945_s17, 1 }
  0x1b   : > { %s390_s28 = scalar_select %p389_p13, %s4093_s22, 7 }
  0x1c   : > { %s3548_s30 = smul.u32 480, %s384_s25  ;;  %p3377_p0 = scmp.ne.s32.totalorder %s3941_s16, 0 }
  0x1d   : > { %s3376_s29 = sshll.u32 %s390_s28, 3 }
  0x1e   : > { %s4101_s19 = scalar_lea.vmem %s7862_s0, %s3548_s30  ;;  %s4106_s15 = scalar_lea.vmem %s7870_s8, %s3376_s29 }
  0x1f   : > { %399 = sbr.rel (%p3377_p0) target bundleno = 860 (0x35c), region = 64 }
  0x24   : > { %v2469_v0 = vld [vmem:[%s7866_s4 + $0x70] sm:$0xff]  ;;  %v2470_v1 = vld [vmem:[%s7866_s4 + $0x78] sm:$0xff]  ;;  %v2467_v2 = vld [vmem:[%s7866_s4 + $0x60] sm:$0xff]  ;;  %vm2789_vm0 = vcmask 261120   ;;  %vm2929_vm1 = vcmask 130112   ;;  %vm3066_vm2 = vcmask 1041409  }
  0x25   : > { %v2478_v3 = vpack.c.bf16 %v2470_v1, %v2469_v0  ;;  %v2468_v4 = vld [vmem:[%s7866_s4 + $0x68] sm:$0xff]  ;;  %v2465_v6 = vld [vmem:[%s7866_s4 + $0x50] sm:$0xff]  ;;  %v2466_v7 = vld [vmem:[%s7866_s4 + $0x58] sm:$0xff]  ;;  %vm3068_vm3 = vcmask 1042434   ;;  %vm3070_vm4 = vcmask 1043459   ;;  %vm3072_vm5 = vcmask 1044484  }
  0x26   : > { %v2477_v5 = vpack.c.bf16 %v2468_v4, %v2467_v2  ;;  %v2476_v8 = vpack.c.bf16 %v2466_v7, %v2465_v6  ;;  %v2463_v9 = vld [vmem:[%s7866_s4 + $0x40] sm:$0xff]  ;;  %v2464_v10 = vld [vmem:[%s7866_s4 + $0x48] sm:$0xff]  ;;  %v2461_v11 = vld [vmem:[%s7866_s4 + $0x30] sm:$0xff]  ;;  %vm3074_vm6 = vcmask 1045509   ;;  %vm3076_vm7 = vcmask 1046534  }
  0x27   : > { %3470 = vmatprep.subr.bf16.mxu0 %v2478_v3  ;;  %3532 = vmatprep.subr.bf16.mxu1 %v2478_v3  ;;  %v2462_v12 = vld [vmem:[%s7866_s4 + $0x38] sm:$0xff]  ;;  %v2459_v13 = vld [vmem:[%s7866_s4 + $0x20] sm:$0xff]  ;;  %v2460_v14 = vld [vmem:[%s7866_s4 + $0x28] sm:$0xff]  ;;  %v2475_v24 = vpack.c.bf16 %v2464_v10, %v2463_v9  ;;  %vm3078_vm8 = vcmask 1047559   ;;  %vm3089_vm9 = vcmask 130048  }
  0x28   : > { %3471 = vmatpush3.bf16.msra.mxu0 %v2478_v3  ;;  %3540 = vmatpush3.bf16.msra.mxu1 %v2478_v3  ;;  %v400_v15 = vld [vmem:[%s4101_s19] sm:$0xff]  ;;  %v401_v16 = vld [vmem:[%s4101_s19 + $0x8] sm:$0xff]  ;;  %v402_v17 = vld [vmem:[%s4101_s19 + $0x18] sm:$0xff]  ;;  %v2474_v34 = vpack.c.bf16 %v2462_v12, %v2461_v11  ;;  %v4191_v35 = vpack.c.bf16 %v2460_v14, %v2459_v13 }
  0x29   : > { %3472 = vmatprep.subr.bf16.mxu0 %v2477_v5  ;;  %3533 = vmatprep.subr.bf16.mxu1 %v2477_v5  ;;  %v403_v18 = vld [vmem:[%s4101_s19 + $0x20] sm:$0xff]  ;;  %v404_v19 = vld [vmem:[%s4101_s19 + $0x30] sm:$0xff]  ;;  %v405_v21 = vld [vmem:[%s4101_s19 + $0x38] sm:$0xff] }
  0x2a   : > { %v2457_v20 = vld [vmem:[%s7866_s4 + $0x10] sm:$0xff]  ;;  %v4157_v22 = vld [vmem:[%s4101_s19 + $0x48] sm:$0xff]  ;;  %v4162_v23 = vld [vmem:[%s7863_s1] ss:$0 sm:$0xff] }
  0x2b   : > { %8301 = vst [vmem:[#allocation14_spill] sm:$0xff] %v4162_v23  ;;  %v445_v25 = vmul.f32 %v4162_v23, %v400_v15  ;;  %v446_v26 = vmul.f32 %v4162_v23, %v401_v16  ;;  %v4169_v27 = vld [vmem:[%s7863_s1 + $0x8] ss:$0 sm:$0xff]  ;;  %v4174_v28 = vld [vmem:[%s7863_s1 + $0x10] ss:$0 sm:$0xff]  ;;  %v2458_v30 = vld [vmem:[%s7866_s4 + $0x18] sm:$0xff]  ;;  %v4225_v51 = vmul.f32 %v4162_v23, %v402_v17  ;;  %v4231_v55 = vmul.f32 %v4162_v23, %v403_v18 }
  0x2c   : > { %3473 = vmatpush3.bf16.msra.mxu0 %v2477_v5  ;;  %3541 = vmatpush3.bf16.msra.mxu1 %v2477_v5  ;;  %8302 = vst [vmem:[#allocation15_spill] sm:$0xff] %v4169_v27  ;;  %v4179_v29 = vld [vmem:[%s7863_s1 + $0x18] ss:$0 sm:$0xff]  ;;  %v2455_v31 = vld [vmem:[%s7866_s4] sm:$0xff]  ;;  %v4188_v32 = vld [vmem:[%s4101_s19 + $0x50] sm:$0xff]  ;;  %v515_v33 = vmul.f32 %v4169_v27, %v402_v17  ;;  %v516_v38 = vmul.f32 %v4169_v27, %v403_v18 }
  0x2d   : > { %3474 = vmatprep.subr.bf16.mxu0 %v2476_v8  ;;  %3534 = vmatprep.subr.bf16.mxu1 %v2476_v8  ;;  %v2456_v36 = vld [vmem:[%s7866_s4 + $0x8] sm:$0xff]  ;;  %v4197_v37 = vld [vmem:[%s4101_s19 + $0x60] sm:$0xff]  ;;  %v585_v39 = vmul.f32 %v4174_v28, %v404_v19  ;;  %v586_v43 = vmul.f32 %v4174_v28, %v405_v21  ;;  %v655_v44 = vmul.f32 %v4179_v29, %v4157_v22  ;;  %v793_v3 = vld [vmem:[%s4101_s19 + $0x31] sm:$0xff] }
  0x2e   : > { %8303 = vst [vmem:[#allocation16_spill] sm:$0xff] %v4197_v37  ;;  %v4204_v40 = vld [vmem:[%s7863_s1 + $0x20] ss:$0 sm:$0xff]  ;;  %v4207_v41 = vld [vmem:[%s4101_s19 + $0x68] sm:$0xff]  ;;  %v547_v42 = vadd.f32 %v515_v33, %v445_v25  ;;  %v4212_v45 = vpack.c.bf16 %v2458_v30, %v2457_v20  ;;  %v548_v46 = vadd.f32 %v516_v38, %v446_v26  ;;  %v656_v47 = vmul.f32 %v4179_v29, %v4188_v32  ;;  %v4220_v49 = vld [vmem:[%s7863_s1 + $0x1] ss:$0 sm:$0xff] }
  0x2f   : > { %8304 = vst [vmem:[#allocation17_spill] sm:$0xff] %v4207_v41  ;;  %v789_v48 = vld [vmem:[%s4101_s19 + $0x1] sm:$0xff]  ;;  %v4222_v50 = vpack.c.bf16 %v2456_v36, %v2455_v31  ;;  %v725_v53 = vmul.f32 %v4204_v40, %v4197_v37  ;;  %v790_v54 = vld [vmem:[%s4101_s19 + $0x9] sm:$0xff]  ;;  %v4234_v56 = vmul.f32 %v4162_v23, %v404_v19  ;;  %v726_v58 = vmul.f32 %v4204_v40, %v4207_v41  ;;  %v791_v59 = vld [vmem:[%s4101_s19 + $0x19] sm:$0xff] }
  0x30   : > { %3475 = vmatpush3.bf16.msra.mxu0 %v2476_v8  ;;  %3542 = vmatpush3.bf16.msra.mxu1 %v2476_v8  ;;  %v617_v52 = vadd.f32 %v585_v39, %v547_v42  ;;  %v618_v57 = vadd.f32 %v586_v43, %v548_v46  ;;  %v4242_v60 = vld [vmem:[%s7863_s1 + $0x9] ss:$0 sm:$0xff]  ;;  %v4245_v61 = vmul.f32 %v4162_v23, %v405_v21  ;;  %v792_v63 = vld [vmem:[%s4101_s19 + $0x21] sm:$0xff]  ;;  %v4257_v5 = vld [vmem:[%s7863_s1 + $0x11] ss:$0 sm:$0xff] }
  0x31   : > { %3476 = vmatprep.subr.bf16.mxu0 %v2475_v24  ;;  %3535 = vmatprep.subr.bf16.mxu1 %v2475_v24  ;;  %8305 = vst [vmem:[#allocation18_spill] sm:$0xff] %v4234_v56  ;;  %8306 = vst [vmem:[#allocation19_spill] sm:$0xff] %v4242_v60  ;;  %v834_v0 = vmul.f32 %v4220_v49, %v789_v48  ;;  %v4250_v1 = vmul.f32 %v4169_v27, %v404_v19  ;;  %v794_v8 = vld [vmem:[%s4101_s19 + $0x39] sm:$0xff]  ;;  %v4268_v12 = vld [vmem:[%s4101_s19 + $0x49] sm:$0xff] }
  0x32   : > { %8307 = vst [vmem:[#allocation20_spill] sm:$0xff] %v4245_v61  ;;  %v687_v62 = vadd.f32 %v655_v44, %v617_v52  ;;  %v688_v2 = vadd.f32 %v656_v47, %v618_v57  ;;  %v835_v4 = vmul.f32 %v4220_v49, %v790_v54  ;;  %v4260_v6 = vmul.f32 %v4169_v27, %v405_v21  ;;  %v4280_v16 = vld [vmem:[%s7863_s1 + $0x19] ss:$0 sm:$0xff]  ;;  %v4283_v17 = vld [vmem:[%s4101_s19 + $0x51] sm:$0xff]  ;;  %v4286_v18 = vld [vmem:[%s4101_s19 + $0x61] sm:$0xff] }
  0x33   : > { %v4264_v9 = vmul.f32 %v4220_v49, %v791_v59  ;;  %v903_v10 = vmul.f32 %v4242_v60, %v791_v59  ;;  %8309 = vst [vmem:[#allocation22_spill] sm:$0xff] %v4268_v12  ;;  %v4271_v13 = vmul.f32 %v4220_v49, %v792_v63  ;;  %v4274_v14 = vmul.f32 %v4220_v49, %v793_v3  ;;  %v4300_v25 = vld [vmem:[%s4101_s19 + $0x69] sm:$0xff]  ;;  %v1176_v44 = vld [vmem:[%s4101_s19 + $0x1a] sm:$0xff] }
  0x34   : > { %3477 = vmatpush3.bf16.msra.mxu0 %v2475_v24  ;;  %3543 = vmatpush3.bf16.msra.mxu1 %v2475_v24  ;;  %v757_v7 = vadd.f32 %v725_v53, %v687_v62  ;;  %v758_v11 = vadd.f32 %v726_v58, %v688_v2  ;;  %v904_v15 = vmul.f32 %v4242_v60, %v792_v63  ;;  %v4295_v24 = vld [vmem:[%s7863_s1 + $0x21] ss:$0 sm:$0xff]  ;;  %v1174_v33 = vld [vmem:[%s4101_s19 + $0x2] sm:$0xff]  ;;  %v1175_v43 = vld [vmem:[%s4101_s19 + $0xa] sm:$0xff] }
  0x35   : > { %3478 = vmatprep.subr.bf16.mxu0 %v2474_v34  ;;  %3536 = vmatprep.subr.bf16.mxu1 %v2474_v34  ;;  %8308 = vst [vmem:[#allocation21_spill] sm:$0xff] %v4264_v9  ;;  %8310 = vst [vmem:[#allocation23_spill] sm:$0xff] %v4271_v13  ;;  %v4289_v19 = vmul.f32 %v4220_v49, %v794_v8  ;;  %v972_v21 = vmul.f32 %v4257_v5, %v793_v3  ;;  %v1177_v53 = vld [vmem:[%s4101_s19 + $0x22] sm:$0xff]  ;;  %v4340_v59 = vld [vmem:[%s7863_s1 + $0xa] ss:$0 sm:$0xff] }
  0x36   : > { %8311 = vst [vmem:[#allocation24_spill] sm:$0xff] %v4274_v14  ;;  %8312 = vst [vmem:[#allocation25_spill] sm:$0xff] %v4283_v17  ;;  %v866_v20 = vadd.f32 %v834_v0, %v757_v7  ;;  %v4304_v26 = vmul.f32 %v4220_v49, %v4268_v12  ;;  %v867_v30 = vadd.f32 %v835_v4, %v758_v11  ;;  %v1178_v63 = vld [vmem:[%s4101_s19 + $0x32] sm:$0xff]  ;;  %v4351_v4 = vld [vmem:[%s4101_s19 + $0x4a] sm:$0xff] }
  0x37   : > { %8313 = vst [vmem:[#allocation26_spill] sm:$0xff] %v4286_v18  ;;  %8314 = vst [vmem:[#allocation27_spill] sm:$0xff] %v4289_v19  ;;  %v973_v31 = vmul.f32 %v4257_v5, %v794_v8  ;;  %v4315_v36 = vmul.f32 %v4220_v49, %v4283_v17  ;;  %v4318_v38 = vmul.f32 %v4242_v60, %v793_v3  ;;  %v4354_v7 = vld [vmem:[%s4101_s19 + $0x52] sm:$0xff]  ;;  %v805_v41 = vld [vmem:[%s4101_s19 + $0xc1] sm:$0xff] }
  0x38   : > { %3479 = vmatpush3.bf16.msra.mxu0 %v2474_v34  ;;  %3544 = vmatpush3.bf16.msra.mxu1 %v2474_v34  ;;  %8315 = vst [vmem:[#allocation28_spill] sm:$0xff] %v4300_v25  ;;  %8316 = vst [vmem:[#allocation29_spill] sm:$0xff] %v4304_v26  ;;  %v4311_v34 = vld [vmem:[%s7863_s1 + $0x2] ss:$0 sm:$0xff]  ;;  %v935_v39 = vadd.f32 %v903_v10, %v866_v20  ;;  %v1041_v42 = vmul.f32 %v4280_v16, %v4268_v12  ;;  %v1563_v19 = vld [vmem:[%s4101_s19 + $0x33] sm:$0xff] }
  0x39   : > { %3480 = vmatprep.subr.bf16.mxu0 %v4191_v35  ;;  %3537 = vmatprep.subr.bf16.mxu1 %v4191_v35  ;;  %8317 = vst [vmem:[#allocation30_spill] sm:$0xff] %v4311_v34  ;;  %8318 = vst [vmem:[#allocation31_spill] sm:$0xff] %v4315_v36  ;;  %v4325_v46 = vmul.f32 %v4242_v60, %v794_v8  ;;  %v936_v47 = vadd.f32 %v904_v15, %v867_v30  ;;  %v4368_v15 = vld [vmem:[%s7863_s1 + $0x12] ss:$0 sm:$0xff]  ;;  %v4374_v30 = vld [vmem:[%s4101_s19 + $0x6a] sm:$0xff] }
  0x3a   : > { %8319 = vst [vmem:[#allocation32_spill] sm:$0xff] %v4318_v38  ;;  %v1042_v48 = vmul.f32 %v4280_v16, %v4283_v17  ;;  %v1110_v52 = vmul.f32 %v4295_v24, %v4286_v18  ;;  %v1004_v54 = vadd.f32 %v972_v21, %v935_v39  ;;  %v1111_v57 = vmul.f32 %v4295_v24, %v4300_v25  ;;  %v4371_v21 = vld [vmem:[%s4101_s19 + $0x62] sm:$0xff]  ;;  %v4439_v14 = vld [vmem:[%s4101_s19 + $0x53] sm:$0xff]  ;;  %v4590_v17 = vld [vmem:[%s7863_s1 + $0x1c] ss:$0 sm:$0xff] }
  0x3b   : > { %8320 = vst [vmem:[#allocation33_spill] sm:$0xff] %v4325_v46  ;;  %v1219_v58 = vmul.f32 %v4311_v34, %v1174_v33  ;;  %8321 = vst [vmem:[#allocation34_spill] sm:$0xff] %v4340_v59  ;;  %v1005_v62 = vadd.f32 %v973_v31, %v936_v47  ;;  %v1220_v0 = vmul.f32 %v4311_v34, %v1175_v43  ;;  %v4593_v12 = vld [vmem:[%s4101_s19 + $0x120] sm:$0xff]  ;;  %v806_v37 = vld [vmem:[%s4101_s19 + $0xc9] sm:$0xff] }
  0x3c   : > { %3481 = vmatpush3.bf16.msra.mxu0 %v4191_v35  ;;  %3545 = vmatpush3.bf16.msra.mxu1 %v4191_v35  ;;  %v1179_v35 = vld [vmem:[%s4101_s19 + $0x3a] sm:$0xff]  ;;  %v4348_v2 = vmul.f32 %v4311_v34, %v1176_v44  ;;  %v1073_v3 = vadd.f32 %v1041_v42, %v1004_v54  ;;  %8323 = vst [vmem:[#allocation36_spill] sm:$0xff] %v4351_v4  ;;  %8324 = vst [vmem:[#allocation37_spill] sm:$0xff] %v4354_v7  ;;  %v1559_v54 = vld [vmem:[%s4101_s19 + $0x3] sm:$0xff] }
  0x3d   : > { %3482 = vmatprep.subr.bf16.mxu0 %v4212_v45  ;;  %3538 = vmatprep.subr.bf16.mxu1 %v4212_v45  ;;  %v4357_v8 = vmul.f32 %v4311_v34, %v1177_v53  ;;  %v4360_v10 = vmul.f32 %v4311_v34, %v1178_v63  ;;  %v4363_v11 = vmul.f32 %v4311_v34, %v1179_v35  ;;  %v4388_v42 = vld [vmem:[%s7863_s1 + $0x1a] ss:$0 sm:$0xff] }
  0x3e   : > { %8322 = vst [vmem:[#allocation35_spill] sm:$0xff] %v4348_v2  ;;  %v1074_v20 = vadd.f32 %v1042_v48, %v1005_v62  ;;  %8328 = vst [vmem:[#allocation41_spill] sm:$0xff] %v4371_v21  ;;  %v4378_v31 = vmul.f32 %v4311_v34, %v4351_v4  ;;  %v4382_v33 = vmul.f32 %v4311_v34, %v4354_v7  ;;  %v4405_v62 = vld [vmem:[%s7863_s1 + $0x3] ss:$0 sm:$0xff] }
  0x3f   : > { %8325 = vst [vmem:[#allocation38_spill] sm:$0xff] %v4357_v8  ;;  %8326 = vst [vmem:[#allocation39_spill] sm:$0xff] %v4360_v10  ;;  %v1288_v39 = vmul.f32 %v4340_v59, %v1176_v44  ;;  %v1142_v43 = vadd.f32 %v1110_v52, %v1073_v3  ;;  %v1289_v47 = vmul.f32 %v4340_v59, %v1177_v53  ;;  %v4399_v44 = vld [vmem:[%s7863_s1 + $0x22] ss:$0 sm:$0xff]  ;;  %v1560_v3 = vld [vmem:[%s4101_s19 + $0xb] sm:$0xff] }
  0x40   : > { %8327 = vst [vmem:[#allocation40_spill] sm:$0xff] %v4363_v11  ;;  %8329 = vst [vmem:[#allocation42_spill] sm:$0xff] %v4374_v30  ;;  %3483 = vmatpush3.bf16.msra.mxu0 %v4212_v45  ;;  %3546 = vmatpush3.bf16.msra.mxu1 %v4212_v45  ;;  %v4394_v48 = vmul.f32 %v4340_v59, %v1178_v63  ;;  %v1143_v45 = vadd.f32 %v1111_v57, %v1074_v20  ;;  %v1562_v57 = vld [vmem:[%s4101_s19 + $0x23] sm:$0xff] }
  0x41   : > { %8330 = vst [vmem:[#allocation43_spill] sm:$0xff] %v4378_v31  ;;  %8331 = vst [vmem:[#allocation44_spill] sm:$0xff] %v4382_v33  ;;  %3484 = vmatprep.subr.bf16.mxu0 %v4222_v50  ;;  %3539 = vmatprep.subr.bf16.mxu1 %v4222_v50  ;;  %v4410_v52 = vmul.f32 %v4340_v59, %v1179_v35  ;;  %v1357_v53 = vmul.f32 %v4368_v15, %v1178_v63  ;;  %v1561_v33 = vld [vmem:[%s4101_s19 + $0x1b] sm:$0xff]  ;;  %v1944_v8 = vld [vmem:[%s4101_s19 + $0x4] sm:$0xff] }
  0x42   : > { %8332 = vst [vmem:[#allocation45_spill] sm:$0xff] %v4394_v48  ;;  %8333 = vst [vmem:[#allocation46_spill] sm:$0xff] %v4405_v62  ;;  %v1251_v31 = vadd.f32 %v1219_v58, %v1142_v43  ;;  %v1358_v36 = vmul.f32 %v4368_v15, %v1179_v35  ;;  %v1426_v26 = vmul.f32 %v4388_v42, %v4351_v4  ;;  %v4430_v35 = vld [vmem:[%s7863_s1 + $0xb] ss:$0 sm:$0xff]  ;;  %v1564_v43 = vld [vmem:[%s4101_s19 + $0x3b] sm:$0xff] }
  0x43   : > { %8334 = vst [vmem:[#allocation47_spill] sm:$0xff] %v4410_v52  ;;  %v1427_v11 = vmul.f32 %v4388_v42, %v4354_v7  ;;  %v1252_v20 = vadd.f32 %v1220_v0, %v1143_v45  ;;  %v1495_v63 = vmul.f32 %v4399_v44, %v4371_v21  ;;  %v1496_v10 = vmul.f32 %v4399_v44, %v4374_v30  ;;  %v4436_v45 = vld [vmem:[%s4101_s19 + $0x4b] sm:$0xff]  ;;  %v4446_v52 = vld [vmem:[%s4101_s19 + $0x63] sm:$0xff] }
  0x44   : > { %v1604_v58 = vmul.f32 %v4405_v62, %v1559_v54  ;;  %8335 = vst [vmem:[#allocation48_spill] sm:$0xff] %v4430_v35  ;;  %3485 = vmatpush3.bf16.msra.mxu0 %v4222_v50  ;;  %3547 = vmatpush3.bf16.msra.mxu1 %v4222_v50  ;;  %v1320_v0 = vadd.f32 %v1288_v39, %v1251_v31  ;;  %8336 = vst [vmem:[#allocation49_spill] sm:$0xff] %v4436_v45  ;;  %v4460_v39 = vld [vmem:[%s7863_s1 + $0x13] ss:$0 sm:$0xff]  ;;  %v4497_v30 = vld [vmem:[%s7863_s1 + $0x4] ss:$0 sm:$0xff] }
  0x45   : > { %8337 = vst [vmem:[#allocation50_spill] sm:$0xff] %v4439_v14  ;;  %v1605_v61 = vmul.f32 %v4405_v62, %v1560_v3  ;;  %v4443_v54 = vmul.f32 %v4405_v62, %v1561_v33  ;;  %v1321_v56 = vadd.f32 %v1289_v47, %v1252_v20  ;;  %8339 = vst [vmem:[#allocation52_spill] sm:$0xff] %v4446_v52  ;;  %v4465_v47 = vld [vmem:[%s7863_s1 + $0x1b] ss:$0 sm:$0xff]  ;;  %v4468_v20 = vld [vmem:[%s4101_s19 + $0x6b] sm:$0xff] }
  0x46   : > { %v4449_v48 = vmul.f32 %v4405_v62, %v1562_v57  ;;  %v4452_v50 = vmul.f32 %v4405_v62, %v1563_v19  ;;  %v4455_v31 = vmul.f32 %v4405_v62, %v1564_v43  ;;  %8343 = vst [vmem:[#allocation56_spill] sm:$0xff] %v4460_v39  ;;  %8344 = vst [vmem:[#allocation57_spill] sm:$0xff] %v4465_v47  ;;  %v417_v7 = vld [vmem:[%s4101_s19 + $0xc8] sm:$0xff] }
  0x47   : > { %8338 = vst [vmem:[#allocation51_spill] sm:$0xff] %v4443_v54  ;;  %v1389_v3 = vadd.f32 %v1357_v53, %v1320_v0  ;;  %8345 = vst [vmem:[#allocation58_spill] sm:$0xff] %v4468_v20  ;;  %v4482_v54 = vld [vmem:[%s7863_s1 + $0x23] ss:$0 sm:$0xff]  ;;  %v1390_v53 = vadd.f32 %v1358_v36, %v1321_v56  ;;  %v1674_v0 = vmul.f32 %v4430_v35, %v1562_v57 }
  0x48   : > { %8340 = vst [vmem:[#allocation53_spill] sm:$0xff] %v4449_v48  ;;  %8341 = vst [vmem:[#allocation54_spill] sm:$0xff] %v4452_v50  ;;  %v4472_v50 = vmul.f32 %v4405_v62, %v4436_v45  ;;  %v1673_v48 = vmul.f32 %v4430_v35, %v1561_v33  ;;  %v4490_v2 = vmul.f32 %v4430_v35, %v1564_v43  ;;  %v1946_v33 = vld [vmem:[%s4101_s19 + $0x1c] sm:$0xff] }
  0x49   : > { %8342 = vst [vmem:[#allocation55_spill] sm:$0xff] %v4455_v31  ;;  %v4476_v31 = vmul.f32 %v4405_v62, %v4439_v14  ;;  %8348 = vst [vmem:[#allocation61_spill] sm:$0xff] %v4482_v54  ;;  %v1458_v46 = vadd.f32 %v1426_v26, %v1389_v3  ;;  %v1742_v56 = vmul.f32 %v4460_v39, %v1563_v19  ;;  %v1948_v26 = vld [vmem:[%s4101_s19 + $0x34] sm:$0xff] }
  0x4a   : > { %8346 = vst [vmem:[#allocation59_spill] sm:$0xff] %v4472_v50  ;;  %v4487_v50 = vmul.f32 %v4430_v35, %v1563_v19  ;;  %8350 = vst [vmem:[#allocation63_spill] sm:$0xff] %v4490_v2  ;;  %v1743_v36 = vmul.f32 %v4460_v39, %v1564_v43  ;;  %v1811_v57 = vmul.f32 %v4465_v47, %v4436_v45  ;;  %v4518_v43 = vld [vmem:[%s4101_s19 + $0x3c] sm:$0xff] }
  0x4b   : > { %8347 = vst [vmem:[#allocation60_spill] sm:$0xff] %v4476_v31  ;;  %v1945_v31 = vld [vmem:[%s4101_s19 + $0xc] sm:$0xff]  ;;  %8351 = vst [vmem:[#allocation64_spill] sm:$0xff] %v4497_v30  ;;  %v1459_v2 = vadd.f32 %v1427_v11, %v1390_v53  ;;  %v4506_v38 = vmul.f32 %v4465_v47, %v4439_v14  ;;  %v4510_v21 = vmul.f32 %v4482_v54, %v4446_v52  ;;  %v416_v45 = vld [vmem:[%s4101_s19 + $0xc0] sm:$0xff] }
  0x4c   : > { %8349 = vst [vmem:[#allocation62_spill] sm:$0xff] %v4487_v50  ;;  %v1947_v50 = vld [vmem:[%s4101_s19 + $0x24] sm:$0xff]  ;;  %v4514_v19 = vmul.f32 %v4482_v54, %v4468_v20  ;;  %8352 = vst [vmem:[#allocation65_spill] sm:$0xff] %v4518_v43  ;;  %v4523_v11 = vld [vmem:[%s7863_s1 + $0xc] ss:$0 sm:$0xff]  ;;  %v1527_v3 = vadd.f32 %v1495_v63, %v1458_v46  ;;  %v4529_v52 = vmul.f32 %v4497_v30, %v1944_v8 }
  0x4d   : > { %v4526_v53 = vld [vmem:[%s4101_s19 + $0x4c] sm:$0xff]  ;;  %v4532_v14 = vmul.f32 %v4497_v30, %v1945_v31  ;;  %v4535_v20 = vmul.f32 %v4497_v30, %v1946_v33  ;;  %v1528_v4 = vadd.f32 %v1496_v10, %v1459_v2  ;;  %v4540_v13 = vmul.f32 %v4497_v30, %v1947_v50  ;;  %v4550_v63 = vld [vmem:[%s4101_s19 + $0xd8] sm:$0xff]  ;;  %v4553_v31 = vld [vmem:[%s4101_s19 + $0xe0] sm:$0xff]  ;;  %8366 = vst [vmem:[#allocation79_spill] sm:$0xff] %v4593_v12 }
  0x4e   : > { %8353 = vst [vmem:[#allocation66_spill] sm:$0xff] %v4526_v53  ;;  %v4543_v46 = vmul.f32 %v4497_v30, %v1948_v26  ;;  %v4547_v8 = vmul.f32 %v4497_v30, %v4518_v43  ;;  %8358 = vst [vmem:[#allocation71_spill] sm:$0xff] %v4550_v63  ;;  %v1636_v9 = vadd.f32 %v1604_v58, %v1527_v3  ;;  %v4577_v58 = vld [vmem:[%s4101_s19 + $0x108] sm:$0xff] }
  0x4f   : > { %8354 = vst [vmem:[#allocation67_spill] sm:$0xff] %v4535_v20  ;;  %8355 = vst [vmem:[#allocation68_spill] sm:$0xff] %v4540_v13  ;;  %v4556_v20 = vld [vmem:[%s4101_s19 + $0xf0] sm:$0xff]  ;;  %v4560_v2 = vmul.f32 %v4497_v30, %v4526_v53  ;;  %v4563_v10 = vmul.f32 %v4523_v11, %v1946_v33  ;;  %v4574_v13 = vld [vmem:[%s4101_s19 + $0xf8] sm:$0xff]  ;;  %v1637_v3 = vadd.f32 %v1605_v61, %v1528_v4 }
  0x50   : > { %8356 = vst [vmem:[#allocation69_spill] sm:$0xff] %v4543_v46  ;;  %8357 = vst [vmem:[#allocation70_spill] sm:$0xff] %v4547_v8  ;;  %v4566_v46 = vmul.f32 %v4523_v11, %v1947_v50  ;;  %v4571_v8 = vld [vmem:[%s7863_s1 + $0x14] ss:$0 sm:$0xff]  ;;  %v461_v50 = vmul.f32 %v4162_v23, %v416_v45  ;;  %v462_v25 = vmul.f32 %v4162_v23, %v417_v7 }
  0x51   : > { %8359 = vst [vmem:[#allocation72_spill] sm:$0xff] %v4553_v31  ;;  %8360 = vst [vmem:[#allocation73_spill] sm:$0xff] %v4556_v20  ;;  %v4583_v33 = vld [vmem:[%s4101_s19 + $0x110] sm:$0xff]  ;;  %v1705_v18 = vadd.f32 %v1673_v48, %v1636_v9  ;;  %v531_v61 = vmul.f32 %v4169_v27, %v4550_v63  ;;  %v532_v4 = vmul.f32 %v4169_v27, %v4553_v31  ;;  %v4608_v48 = vld [vmem:[%s4101_s19 + $0x128] sm:$0xff] }
  0x52   : > { %8361 = vst [vmem:[#allocation74_spill] sm:$0xff] %v4560_v2  ;;  %8362 = vst [vmem:[#allocation75_spill] sm:$0xff] %v4574_v13  ;;  %v4580_v2 = vmul.f32 %v4523_v11, %v1948_v26  ;;  %v601_v45 = vmul.f32 %v4174_v28, %v4556_v20  ;;  %v4602_v7 = vld [vmem:[%s4101_s19 + $0x54] sm:$0xff]  ;;  %v4605_v9 = vmul.f32 %v4571_v8, %v1948_v26  ;;  %v4615_v31 = vld [vmem:[%s4101_s19 + $0x64] sm:$0xff] }
  0x53   : > { %8363 = vst [vmem:[#allocation76_spill] sm:$0xff] %v4577_v58  ;;  %8365 = vst [vmem:[#allocation78_spill] sm:$0xff] %v4583_v33  ;;  %v602_v23 = vmul.f32 %v4174_v28, %v4574_v13  ;;  %v671_v63 = vmul.f32 %v4179_v29, %v4577_v58  ;;  %v1774_v27 = vadd.f32 %v1742_v56, %v1705_v18 }
  0x54   : > { %8364 = vst [vmem:[#allocation77_spill] sm:$0xff] %v4580_v2  ;;  %v1706_v2 = vadd.f32 %v1674_v0, %v1637_v3  ;;  %8367 = vst [vmem:[#allocation80_spill] sm:$0xff] %v4602_v7  ;;  %v4620_v0 = vld [vmem:[%s7863_s1 + $0x24] ss:$0 sm:$0xff]  ;;  %v563_v26 = vadd.f32 %v531_v61, %v461_v50  ;;  %v564_v3 = vadd.f32 %v532_v4, %v462_v25  ;;  %v4635_v25 = vld [vmem:[%s4101_s19 + $0x6c] sm:$0xff] }
  0x55   : > { %8368 = vst [vmem:[#allocation81_spill] sm:$0xff] %v4608_v48  ;;  %8369 = vst [vmem:[#allocation82_spill] sm:$0xff] %v4615_v31  ;;  %v672_v20 = vmul.f32 %v4179_v29, %v4583_v33  ;;  %v2128_v18 = vmul.f32 %v4571_v8, %v4518_v43  ;;  %v4629_v56 = vmul.f32 %v4590_v17, %v4526_v53  ;;  %v4643_v53 = vld [vmem:[%s4101_s19 + $0xe1] sm:$0xff] }
  0x56   : > { %v1775_v13 = vadd.f32 %v1743_v36, %v1706_v2  ;;  %v741_v58 = vmul.f32 %v4204_v40, %v4593_v12  ;;  %v1843_v50 = vadd.f32 %v1811_v57, %v1774_v27  ;;  %8370 = vst [vmem:[#allocation83_spill] sm:$0xff] %v4635_v25  ;;  %v633_v61 = vadd.f32 %v601_v45, %v563_v26  ;;  %v4640_v2 = vld [vmem:[%s4101_s19 + $0xd9] sm:$0xff]  ;;  %v4653_v57 = vld [vmem:[%s4101_s19 + $0xf1] sm:$0xff]  ;;  %v4671_v33 = vld [vmem:[%s4101_s19 + $0x121] sm:$0xff] }
  0x57   : > { %v634_v4 = vadd.f32 %v602_v23, %v564_v3  ;;  %v742_v36 = vmul.f32 %v4204_v40, %v4608_v48  ;;  %8371 = vst [vmem:[#allocation84_spill] sm:$0xff] %v4643_v53  ;;  %v2197_v12 = vmul.f32 %v4590_v17, %v4602_v7  ;;  %v4650_v27 = vmul.f32 %v4620_v0, %v4615_v31  ;;  %v4658_v48 = vld [vmem:[%s4101_s19 + $0xf9] sm:$0xff] }
  0x58   : > { %v1844_v43 = vadd.f32 %v4506_v38, %v1775_v13  ;;  %8372 = vst [vmem:[#allocation85_spill] sm:$0xff] %v4653_v57  ;;  %v850_v23 = vmul.f32 %v4220_v49, %v805_v41  ;;  %v1912_v45 = vadd.f32 %v4510_v21, %v1843_v50  ;;  %v703_v26 = vadd.f32 %v671_v63, %v633_v61  ;;  %v4661_v13 = vld [vmem:[%s4101_s19 + $0x109] sm:$0xff]  ;;  %v4664_v38 = vld [vmem:[%s4101_s19 + $0x111] sm:$0xff] }
  0x59   : > { %v704_v3 = vadd.f32 %v672_v20, %v634_v4  ;;  %8373 = vst [vmem:[#allocation86_spill] sm:$0xff] %v4658_v48  ;;  %8374 = vst [vmem:[#allocation87_spill] sm:$0xff] %v4661_v13  ;;  %v851_v31 = vmul.f32 %v4220_v49, %v806_v37  ;;  %v2266_v41 = vmul.f32 %v4620_v0, %v4635_v25  ;;  %v1190_v61 = vld [vmem:[%s4101_s19 + $0xc2] sm:$0xff]  ;;  %v1191_v4 = vld [vmem:[%s4101_s19 + $0xca] sm:$0xff] }
  0x5a   : > { %8375 = vst [vmem:[#allocation88_spill] sm:$0xff] %v4664_v38  ;;  %v1913_v7 = vadd.f32 %v4514_v19, %v1844_v43  ;;  %8376 = vst [vmem:[#allocation89_spill] sm:$0xff] %v4671_v33  ;;  %v919_v21 = vmul.f32 %v4242_v60, %v4640_v2  ;;  %v920_v20 = vmul.f32 %v4242_v60, %v4643_v53  ;;  %v4679_v19 = vld [vmem:[%s4101_s19 + $0x129] sm:$0xff] }
  0x5b   : > { %v2021_v63 = vadd.f32 %v4529_v52, %v1912_v45  ;;  %v773_v50 = vadd.f32 %v741_v58, %v703_v26  ;;  %v774_v37 = vadd.f32 %v742_v36, %v704_v3  ;;  %8377 = vst [vmem:[#allocation90_spill] sm:$0xff] %v4679_v19  ;;  %v988_v43 = vmul.f32 %v4257_v5, %v4653_v57  ;;  %v4693_v36 = vld [vmem:[%s4101_s19 + $0xda] sm:$0xff] }
  0x5c   : > { %v2022_v25 = vadd.f32 %v4532_v14, %v1913_v7  ;;  %v989_v60 = vmul.f32 %v4257_v5, %v4658_v48  ;;  %v1057_v52 = vmul.f32 %v4280_v16, %v4661_v13  ;;  %v1058_v58 = vmul.f32 %v4280_v16, %v4664_v38  ;;  %v4699_v7 = vld [vmem:[%s4101_s19 + $0xe2] sm:$0xff]  ;;  %v4702_v48 = vld [vmem:[%s4101_s19 + $0xf2] sm:$0xff]  ;;  %v4705_v13 = vld [vmem:[%s4101_s19 + $0xfa] sm:$0xff] }
  0x5d   : > { %v2090_v45 = vadd.f32 %v4563_v10, %v2021_v63  ;;  %v882_v26 = vadd.f32 %v850_v23, %v773_v50  ;;  %v883_v3 = vadd.f32 %v851_v31, %v774_v37  ;;  %v1126_v14 = vmul.f32 %v4295_v24, %v4671_v33  ;;  %8378 = vst [vmem:[#allocation91_spill] sm:$0xff] %v4699_v7  ;;  %v4711_v10 = vld [vmem:[%s4101_s19 + $0x10a] sm:$0xff]  ;;  %v4717_v33 = vld [vmem:[%s4101_s19 + $0x112] sm:$0xff] }
  0x5e   : > { %8379 = vst [vmem:[#allocation92_spill] sm:$0xff] %v4702_v48  ;;  %8380 = vst [vmem:[#allocation93_spill] sm:$0xff] %v4705_v13  ;;  %v2091_v38 = vadd.f32 %v4566_v46, %v2022_v25  ;;  %v1127_v57 = vmul.f32 %v4295_v24, %v4679_v19  ;;  %v1235_v23 = vmul.f32 %v4311_v34, %v1190_v61  ;;  %v4720_v46 = vld [vmem:[%s4101_s19 + $0x122] sm:$0xff]  ;;  %v4723_v25 = vld [vmem:[%s4101_s19 + $0x12a] sm:$0xff] }
  0x5f   : > { %8381 = vst [vmem:[#allocation94_spill] sm:$0xff] %v4711_v10  ;;  %v1236_v31 = vmul.f32 %v4311_v34, %v1191_v4  ;;  %v2159_v63 = vadd.f32 %v4605_v9, %v2090_v45  ;;  %v951_v50 = vadd.f32 %v919_v21, %v882_v26  ;;  %v952_v37 = vadd.f32 %v920_v20, %v883_v3  ;;  %v1575_v20 = vld [vmem:[%s4101_s19 + $0xc3] sm:$0xff]  ;;  %v4741_v3 = vld [vmem:[%s4101_s19 + $0xdb] sm:$0xff] }
  0x60   : > { %8382 = vst [vmem:[#allocation95_spill] sm:$0xff] %v4717_v33  ;;  %8383 = vst [vmem:[#allocation96_spill] sm:$0xff] %v4720_v46  ;;  %v1304_v19 = vmul.f32 %v4340_v59, %v4693_v36  ;;  %v2160_v53 = vadd.f32 %v2128_v18, %v2091_v38  ;;  %v1305_v61 = vmul.f32 %v4340_v59, %v4699_v7  ;;  %v1576_v38 = vld [vmem:[%s4101_s19 + $0xcb] sm:$0xff]  ;;  %v4744_v59 = vld [vmem:[%s4101_s19 + $0xe3] sm:$0xff] }
  0x61   : > { %8384 = vst [vmem:[#allocation97_spill] sm:$0xff] %v4723_v25  ;;  %v1373_v9 = vmul.f32 %v4368_v15, %v4702_v48  ;;  %v1374_v21 = vmul.f32 %v4368_v15, %v4705_v13  ;;  %v2228_v4 = vadd.f32 %v4629_v56, %v2159_v63  ;;  %v1020_v45 = vadd.f32 %v988_v43, %v951_v50  ;;  %v4749_v56 = vld [vmem:[%s7864_s2] ss:$0 sm:$0xff]  ;;  %v4762_v50 = vld [vmem:[%s4101_s19 + $0xf3] sm:$0xff] }
  0x62   : > { %v1021_v26 = vadd.f32 %v989_v60, %v952_v37  ;;  %v4737_v18 = vmul.f32 %v4388_v42, %v4711_v10  ;;  %8385 = vst [vmem:[#allocation98_spill] sm:$0xff] %v4741_v3  ;;  %8386 = vst [vmem:[#allocation99_spill] sm:$0xff] %v4744_v59  ;;  %v2229_v48 = vadd.f32 %v2197_v12, %v2160_v53  ;;  %v4766_v10 = vld [vmem:[%s4101_s19 + $0xfb] sm:$0xff]  ;;  %v4772_v13 = vld [vmem:[%s4101_s19 + $0x113] sm:$0xff] }
  0x63   : > { %8387 = vst [vmem:[#allocation100_spill] sm:$0xff] %v4749_v56  ;;  %v1443_v60 = vmul.f32 %v4388_v42, %v4717_v33  ;;  %v4755_v43 = vmul.f32 %v4399_v44, %v4720_v46  ;;  %v4759_v63 = vmul.f32 %v4399_v44, %v4723_v25  ;;  %8388 = vst [vmem:[#allocation101_spill] sm:$0xff] %v4762_v50  ;;  %v4769_v33 = vld [vmem:[%s4101_s19 + $0x10b] sm:$0xff]  ;;  %v4780_v7 = vld [vmem:[%s7865_s3] ss:$0 sm:$0xff] }
  0x64   : > { %v2297_v12 = vadd.f32 %v4650_v27, %v2228_v4  ;;  %v1089_v53 = vadd.f32 %v1057_v52, %v1020_v45  ;;  %v1090_v37 = vadd.f32 %v1058_v58, %v1021_v26  ;;  %8389 = vst [vmem:[#allocation102_spill] sm:$0xff] %v4766_v10  ;;  %8390 = vst [vmem:[#allocation103_spill] sm:$0xff] %v4769_v33  ;;  %v4783_v27 = vld [vmem:[%s4101_s19 + $0x123] sm:$0xff]  ;;  %v4798_v45 = vld [vmem:[%s4101_s19 + $0x12b] sm:$0xff] }
  0x65   : > { %8391 = vst [vmem:[#allocation104_spill] sm:$0xff] %v4772_v13  ;;  %v4775_v46 = vmul.f32 %v4405_v62, %v1575_v20  ;;  %v2298_v25 = vadd.f32 %v2266_v41, %v2229_v48  ;;  %8392 = vst [vmem:[#allocation105_spill] sm:$0xff] %v4780_v7  ;;  %v4786_v52 = vmul.f32 %v4405_v62, %v1576_v38  ;;  %v1960_v38 = vld [vmem:[%s4101_s19 + $0xc4] sm:$0xff]  ;;  %v1961_v62 = vld [vmem:[%s4101_s19 + $0xcc] sm:$0xff] }
  0x66   : > { %8393 = vst [vmem:[#allocation106_spill] sm:$0xff] %v4783_v27  ;;  %v4790_v58 = vmul.f32 %v4430_v35, %v4741_v3  ;;  %v4794_v20 = vmul.f32 %v4430_v35, %v4744_v59  ;;  %v2336_v48 = vmul.f32 %v4749_v56, %v2297_v12  ;;  %v1158_v41 = vadd.f32 %v1126_v14, %v1089_v53  ;;  %v4820_v14 = vld [vmem:[%s4101_s19 + $0xdc] sm:$0xff]  ;;  %v4828_v35 = vld [vmem:[%s4101_s19 + $0xe4] sm:$0xff]  ;;  %v4886_v59 = vld [vmem:[%s4101_s19 + $0x12c] sm:$0xff] }
  0x67   : > { %v1159_v4 = vadd.f32 %v1127_v57, %v1090_v37  ;;  %8394 = vst [vmem:[#allocation107_spill] sm:$0xff] %v4798_v45  ;;  %v4802_v26 = vmul.f32 %v4460_v39, %v4762_v50  ;;  %v2337_v3 = vmul.f32 %v4749_v56, %v2298_v25  ;;  %v4809_v34 = vmul.f32 %v4460_v39, %v4766_v10 }
  0x68   : > { %v4813_v12 = vmul.f32 %v4465_v47, %v4769_v33  ;;  %v4817_v57 = vmul.f32 %v4465_v47, %v4772_v13  ;;  %8395 = vst [vmem:[#allocation108_spill] sm:$0xff] %v4820_v14  ;;  %v2375_v53 = vadd.f32 %v4780_v7, %v2336_v48  ;;  %v1267_v37 = vadd.f32 %v1235_v23, %v1158_v41 }
  0x69   : > { %v1268_v25 = vadd.f32 %v1236_v31, %v1159_v4  ;;  %v4825_v10 = vmul.f32 %v4482_v54, %v4783_v27  ;;  %8396 = vst [vmem:[#allocation109_spill] sm:$0xff] %v4828_v35  ;;  %v2376_v33 = vadd.f32 %v4780_v7, %v2337_v3  ;;  %v4833_v13 = vmul.f32 %v4482_v54, %v4798_v45  ;;  %v4846_v3 = vld [vmem:[%s4101_s19 + $0x78] sm:$0xff] }
  0x6a   : > { %v4836_v50 = vmul.f32 %v4497_v30, %v1960_v38  ;;  %v4839_v23 = vmul.f32 %v4497_v30, %v1961_v62  ;;  %v2407_v31 = vmax.f32 %v2375_v53, 0.0  ;;  %v1336_v48 = vadd.f32 %v1304_v19, %v1267_v37  ;;  %8397 = vst [vmem:[#allocation110_spill] sm:$0xff] %v4846_v3  ;;  %v4849_v45 = vld [vmem:[%s4101_s19 + $0xf4] sm:$0xff]  ;;  %v4860_v37 = vld [vmem:[%s4101_s19 + $0xfc] sm:$0xff]  ;;  %8406 = vst [vmem:[#allocation115_spill] sm:$0xff] %v4886_v59 }
  0x6b   : > { %v1337_v41 = vadd.f32 %v1305_v61, %v1268_v25  ;;  %v4843_v4 = vmul.f32 %v4523_v11, %v4820_v14  ;;  %v2408_v27 = vmax.f32 %v2376_v33, 0.0  ;;  %8398 = vst [vmem:[#allocation111_spill] sm:$0xff] %v4849_v45  ;;  %v4853_v38 = vmul.f32 %v4523_v11, %v4828_v35  ;;  %8399 = vst [vmem:[#allocation112_spill] sm:$0xff] %v4860_v37  ;;  %v4863_v33 = vld [vmem:[%s4101_s19 + $0x10c] sm:$0xff]  ;;  %v4866_v25 = vld [vmem:[%s4101_s19 + $0x80] sm:$0xff] }
  0x6c   : > { %v549_v62 = vadd.f32 %v4250_v1, %v4225_v51  ;;  %v550_v19 = vadd.f32 %v4260_v6, %v4231_v55  ;;  %v1405_v61 = vadd.f32 %v1373_v9, %v1336_v48  ;;  %8400 = vst [vmem:[#allocation113_spill] sm:$0xff] %v4863_v33  ;;  %8401 = vst [vmem:[#allocation114_spill] sm:$0xff] %v4866_v25  ;;  %v8402_v1 = vld [vmem:[#allocation16_spill] sm:$0xff]  ;;  %v8403_v55 = vld [vmem:[#allocation17_spill] sm:$0xff] }
  0x6d   : > { %v1406_v53 = vadd.f32 %v1374_v21, %v1337_v41  ;;  %v587_v35 = vmul.f32 %v4174_v28, %v4157_v22  ;;  %v588_v30 = vmul.f32 %v4174_v28, %v4188_v32  ;;  %v2439_v51 = vpack.c.bf16 %v2408_v27, %v2407_v31  ;;  %v4880_v41 = vld [vmem:[%s4101_s19 + $0x114] sm:$0xff]  ;;  %v4883_v22 = vld [vmem:[%s4101_s19 + $0x124] sm:$0xff] }
  0x6e   : > { %v657_v14 = vmul.f32 %v4179_v29, %v8402_v1  ;;  %v658_v6 = vmul.f32 %v4179_v29, %v8403_v55  ;;  %v727_v9 = vmul.f32 %v4204_v40, %v4846_v3  ;;  %v1474_v21 = vadd.f32 %v4737_v18, %v1405_v61  ;;  %8404 = vst [vmem:[#allocation16_spill] sm:$0xff] %v4880_v41  ;;  %v4905_v61 = vld [vmem:[%s4101_s19 + $0x79] sm:$0xff]  ;;  %v8423_v3 = vld [vmem:[#allocation42_spill] sm:$0xff] }
  0x6f   : > { %v1475_v48 = vadd.f32 %v1443_v60, %v1406_v53  ;;  %8405 = vst [vmem:[#allocation17_spill] sm:$0xff] %v4883_v22  ;;  %v619_v32 = vadd.f32 %v587_v35, %v549_v62  ;;  %v620_v27 = vadd.f32 %v588_v30, %v550_v19  ;;  %3486 = vmatprep.mubr.bf16.mxu0 %v2439_v51  ;;  %8407 = vst [vmem:[#allocation116_spill] sm:$0xff] %v4905_v61 }
  0x70   : > { %v4890_v31 = vmul.f32 %v4571_v8, %v4849_v45  ;;  %v4894_v1 = vmul.f32 %v4571_v8, %v4860_v37  ;;  %v4898_v18 = vmul.f32 %v4590_v17, %v4863_v33  ;;  %v728_v60 = vmul.f32 %v4204_v40, %v4866_v25  ;;  %v8418_v25 = vld [vmem:[#allocation37_spill] sm:$0xff]  ;;  %v8428_v45 = vld [vmem:[#allocation58_spill] sm:$0xff] }
  0x71   : > { %v1543_v35 = vadd.f32 %v4755_v43, %v1474_v21  ;;  %v1544_v30 = vadd.f32 %v4759_v63, %v1475_v48  ;;  %v689_v62 = vadd.f32 %v657_v14, %v619_v32  ;;  %v690_v19 = vadd.f32 %v658_v6, %v620_v27  ;;  %v8408_v43 = vld [vmem:[#allocation22_spill] sm:$0xff]  ;;  %v4924_v32 = vld [vmem:[%s4101_s19 + $0x81] sm:$0xff] }
  0x72   : > { %v4909_v53 = vmul.f32 %v4590_v17, %v4880_v41  ;;  %v4913_v51 = vmul.f32 %v4620_v0, %v4883_v22  ;;  %v4917_v55 = vmul.f32 %v4620_v0, %v4886_v59  ;;  %v974_v63 = vmul.f32 %v4257_v5, %v8408_v43  ;;  %8409 = vst [vmem:[#allocation22_spill] sm:$0xff] %v4924_v32  ;;  %v8410_v27 = vld [vmem:[#allocation25_spill] sm:$0xff]  ;;  %v8411_v41 = vld [vmem:[#allocation26_spill] sm:$0xff]  ;;  %v8412_v59 = vld [vmem:[#allocation28_spill] sm:$0xff] }
  0x73   : > { %v1652_v14 = vadd.f32 %v4775_v46, %v1543_v35  ;;  %v1653_v6 = vadd.f32 %v4786_v52, %v1544_v30  ;;  %v759_v21 = vadd.f32 %v727_v9, %v689_v62  ;;  %v760_v48 = vadd.f32 %v728_v60, %v690_v19  ;;  %v8413_v9 = vld [vmem:[#allocation21_spill] sm:$0xff]  ;;  %v8414_v35 = vld [vmem:[#allocation23_spill] sm:$0xff] }
  0x74   : > { %v975_v22 = vmul.f32 %v4257_v5, %v8410_v27  ;;  %v1043_v33 = vmul.f32 %v4280_v16, %v8411_v41  ;;  %v1044_v37 = vmul.f32 %v4280_v16, %v8412_v59  ;;  %v1112_v43 = vmul.f32 %v4295_v24, %v4905_v61  ;;  %v4939_v62 = vld [vmem:[%s4101_s19 + $0x7a] sm:$0xff]  ;;  %v4942_v19 = vld [vmem:[%s4101_s19 + $0x82] sm:$0xff] }
  0x75   : > { %v1721_v46 = vadd.f32 %v4790_v58, %v1652_v14  ;;  %v1722_v52 = vadd.f32 %v4794_v20, %v1653_v6  ;;  %v868_v60 = vadd.f32 %v8413_v9, %v759_v21  ;;  %v869_v30 = vadd.f32 %v8414_v35, %v760_v48  ;;  %8415 = vst [vmem:[#allocation25_spill] sm:$0xff] %v4939_v62  ;;  %v8417_v59 = vld [vmem:[#allocation36_spill] sm:$0xff]  ;;  %v8419_v14 = vld [vmem:[#allocation41_spill] sm:$0xff] }
  0x76   : > { %8416 = vst [vmem:[#allocation26_spill] sm:$0xff] %v4942_v19  ;;  %v1113_v41 = vmul.f32 %v4295_v24, %v4924_v32  ;;  %v1359_v27 = vmul.f32 %v4368_v15, %v8417_v59  ;;  %v1360_v58 = vmul.f32 %v4368_v15, %v8418_v25  ;;  %v4952_v20 = vmul.f32 %v4388_v42, %v8419_v14  ;;  %v8420_v48 = vld [vmem:[#allocation32_spill] sm:$0xff]  ;;  %v8421_v35 = vld [vmem:[#allocation33_spill] sm:$0xff] }
  0x77   : > { %v1790_v6 = vadd.f32 %v4802_v26, %v1721_v46  ;;  %v1791_v21 = vadd.f32 %v4809_v34, %v1722_v52  ;;  %v937_v9 = vadd.f32 %v8420_v48, %v868_v60  ;;  %v938_v61 = vadd.f32 %v8421_v35, %v869_v30  ;;  %v4959_v32 = vld [vmem:[%s4101_s19 + $0x7b] sm:$0xff]  ;;  %v8424_v26 = vld [vmem:[#allocation49_spill] sm:$0xff] }
  0x78   : > { %8422 = vst [vmem:[#allocation28_spill] sm:$0xff] %v4959_v32  ;;  %v1429_v59 = vmul.f32 %v4388_v42, %v8423_v3  ;;  %v4965_v25 = vmul.f32 %v4399_v44, %v4939_v62  ;;  %v4969_v14 = vmul.f32 %v4399_v44, %v4942_v19  ;;  %v4973_v34 = vmul.f32 %v4460_v39, %v8424_v26  ;;  %v4978_v48 = vld [vmem:[%s4101_s19 + $0x83] sm:$0xff]  ;;  %v8426_v3 = vld [vmem:[#allocation50_spill] sm:$0xff] }
  0x79   : > { %v1859_v46 = vadd.f32 %v4813_v12, %v1790_v6  ;;  %v1860_v52 = vadd.f32 %v4817_v57, %v1791_v21  ;;  %v1006_v60 = vadd.f32 %v974_v63, %v937_v9  ;;  %v1007_v30 = vadd.f32 %v975_v22, %v938_v61  ;;  %8425 = vst [vmem:[#allocation21_spill] sm:$0xff] %v4978_v48  ;;  %v8427_v62 = vld [vmem:[#allocation52_spill] sm:$0xff]  ;;  %v8429_v21 = vld [vmem:[#allocation71_spill] sm:$0xff]  ;;  %v8430_v9 = vld [vmem:[#allocation14_spill] sm:$0xff] }
  0x7a   : > { %v4982_v35 = vmul.f32 %v4460_v39, %v8426_v3  ;;  %v4986_v19 = vmul.f32 %v4465_v47, %v8427_v62  ;;  %v4990_v26 = vmul.f32 %v4465_v47, %v8428_v45  ;;  %v4994_v12 = vmul.f32 %v4482_v54, %v4959_v32  ;;  %v8431_v45 = vld [vmem:[#allocation72_spill] sm:$0xff]  ;;  %v8432_v32 = vld [vmem:[#allocation73_spill] sm:$0xff]  ;;  %v8433_v47 = vld [vmem:[#allocation15_spill] sm:$0xff] }
  0x7b   : > { %v1928_v57 = vadd.f32 %v4825_v10, %v1859_v46  ;;  %v1929_v22 = vadd.f32 %v4833_v13, %v1860_v52  ;;  %v1075_v61 = vadd.f32 %v1043_v33, %v1006_v60  ;;  %v1076_v63 = vadd.f32 %v1044_v37, %v1007_v30  ;;  %v8434_v46 = vld [vmem:[#allocation75_spill] sm:$0xff]  ;;  %v8435_v30 = vld [vmem:[#allocation76_spill] sm:$0xff] }
  0x7c   : > { %v5000_v6 = vmul.f32 %v4482_v54, %v4978_v48  ;;  %v463_v62 = vmul.f32 %v8430_v9, %v8429_v21  ;;  %v464_v3 = vmul.f32 %v8430_v9, %v8431_v45  ;;  %v533_v39 = vmul.f32 %v8433_v47, %v8432_v32  ;;  %v8436_v48 = vld [vmem:[#allocation78_spill] sm:$0xff]  ;;  %v8437_v9 = vld [vmem:[#allocation35_spill] sm:$0xff] }
  0x7d   : > { %v2037_v10 = vadd.f32 %v4836_v50, %v1928_v57  ;;  %v2038_v13 = vadd.f32 %v4839_v23, %v1929_v22  ;;  %v1144_v37 = vadd.f32 %v1112_v43, %v1075_v61  ;;  %v1145_v33 = vadd.f32 %v1113_v41, %v1076_v63  ;;  %v8438_v57 = vld [vmem:[#allocation38_spill] sm:$0xff]  ;;  %v5021_v43 = vld [vmem:[%s4101_s19 + $0x138] sm:$0xff]  ;;  %v5024_v41 = vld [vmem:[%s4101_s19 + $0x140] sm:$0xff] }
  0x7e   : > { %v534_v52 = vmul.f32 %v8433_v47, %v8434_v46  ;;  %v565_v60 = vadd.f32 %v533_v39, %v463_v62  ;;  %v603_v21 = vmul.f32 %v4174_v28, %v8435_v30  ;;  %v604_v54 = vmul.f32 %v4174_v28, %v8436_v48  ;;  %8439 = vst [vmem:[#allocation23_spill] sm:$0xff] %v5021_v43  ;;  %v8441_v62 = vld [vmem:[#allocation79_spill] sm:$0xff]  ;;  %v8442_v61 = vld [vmem:[#allocation81_spill] sm:$0xff] }
  0x7f   : > { %v2106_v45 = vadd.f32 %v4843_v4, %v2037_v10  ;;  %v2107_v32 = vadd.f32 %v4853_v38, %v2038_v13  ;;  %v1253_v50 = vadd.f32 %v8437_v9, %v1144_v37  ;;  %v1254_v23 = vadd.f32 %v8438_v57, %v1145_v33  ;;  %8440 = vst [vmem:[#allocation36_spill] sm:$0xff] %v5024_v41  ;;  %v8443_v48 = vld [vmem:[#allocation45_spill] sm:$0xff]  ;;  %v8444_v10 = vld [vmem:[#allocation47_spill] sm:$0xff] }
  0x80   : > { %v566_v47 = vadd.f32 %v534_v52, %v464_v3  ;;  %v635_v39 = vadd.f32 %v603_v21, %v565_v60  ;;  %v673_v22 = vmul.f32 %v4179_v29, %v8441_v62  ;;  %v674_v28 = vmul.f32 %v4179_v29, %v8442_v61 }
  0x81   : > { %v2175_v4 = vadd.f32 %v4890_v31, %v2106_v45  ;;  %v2176_v38 = vadd.f32 %v4894_v1, %v2107_v32  ;;  %v1322_v63 = vadd.f32 %v8443_v48, %v1253_v50  ;;  %v1323_v13 = vadd.f32 %v8444_v10, %v1254_v23  ;;  %v8445_v45 = vld [vmem:[#allocation84_spill] sm:$0xff]  ;;  %v8448_v23 = vld [vmem:[#allocation86_spill] sm:$0xff] }
  0x82   : > { %v636_v37 = vadd.f32 %v604_v54, %v566_v47  ;;  %v705_v33 = vadd.f32 %v673_v22, %v635_v39  ;;  %v743_v3 = vmul.f32 %v4204_v40, %v5021_v43  ;;  %v744_v46 = vmul.f32 %v4204_v40, %v5024_v41  ;;  %v8449_v39 = vld [vmem:[#allocation87_spill] sm:$0xff]  ;;  %v8450_v22 = vld [vmem:[#allocation88_spill] sm:$0xff]  ;;  %v5326_v41 = vld [vmem:[%s4101_s19 + $0x6a] sm:$0xff] }
  0x83   : > { %v2244_v52 = vadd.f32 %v4898_v18, %v2175_v4  ;;  %v2245_v29 = vadd.f32 %v4909_v53, %v2176_v38  ;;  %v1391_v60 = vadd.f32 %v1359_v27, %v1322_v63  ;;  %v1392_v31 = vadd.f32 %v1360_v58, %v1323_v13  ;;  %v8446_v27 = vld [vmem:[#allocation85_spill] sm:$0xff]  ;;  %v8447_v58 = vld [vmem:[#allocation19_spill] sm:$0xff]  ;;  %v5343_v43 = vld [vmem:[%s7863_s1 + $0x22] ss:$0 sm:$0xff] }
  0x84   : > { %v706_v30 = vadd.f32 %v674_v28, %v636_v37  ;;  %v775_v1 = vadd.f32 %v743_v3, %v705_v33  ;;  %v852_v21 = vmul.f32 %v4220_v49, %v4640_v2  ;;  %v853_v54 = vmul.f32 %v4220_v49, %v8445_v45  ;;  %v8451_v38 = vld [vmem:[#allocation51_spill] sm:$0xff]  ;;  %v8452_v63 = vld [vmem:[#allocation53_spill] sm:$0xff] }
  0x85   : > { %v2313_v32 = vadd.f32 %v4913_v51, %v2244_v52  ;;  %v2314_v9 = vadd.f32 %v4917_v55, %v2245_v29  ;;  %v1460_v40 = vadd.f32 %v4952_v20, %v1391_v60  ;;  %v1461_v50 = vadd.f32 %v1429_v59, %v1392_v31  ;;  %v5064_v13 = vld [vmem:[%s4101_s19 + $0x139] sm:$0xff]  ;;  %v8455_v33 = vld [vmem:[#allocation89_spill] sm:$0xff]  ;;  %v8457_v60 = vld [vmem:[#allocation62_spill] sm:$0xff]  ;;  %8529 = vst [vmem:[#allocation51_spill] sm:$0xff] %v5326_v41 }
  0x86   : > { %v776_v18 = vadd.f32 %v744_v46, %v706_v30  ;;  %v884_v53 = vadd.f32 %v852_v21, %v775_v1  ;;  %v921_v57 = vmul.f32 %v8447_v58, %v8446_v27  ;;  %v922_v2 = vmul.f32 %v8447_v58, %v8448_v23  ;;  %8453 = vst [vmem:[#allocation37_spill] sm:$0xff] %v5064_v13  ;;  %v8456_v46 = vld [vmem:[#allocation90_spill] sm:$0xff]  ;;  %v8458_v30 = vld [vmem:[#allocation63_spill] sm:$0xff]  ;;  %v8461_v23 = vld [vmem:[#allocation92_spill] sm:$0xff] }
  0x87   : > { %v2352_v47 = vmul.f32 %v4749_v56, %v2313_v32  ;;  %v2353_v49 = vmul.f32 %v4749_v56, %v2314_v9  ;;  %v1529_v51 = vadd.f32 %v4965_v25, %v1460_v40  ;;  %v1530_v55 = vadd.f32 %v4969_v14, %v1461_v50  ;;  %v5067_v25 = vld [vmem:[%s4101_s19 + $0x141] sm:$0xff]  ;;  %v8459_v50 = vld [vmem:[#allocation30_spill] sm:$0xff]  ;;  %v8460_v58 = vld [vmem:[#allocation91_spill] sm:$0xff]  ;;  %8533 = vst [vmem:[#allocation89_spill] sm:$0xff] %v5343_v43 }
  0x88   : > { %v885_v20 = vadd.f32 %v853_v54, %v776_v18  ;;  %v953_v59 = vadd.f32 %v921_v57, %v884_v53  ;;  %v990_v62 = vmul.f32 %v4257_v5, %v8449_v39  ;;  %v991_v61 = vmul.f32 %v4257_v5, %v8450_v22  ;;  %8454 = vst [vmem:[#allocation41_spill] sm:$0xff] %v5067_v25  ;;  %v8465_v39 = vld [vmem:[#allocation93_spill] sm:$0xff]  ;;  %v8466_v22 = vld [vmem:[#allocation94_spill] sm:$0xff] }
  0x89   : > { %v2391_v28 = vadd.f32 %v4780_v7, %v2352_v47  ;;  %v2392_v4 = vadd.f32 %v4780_v7, %v2353_v49  ;;  %v1638_v48 = vadd.f32 %v8451_v38, %v1529_v51  ;;  %v1639_v10 = vadd.f32 %v8452_v63, %v1530_v55  ;;  %v8463_v49 = vld [vmem:[#allocation65_spill] sm:$0xff]  ;;  %v5094_v55 = vld [vmem:[%s4101_s19 + $0x7c] sm:$0xff]  ;;  %v8468_v38 = vld [vmem:[#allocation82_spill] sm:$0xff] }
  0x8a   : > { %v954_v14 = vadd.f32 %v922_v2, %v885_v20  ;;  %v1022_v37 = vadd.f32 %v990_v62, %v953_v59  ;;  %v1059_v3 = vmul.f32 %v4280_v16, %v8455_v33  ;;  %v1060_v5 = vmul.f32 %v4280_v16, %v8456_v46  ;;  %v8462_v2 = vld [vmem:[#allocation34_spill] sm:$0xff]  ;;  %v5107_v63 = vld [vmem:[%s4101_s19 + $0x13a] sm:$0xff] }
  0x8b   : > { %v2423_v52 = vmax.f32 %v2391_v28, 0.0  ;;  %v2424_v29 = vmax.f32 %v2392_v4, 0.0  ;;  %v1707_v31 = vadd.f32 %v8457_v60, %v1638_v48  ;;  %v1708_v1 = vadd.f32 %v8458_v30, %v1639_v10  ;;  %8469 = vst [vmem:[#allocation32_spill] sm:$0xff] %v5107_v63  ;;  %v5110_v10 = vld [vmem:[%s4101_s19 + $0x84] sm:$0xff] }
  0x8c   : > { %v1023_v21 = vadd.f32 %v991_v61, %v954_v14  ;;  %v1091_v45 = vadd.f32 %v1059_v3, %v1022_v37  ;;  %v1128_v54 = vmul.f32 %v4295_v24, %v5064_v13  ;;  %v1129_v32 = vmul.f32 %v4295_v24, %v5067_v25  ;;  %v5113_v14 = vld [vmem:[%s4101_s19 + $0x142] sm:$0xff]  ;;  %v8471_v3 = vld [vmem:[#allocation95_spill] sm:$0xff] }
  0x8d   : > { %v2447_v9 = vpack.c.bf16 %v2424_v29, %v2423_v52  ;;  %v1776_v40 = vadd.f32 %v4973_v34, %v1707_v31  ;;  %v1777_v16 = vadd.f32 %v4982_v35, %v1708_v1  ;;  %v1237_v18 = vmul.f32 %v8459_v50, %v4693_v36  ;;  %v8464_v36 = vld [vmem:[#allocation66_spill] sm:$0xff]  ;;  %8470 = vst [vmem:[#allocation33_spill] sm:$0xff] %v5113_v14  ;;  %v8474_v29 = vld [vmem:[#allocation68_spill] sm:$0xff]  ;;  %v8475_v31 = vld [vmem:[#allocation83_spill] sm:$0xff] }
  0x8e   : > { %v1092_v53 = vadd.f32 %v1060_v5, %v1023_v21  ;;  %v1160_v27 = vadd.f32 %v1128_v54, %v1091_v45  ;;  %v1238_v57 = vmul.f32 %v8459_v50, %v8460_v58  ;;  %v1306_v47 = vmul.f32 %v8462_v2, %v8461_v23  ;;  %v8473_v5 = vld [vmem:[#allocation67_spill] sm:$0xff]  ;;  %v8476_v54 = vld [vmem:[#allocation97_spill] sm:$0xff]  ;;  %v8478_v58 = vld [vmem:[#allocation98_spill] sm:$0xff] }
  0x8f   : > { %v2061_v24 = vmul.f32 %v4523_v11, %v8463_v49  ;;  %3502 = vmatprep.mubr.bf16.mxu1 %v2447_v9  ;;  %v1845_v34 = vadd.f32 %v4986_v19, %v1776_v40  ;;  %v1846_v35 = vadd.f32 %v4990_v26, %v1777_v16  ;;  %v2129_v51 = vmul.f32 %v4571_v8, %v8464_v36  ;;  %v8467_v19 = vld [vmem:[#allocation80_spill] sm:$0xff]  ;;  %v8477_v9 = vld [vmem:[#allocation77_spill] sm:$0xff] }
  0x90   : > { %v1161_v20 = vadd.f32 %v1129_v32, %v1092_v53  ;;  %v1269_v59 = vadd.f32 %v1237_v18, %v1160_v27  ;;  %v1307_v62 = vmul.f32 %v8462_v2, %v8465_v39  ;;  %v1375_v61 = vmul.f32 %v4368_v15, %v8466_v22  ;;  %v8480_v2 = vld [vmem:[#allocation99_spill] sm:$0xff]  ;;  %v8485_v39 = vld [vmem:[#allocation102_spill] sm:$0xff]  ;;  %v5321_v25 = vld [vmem:[%s4101_s19 + $0x62] sm:$0xff] }
  0x91   : > { %v1914_v28 = vadd.f32 %v4994_v12, %v1845_v34  ;;  %v1915_v4 = vadd.f32 %v5000_v6, %v1846_v35  ;;  %v2130_v26 = vmul.f32 %v4571_v8, %v8467_v19  ;;  %v2198_v48 = vmul.f32 %v4590_v17, %v8468_v38  ;;  %v8472_v12 = vld [vmem:[#allocation96_spill] sm:$0xff]  ;;  %8528 = vst [vmem:[#allocation88_spill] sm:$0xff] %v5321_v25 }
  0x92   : > { %v1270_v37 = vadd.f32 %v1238_v57, %v1161_v20  ;;  %v1338_v33 = vadd.f32 %v1306_v47, %v1269_v59  ;;  %v1376_v46 = vmul.f32 %v4368_v15, %v8471_v3  ;;  %v1444_v6 = vmul.f32 %v4388_v42, %v8472_v12  ;;  %v8479_v57 = vld [vmem:[#allocation46_spill] sm:$0xff]  ;;  %v5139_v34 = vld [vmem:[%s4101_s19 + $0x13b] sm:$0xff]  ;;  %v5142_v35 = vld [vmem:[%s4101_s19 + $0x143] sm:$0xff] }
  0x93   : > { %v2023_v52 = vadd.f32 %v8473_v5, %v1914_v28  ;;  %v2024_v60 = vadd.f32 %v8474_v29, %v1915_v4  ;;  %v2199_v30 = vmul.f32 %v4590_v17, %v8475_v31  ;;  %v2267_v1 = vmul.f32 %v4620_v0, %v5094_v55  ;;  %8481 = vst [vmem:[#allocation42_spill] sm:$0xff] %v5139_v34  ;;  %v8484_v20 = vld [vmem:[#allocation48_spill] sm:$0xff]  ;;  %v8489_v3 = vld [vmem:[#allocation106_spill] sm:$0xff] }
  0x94   : > { %v1339_v21 = vadd.f32 %v1307_v62, %v1270_v37  ;;  %v1407_v45 = vadd.f32 %v1375_v61, %v1338_v33  ;;  %v1445_v15 = vmul.f32 %v4388_v42, %v8476_v54  ;;  %v1513_v32 = vmul.f32 %v4399_v44, %v5107_v63  ;;  %8482 = vst [vmem:[#allocation71_spill] sm:$0xff] %v5142_v35  ;;  %v8486_v61 = vld [vmem:[#allocation103_spill] sm:$0xff]  ;;  %v8487_v28 = vld [vmem:[#allocation56_spill] sm:$0xff] }
  0x95   : > { %v2092_v40 = vadd.f32 %v8477_v9, %v2023_v52  ;;  %v2093_v16 = vadd.f32 %v2061_v24, %v2024_v60  ;;  %v2268_v50 = vmul.f32 %v4620_v0, %v5110_v10  ;;  %v1514_v18 = vmul.f32 %v4399_v44, %v5113_v14  ;;  %v8483_v24 = vld [vmem:[#allocation101_spill] sm:$0xff]  ;;  %v8488_v37 = vld [vmem:[#allocation104_spill] sm:$0xff] }
  0x96   : > { %v1408_v53 = vadd.f32 %v1376_v46, %v1339_v21  ;;  %v1476_v27 = vadd.f32 %v1444_v6, %v1407_v45  ;;  %v1622_v23 = vmul.f32 %v8479_v57, %v8478_v58  ;;  %v1623_v42 = vmul.f32 %v8479_v57, %v8480_v2  ;;  %v8490_v46 = vld [vmem:[#allocation57_spill] sm:$0xff]  ;;  %v8491_v6 = vld [vmem:[#allocation107_spill] sm:$0xff]  ;;  %v5179_v2 = vld [vmem:[%s4101_s19 + $0x50] sm:$0xff] }
  0x97   : > { %v2161_v47 = vadd.f32 %v2129_v51, %v2092_v40  ;;  %v2162_v49 = vadd.f32 %v2130_v26, %v2093_v16  ;;  %v1691_v59 = vmul.f32 %v8484_v20, %v8483_v24  ;;  %v1692_v44 = vmul.f32 %v8484_v20, %v8485_v39  ;;  %v8492_v60 = vld [vmem:[#allocation61_spill] sm:$0xff]  ;;  %v5294_v14 = vld [vmem:[%s7863_s1 + $0x21] ss:$0 sm:$0xff] }
  0x98   : > { %v1477_v62 = vadd.f32 %v1445_v15, %v1408_v53  ;;  %v1545_v22 = vadd.f32 %v1513_v32, %v1476_v27  ;;  %v1760_v4 = vmul.f32 %v8487_v28, %v8486_v61  ;;  %v1761_v33 = vmul.f32 %v8487_v28, %v8488_v37  ;;  %v8495_v9 = vld [vmem:[#allocation109_spill] sm:$0xff]  ;;  %v8496_v53 = vld [vmem:[#allocation111_spill] sm:$0xff]  ;;  %8523 = vst [vmem:[#allocation84_spill] sm:$0xff] %v5294_v14 }
  0x99   : > { %v2230_v51 = vadd.f32 %v2198_v48, %v2161_v47  ;;  %v2231_v26 = vadd.f32 %v2199_v30, %v2162_v49  ;;  %v1829_v12 = vmul.f32 %v8490_v46, %v8489_v3  ;;  %v1830_v5 = vmul.f32 %v8490_v46, %v8491_v6  ;;  %v8493_v48 = vld [vmem:[#allocation108_spill] sm:$0xff]  ;;  %v5167_v58 = vld [vmem:[%s4101_s19 + $0x48] sm:$0xff]  ;;  %v5186_v47 = vld [vmem:[%s7863_s1 + $0x10] ss:$0 sm:$0xff] }
  0x9a   : > { %v1546_v52 = vadd.f32 %v1514_v18, %v1477_v62  ;;  %v1654_v29 = vadd.f32 %v1622_v23, %v1545_v22  ;;  %v1898_v21 = vmul.f32 %v8492_v60, %v5139_v34  ;;  %v1899_v45 = vmul.f32 %v8492_v60, %v5142_v35  ;;  %v8494_v30 = vld [vmem:[#allocation64_spill] sm:$0xff]  ;;  %8498 = vst [vmem:[#allocation72_spill] sm:$0xff] %v5186_v47  ;;  %v5194_v62 = vld [vmem:[%s4101_s19 + $0x90] sm:$0xff]  ;;  %v5198_v37 = vld [vmem:[%s4101_s19 + $0x68] sm:$0xff] }
  0x9b   : > { %v2299_v54 = vadd.f32 %v2267_v1, %v2230_v51  ;;  %v2300_v15 = vadd.f32 %v2268_v50, %v2231_v26  ;;  %v2007_v32 = vmul.f32 %v8494_v30, %v8493_v48  ;;  %v2008_v40 = vmul.f32 %v8494_v30, %v8495_v9  ;;  %v5172_v1 = vld [vmem:[%s7863_s1 + $0x8] ss:$0 sm:$0xff]  ;;  %v5189_v49 = vld [vmem:[%s4101_s19 + $0x60] sm:$0xff]  ;;  %8500 = vst [vmem:[#allocation15_spill] sm:$0xff] %v5194_v62  ;;  %v8501_v22 = vld [vmem:[#allocation18_spill] sm:$0xff] }
  0x9c   : > { %v1655_v16 = vadd.f32 %v1623_v42, %v1546_v52  ;;  %v1723_v18 = vadd.f32 %v1691_v59, %v1654_v29  ;;  %v2076_v27 = vmul.f32 %v4523_v11, %v8496_v53  ;;  %8497 = vst [vmem:[#allocation14_spill] sm:$0xff] %v5172_v1  ;;  %v519_v50 = vmul.f32 %v5172_v1, %v5167_v58  ;;  %v5205_v6 = vld [vmem:[%s4101_s19 + $0x98] sm:$0xff]  ;;  %v8504_v52 = vld [vmem:[#allocation20_spill] sm:$0xff] }
  0x9d   : > { %v2338_v57 = vmul.f32 %v4749_v56, %v2299_v54  ;;  %v2339_v23 = vmul.f32 %v4749_v56, %v2300_v15  ;;  %v520_v42 = vmul.f32 %v5179_v2, %v5172_v1  ;;  %8499 = vst [vmem:[#allocation73_spill] sm:$0xff] %v5189_v49  ;;  %v589_v24 = vmul.f32 %v5189_v49, %v5186_v47 }
  0x9e   : > { %v1724_v59 = vadd.f32 %v1692_v44, %v1655_v16  ;;  %v1792_v39 = vadd.f32 %v1760_v4, %v1723_v18  ;;  %v551_v61 = vadd.f32 %v519_v50, %v8501_v22  ;;  %8502 = vst [vmem:[#allocation75_spill] sm:$0xff] %v5198_v37  ;;  %v590_v51 = vmul.f32 %v5198_v37, %v5186_v47  ;;  %v5211_v44 = vld [vmem:[%s7863_s1 + $0x18] ss:$0 sm:$0xff]  ;;  %v8505_v4 = vld [vmem:[#allocation110_spill] sm:$0xff] }
  0x9f   : > { %v2377_v26 = vadd.f32 %v4780_v7, %v2338_v57  ;;  %v2378_v3 = vadd.f32 %v4780_v7, %v2339_v23  ;;  %8503 = vst [vmem:[#allocation76_spill] sm:$0xff] %v5205_v6  ;;  %v552_v29 = vadd.f32 %v520_v42, %v8504_v52  ;;  %v659_v54 = vmul.f32 %v5211_v44, %v8505_v4  ;;  %v8506_v16 = vld [vmem:[#allocation114_spill] sm:$0xff]  ;;  %v5220_v23 = vld [vmem:[%s7863_s1 + $0x20] ss:$0 sm:$0xff] }
  0xa0   : > { %v1793_v15 = vadd.f32 %v1761_v33, %v1724_v59  ;;  %v1861_v48 = vadd.f32 %v1829_v12, %v1792_v39  ;;  %v621_v9 = vadd.f32 %v589_v24, %v551_v61  ;;  %v660_v18 = vmul.f32 %v5211_v44, %v8506_v16  ;;  %v8507_v39 = vld [vmem:[#allocation112_spill] sm:$0xff] }
  0xa1   : > { %v2409_v53 = vmax.f32 %v2377_v26, 0.0  ;;  %v2410_v50 = vmax.f32 %v2378_v3, 0.0  ;;  %v622_v57 = vadd.f32 %v590_v51, %v552_v29  ;;  %v729_v42 = vmul.f32 %v5220_v23, %v5194_v62  ;;  %v8508_v51 = vld [vmem:[#allocation113_spill] sm:$0xff]  ;;  %v5231_v29 = vld [vmem:[%s4101_s19 + $0x13c] sm:$0xff] }
  0xa2   : > { %v1862_v22 = vadd.f32 %v1830_v5, %v1793_v15  ;;  %v1930_v33 = vadd.f32 %v1898_v21, %v1861_v48  ;;  %v691_v12 = vadd.f32 %v659_v54, %v621_v9  ;;  %v730_v24 = vmul.f32 %v5220_v23, %v5205_v6  ;;  %8509 = vst [vmem:[#allocation78_spill] sm:$0xff] %v5231_v29  ;;  %v5236_v21 = vld [vmem:[%s7863_s1 + $0x9] ss:$0 sm:$0xff]  ;;  %v8510_v48 = vld [vmem:[#allocation16_spill] sm:$0xff] }
  0xa3   : > { %v2440_v59 = vpack.c.bf16 %v2410_v50, %v2409_v53  ;;  %v2077_v61 = vmul.f32 %v4523_v11, %v8507_v39  ;;  %v2145_v26 = vmul.f32 %v4571_v8, %v8508_v51  ;;  %v692_v3 = vadd.f32 %v660_v18, %v622_v57  ;;  %v3631_v54 = vld [vmem:[%s4101_s19 + $0x49] sm:$0xff]  ;;  %v3632_v53 = vld [vmem:[%s4101_s19 + $0x51] sm:$0xff]  ;;  %v5256_v39 = vld [vmem:[%s4101_s19 + $0x61] sm:$0xff] }
  0xa4   : > { %v1931_v52 = vadd.f32 %v1899_v45, %v1862_v22  ;;  %v2039_v35 = vadd.f32 %v2007_v32, %v1930_v33  ;;  %v761_v5 = vadd.f32 %v729_v42, %v691_v12  ;;  %v907_v15 = vmul.f32 %v3631_v54, %v5236_v21  ;;  %v8511_v18 = vld [vmem:[#allocation17_spill] sm:$0xff]  ;;  %v8513_v33 = vld [vmem:[#allocation24_spill] sm:$0xff]  ;;  %8514 = vst [vmem:[#allocation38_spill] sm:$0xff] %v5256_v39  ;;  %v8515_v51 = vld [vmem:[#allocation115_spill] sm:$0xff] }
  0xa5   : > { %3487 = vmatmul.mubr.bf16.vlgmr.msra.gmra.mxu0 %v2440_v59  ;;  %v2146_v9 = vmul.f32 %v4571_v8, %v8510_v48  ;;  %v2214_v45 = vmul.f32 %v4590_v17, %v8511_v18  ;;  %v762_v32 = vadd.f32 %v730_v24, %v692_v3  ;;  %v908_v50 = vmul.f32 %v3632_v53, %v5236_v21  ;;  %v5247_v57 = vld [vmem:[%s4101_s19 + $0x144] sm:$0xff]  ;;  %v5253_v59 = vld [vmem:[%s7863_s1 + $0x11] ss:$0 sm:$0xff]  ;;  %v5274_v53 = vld [vmem:[%s4101_s19 + $0x99] sm:$0xff] }
  0xa6   : > { %8512 = vst [vmem:[#allocation35_spill] sm:$0xff] %v5247_v57  ;;  %v2040_v42 = vadd.f32 %v2008_v40, %v1931_v52  ;;  %v2108_v22 = vadd.f32 %v2076_v27, %v2039_v35  ;;  %v870_v12 = vadd.f32 %v8513_v33, %v761_v5  ;;  %v976_v24 = vmul.f32 %v5256_v39, %v5253_v59  ;;  %v5265_v40 = vld [vmem:[%s4101_s19 + $0x91] sm:$0xff]  ;;  %v5269_v52 = vld [vmem:[%s4101_s19 + $0x69] sm:$0xff] }
  0xa7   : > { %v2215_v3 = vmul.f32 %v4590_v17, %v8515_v51  ;;  %v2283_v54 = vmul.f32 %v4620_v0, %v5231_v29  ;;  %8516 = vst [vmem:[#allocation79_spill] sm:$0xff] %v5265_v40  ;;  %v8517_v35 = vld [vmem:[#allocation27_spill] sm:$0xff]  ;;  %8518 = vst [vmem:[#allocation81_spill] sm:$0xff] %v5269_v52  ;;  %v977_v5 = vmul.f32 %v5269_v52, %v5253_v59  ;;  %v8520_v29 = vld [vmem:[#allocation116_spill] sm:$0xff] }
  0xa8   : > { %v871_v27 = vadd.f32 %v8517_v35, %v762_v32  ;;  %v2109_v48 = vadd.f32 %v2077_v61, %v2040_v42  ;;  %v2177_v18 = vadd.f32 %v2145_v26, %v2108_v22  ;;  %8519 = vst [vmem:[#allocation45_spill] sm:$0xff] %v5274_v53  ;;  %v939_v33 = vadd.f32 %v907_v15, %v870_v12  ;;  %v5279_v51 = vld [vmem:[%s7863_s1 + $0x19] ss:$0 sm:$0xff]  ;;  %v8522_v42 = vld [vmem:[#allocation22_spill] sm:$0xff] }
  0xa9   : > { %v1045_v32 = vmul.f32 %v5279_v51, %v8520_v29  ;;  %v5285_v35 = vmul.f32 %v8494_v30, %v8467_v19  ;;  %v2284_v61 = vmul.f32 %v4620_v0, %v5247_v57  ;;  %v1046_v15 = vmul.f32 %v5279_v51, %v8522_v42 }
  0xaa   : > { %v940_v26 = vadd.f32 %v908_v50, %v871_v27  ;;  %v2178_v22 = vadd.f32 %v2146_v9, %v2109_v48  ;;  %v2246_v12 = vadd.f32 %v2214_v45, %v2177_v18  ;;  %v1008_v34 = vadd.f32 %v976_v24, %v939_v33  ;;  %v5301_v27 = vld [vmem:[%s4101_s19 + $0x92] sm:$0xff]  ;;  %v5306_v9 = vld [vmem:[%s7863_s1 + $0xa] ss:$0 sm:$0xff] }
  0xab   : > { %8521 = vst [vmem:[#allocation47_spill] sm:$0xff] %v5285_v35  ;;  %v1114_v30 = vmul.f32 %v5294_v14, %v5265_v40  ;;  %v1115_v50 = vmul.f32 %v5294_v14, %v5274_v53  ;;  %8524 = vst [vmem:[#allocation85_spill] sm:$0xff] %v5301_v27  ;;  %v3639_v45 = vld [vmem:[%s4101_s19 + $0x4a] sm:$0xff]  ;;  %v3640_v48 = vld [vmem:[%s4101_s19 + $0x52] sm:$0xff] }
  0xac   : > { %v1009_v63 = vadd.f32 %v977_v5, %v940_v26  ;;  %8525 = vst [vmem:[#allocation19_spill] sm:$0xff] %v5306_v9  ;;  %v1292_v24 = vmul.f32 %v3639_v45, %v5306_v9  ;;  %v1293_v18 = vmul.f32 %v3640_v48, %v5306_v9  ;;  %v2247_v33 = vadd.f32 %v2215_v3, %v2178_v22  ;;  %v5313_v26 = vld [vmem:[%s4101_s19 + $0x9a] sm:$0xff]  ;;  %v5318_v35 = vld [vmem:[%s7863_s1 + $0x12] ss:$0 sm:$0xff]  ;;  %v8535_v9 = vld [vmem:[#allocation49_spill] sm:$0xff] }
  0xad   : > { %v2315_v57 = vadd.f32 %v2283_v54, %v2246_v12  ;;  %v1077_v5 = vadd.f32 %v1045_v32, %v1008_v34  ;;  %8526 = vst [vmem:[#allocation86_spill] sm:$0xff] %v5313_v26  ;;  %8527 = vst [vmem:[#allocation87_spill] sm:$0xff] %v5318_v35  ;;  %v1361_v13 = vmul.f32 %v5321_v25, %v5318_v35  ;;  %v5333_v34 = vld [vmem:[%s7863_s1 + $0x1a] ss:$0 sm:$0xff]  ;;  %v8531_v54 = vld [vmem:[#allocation25_spill] sm:$0xff] }
  0xae   : > { %v1078_v45 = vadd.f32 %v1046_v15, %v1009_v63  ;;  %v1362_v3 = vmul.f32 %v5326_v41, %v5318_v35  ;;  %8530 = vst [vmem:[#allocation53_spill] sm:$0xff] %v5333_v34  ;;  %v1430_v32 = vmul.f32 %v5333_v34, %v8531_v54  ;;  %v8532_v22 = vld [vmem:[#allocation26_spill] sm:$0xff]  ;;  %v2316_v48 = vadd.f32 %v2284_v61, %v2247_v33 }
  0xaf   : > { %v1431_v12 = vmul.f32 %v5333_v34, %v8532_v22  ;;  %v2354_v63 = vmul.f32 %v4749_v56, %v2315_v57  ;;  %v1146_v15 = vadd.f32 %v1114_v30, %v1077_v5  ;;  %v1499_v35 = vmul.f32 %v5343_v43, %v5301_v27  ;;  %v5350_v54 = vld [vmem:[%s4101_s19 + $0x93] sm:$0xff]  ;;  %v5362_v27 = vld [vmem:[%s4101_s19 + $0x9b] sm:$0xff] }
  0xb0   : > { %v1147_v41 = vadd.f32 %v1115_v50, %v1078_v45  ;;  %v1500_v25 = vmul.f32 %v5343_v43, %v5313_v26  ;;  %8534 = vst [vmem:[#allocation90_spill] sm:$0xff] %v5350_v54  ;;  %v1677_v61 = vmul.f32 %v8484_v20, %v8535_v9  ;;  %v8536_v33 = vld [vmem:[#allocation50_spill] sm:$0xff]  ;;  %v2355_v30 = vmul.f32 %v4749_v56, %v2316_v48  ;;  %v8537_v34 = vld [vmem:[#allocation39_spill] sm:$0xff]  ;;  %v8539_v50 = vld [vmem:[#allocation52_spill] sm:$0xff] }
  0xb1   : > { %v5356_v57 = vmul.f32 %v8484_v20, %v8536_v33  ;;  %v2393_v5 = vadd.f32 %v4780_v7, %v2354_v63  ;;  %v1255_v22 = vadd.f32 %v8537_v34, %v1146_v15  ;;  %8538 = vst [vmem:[#allocation62_spill] sm:$0xff] %v5362_v27  ;;  %v1746_v45 = vmul.f32 %v8487_v28, %v8539_v50  ;;  %v8540_v43 = vld [vmem:[#allocation40_spill] sm:$0xff]  ;;  %v8541_v14 = vld [vmem:[#allocation58_spill] sm:$0xff]  ;;  %v8543_v48 = vld [vmem:[#allocation21_spill] sm:$0xff] }
  0xb2   : > { %v1256_v26 = vadd.f32 %v8540_v43, %v1147_v41  ;;  %v5369_v9 = vmul.f32 %v8487_v28, %v8541_v14  ;;  %v8542_v20 = vld [vmem:[#allocation28_spill] sm:$0xff]  ;;  %v5377_v63 = vmul.f32 %v8490_v46, %v8543_v48  ;;  %v2394_v34 = vadd.f32 %v4780_v7, %v2355_v30  ;;  %v5405_v7 = vld [vmem:[%s4101_s19 + $0xb0] sm:$0xff] }
  0xb3   : > { %v5373_v33 = vmul.f32 %v8490_v46, %v8542_v20  ;;  %v2425_v15 = vmax.f32 %v2393_v5, 0.0  ;;  %v1324_v50 = vadd.f32 %v1292_v24, %v1255_v22  ;;  %v5382_v43 = vmul.f32 %v8492_v60, %v5350_v54  ;;  %v5391_v28 = vld [vmem:[%s7863_s1] ss:$0 sm:$0xff]  ;;  %v5398_v5 = vld [vmem:[%s4101_s19 + $0xa8] sm:$0xff]  ;;  %8546 = vst [vmem:[#allocation91_spill] sm:$0xff] %v5405_v7 }
  0xb4   : > { %v1325_v41 = vadd.f32 %v1293_v18, %v1256_v26  ;;  %v5386_v14 = vmul.f32 %v8492_v60, %v5362_v27  ;;  %8544 = vst [vmem:[#allocation63_spill] sm:$0xff] %v5391_v28  ;;  %v451_v46 = vmul.f32 %v5391_v28, %v5167_v58  ;;  %v452_v24 = vmul.f32 %v5391_v28, %v5179_v2 }
  0xb5   : > { %v2426_v22 = vmax.f32 %v2394_v34, 0.0  ;;  %v1393_v30 = vadd.f32 %v1361_v13, %v1324_v50  ;;  %8545 = vst [vmem:[#allocation30_spill] sm:$0xff] %v5398_v5  ;;  %v521_v18 = vmul.f32 %v5189_v49, %v5172_v1  ;;  %v522_v60 = vmul.f32 %v5198_v37, %v5172_v1  ;;  %v5422_v37 = vld [vmem:[%s4101_s19 + $0x94] sm:$0xff] }
  0xb6   : > { %v1394_v26 = vadd.f32 %v1362_v3, %v1325_v41  ;;  %v591_v58 = vmul.f32 %v5186_v47, %v8505_v4  ;;  %v592_v2 = vmul.f32 %v5186_v47, %v8506_v16  ;;  %v661_v13 = vmul.f32 %v5211_v44, %v5194_v62  ;;  %8547 = vst [vmem:[#allocation92_spill] sm:$0xff] %v5422_v37 }
  0xb7   : > { %v2448_v34 = vpack.c.bf16 %v2426_v22, %v2425_v15  ;;  %v1462_v50 = vadd.f32 %v1430_v32, %v1393_v30  ;;  %v553_v56 = vadd.f32 %v521_v18, %v451_v46  ;;  %v554_v49 = vadd.f32 %v522_v60, %v452_v24  ;;  %v8550_v30 = vld [vmem:[#allocation55_spill] sm:$0xff] }
  0xb8   : > { %v1463_v28 = vadd.f32 %v1431_v12, %v1394_v26  ;;  %v5415_v3 = vmul.f32 %v4523_v11, %v8464_v36  ;;  %v662_v41 = vmul.f32 %v5211_v44, %v5205_v6  ;;  %v731_v4 = vmul.f32 %v5220_v23, %v5398_v5  ;;  %v5429_v11 = vld [vmem:[%s7863_s1 + $0xc] ss:$0 sm:$0xff] }
  0xb9   : > { %3503 = vmatmul.mubr.bf16.vlgmr.msra.gmra.mxu1 %v2448_v34  ;;  %v1531_v16 = vadd.f32 %v1499_v35, %v1462_v50  ;;  %v623_v15 = vadd.f32 %v591_v58, %v553_v56  ;;  %v624_v32 = vadd.f32 %v592_v2, %v554_v49  ;;  %v732_v12 = vmul.f32 %v5220_v23, %v5405_v7  ;;  %v5463_v2 = vld [vmem:[%s4101_s19 + $0xa9] sm:$0xff] }
  0xba   : > { %v1532_v46 = vadd.f32 %v1500_v25, %v1463_v28  ;;  %v5433_v36 = vmul.f32 %v5429_v11, %v8467_v19  ;;  %v5437_v35 = vmul.f32 %v4571_v8, %v8468_v38  ;;  %v5441_v56 = vmul.f32 %v4571_v8, %v8475_v31  ;;  %v8548_v25 = vld [vmem:[#allocation54_spill] sm:$0xff]  ;;  %v5445_v28 = vld [vmem:[%s4101_s19 + $0x9c] sm:$0xff]  ;;  %8551 = vst [vmem:[#allocation65_spill] sm:$0xff] %v5463_v2  ;;  %v5617_v5 = vld [vmem:[%s4101_s19 + $0x128] sm:$0xff] }
  0xbb   : > { %v1640_v49 = vadd.f32 %v8548_v25, %v1531_v16  ;;  %8549 = vst [vmem:[#allocation34_spill] sm:$0xff] %v5445_v28  ;;  %v5449_v24 = vmul.f32 %v4590_v17, %v5094_v55  ;;  %v693_v22 = vadd.f32 %v661_v13, %v623_v15  ;;  %v694_v19 = vadd.f32 %v662_v41, %v624_v32  ;;  %v5466_v13 = vld [vmem:[%s4101_s19 + $0xb1] sm:$0xff]  ;;  %v8553_v16 = vld [vmem:[#allocation29_spill] sm:$0xff]  ;;  %v8555_v25 = vld [vmem:[#allocation84_spill] sm:$0xff] }
  0xbc   : > { %v1641_v18 = vadd.f32 %v8550_v30, %v1532_v46  ;;  %v5454_v38 = vmul.f32 %v4590_v17, %v5110_v10  ;;  %v5458_v8 = vmul.f32 %v4620_v0, %v5422_v37  ;;  %v909_v31 = vmul.f32 %v5256_v39, %v5236_v21  ;;  %8552 = vst [vmem:[#allocation66_spill] sm:$0xff] %v5466_v13  ;;  %v8554_v32 = vld [vmem:[#allocation31_spill] sm:$0xff]  ;;  %v5597_v39 = vld [vmem:[%s4101_s19 + $0x108] sm:$0xff] }
  0xbd   : > { %v1709_v60 = vadd.f32 %v1677_v61, %v1640_v49  ;;  %v763_v26 = vadd.f32 %v731_v4, %v693_v22  ;;  %v764_v58 = vadd.f32 %v732_v12, %v694_v19  ;;  %v910_v34 = vmul.f32 %v5269_v52, %v5236_v21  ;;  %v5492_v19 = vld [vmem:[%s4101_s19 + $0xaa] sm:$0xff]  ;;  %v5495_v30 = vld [vmem:[%s4101_s19 + $0xb2] sm:$0xff]  ;;  %8582 = vst [vmem:[#allocation98_spill] sm:$0xff] %v5617_v5 }
  0xbe   : > { %v1710_v17 = vadd.f32 %v5356_v57, %v1641_v18  ;;  %v5473_v50 = vmul.f32 %v4620_v0, %v5445_v28  ;;  %v978_v61 = vmul.f32 %v5253_v59, %v8520_v29  ;;  %v979_v41 = vmul.f32 %v5253_v59, %v8522_v42  ;;  %8556 = vst [vmem:[#allocation93_spill] sm:$0xff] %v5492_v19  ;;  %v8558_v18 = vld [vmem:[#allocation19_spill] sm:$0xff] }
  0xbf   : > { %v1778_v4 = vadd.f32 %v1746_v45, %v1709_v60  ;;  %v872_v15 = vadd.f32 %v8553_v16, %v763_v26  ;;  %v873_v12 = vadd.f32 %v8554_v32, %v764_v58  ;;  %v1047_v46 = vmul.f32 %v5279_v51, %v5265_v40  ;;  %8557 = vst [vmem:[#allocation94_spill] sm:$0xff] %v5495_v30  ;;  %v8559_v60 = vld [vmem:[#allocation88_spill] sm:$0xff]  ;;  %v8560_v58 = vld [vmem:[#allocation51_spill] sm:$0xff]  ;;  %v8561_v16 = vld [vmem:[#allocation25_spill] sm:$0xff] }
  0xc0   : > { %v1779_v57 = vadd.f32 %v5369_v9, %v1710_v17  ;;  %v1048_v0 = vmul.f32 %v5279_v51, %v5274_v53  ;;  %v1116_v49 = vmul.f32 %v8555_v25, %v5463_v2  ;;  %v1117_v29 = vmul.f32 %v8555_v25, %v5466_v13  ;;  %v8562_v32 = vld [vmem:[#allocation87_spill] sm:$0xff]  ;;  %v8567_v53 = vld [vmem:[#allocation89_spill] sm:$0xff] }
  0xc1   : > { %v1847_v42 = vadd.f32 %v5373_v33, %v1778_v4  ;;  %v941_v45 = vadd.f32 %v909_v31, %v872_v15  ;;  %v942_v22 = vadd.f32 %v910_v34, %v873_v12  ;;  %v1294_v9 = vmul.f32 %v8559_v60, %v8558_v18  ;;  %v8563_v33 = vld [vmem:[#allocation26_spill] sm:$0xff]  ;;  %v8564_v12 = vld [vmem:[#allocation85_spill] sm:$0xff] }
  0xc2   : > { %v1848_v26 = vadd.f32 %v5377_v63, %v1779_v57  ;;  %v1295_v17 = vmul.f32 %v8560_v58, %v8558_v18  ;;  %v1363_v13 = vmul.f32 %v8562_v32, %v8561_v16  ;;  %v1364_v31 = vmul.f32 %v8562_v32, %v8563_v33  ;;  %v8565_v60 = vld [vmem:[#allocation53_spill] sm:$0xff]  ;;  %v8566_v57 = vld [vmem:[#allocation86_spill] sm:$0xff] }
  0xc3   : > { %v1916_v34 = vadd.f32 %v5382_v43, %v1847_v42  ;;  %v1010_v4 = vadd.f32 %v978_v61, %v941_v45  ;;  %v1011_v15 = vadd.f32 %v979_v41, %v942_v22  ;;  %v1432_v2 = vmul.f32 %v8565_v60, %v8564_v12  ;;  %v8568_v43 = vld [vmem:[#allocation69_spill] sm:$0xff]  ;;  %v5525_v22 = vld [vmem:[%s4101_s19 + $0xb3] sm:$0xff] }
  0xc4   : > { %v1917_v63 = vadd.f32 %v5386_v14, %v1848_v26  ;;  %v1433_v58 = vmul.f32 %v8565_v60, %v8566_v57  ;;  %v5514_v16 = vmul.f32 %v8567_v53, %v5492_v19  ;;  %v5518_v33 = vmul.f32 %v8567_v53, %v5495_v30  ;;  %v5522_v45 = vld [vmem:[%s4101_s19 + $0xab] sm:$0xff]  ;;  %8570 = vst [vmem:[#allocation82_spill] sm:$0xff] %v5525_v22  ;;  %v5533_v26 = vld [vmem:[%s4101_s19 + $0x63] sm:$0xff] }
  0xc5   : > { %v2025_v61 = vadd.f32 %v8568_v43, %v1916_v34  ;;  %v1079_v42 = vadd.f32 %v1047_v46, %v1010_v4  ;;  %v1080_v41 = vadd.f32 %v1048_v0, %v1011_v15  ;;  %8569 = vst [vmem:[#allocation80_spill] sm:$0xff] %v5522_v45  ;;  %v5530_v14 = vld [vmem:[%s7863_s1 + $0xb] ss:$0 sm:$0xff]  ;;  %8572 = vst [vmem:[#allocation96_spill] sm:$0xff] %v5533_v26  ;;  %v8573_v30 = vld [vmem:[#allocation70_spill] sm:$0xff] }
  0xc6   : > { %8571 = vst [vmem:[#allocation95_spill] sm:$0xff] %v5530_v14  ;;  %v5537_v19 = vmul.f32 %v5533_v26, %v5530_v14  ;;  %v2026_v57 = vadd.f32 %v8573_v30, %v1917_v63  ;;  %v5541_v34 = vld [vmem:[%s4101_s19 + $0x6b] sm:$0xff]  ;;  %v5550_v0 = vld [vmem:[%s7863_s1 + $0x13] ss:$0 sm:$0xff]  ;;  %v606_v6 = vmul.f32 %v5617_v5, %v5186_v47 }
  0xc7   : > { %8574 = vst [vmem:[#allocation67_spill] sm:$0xff] %v5541_v34  ;;  %v5545_v46 = vmul.f32 %v5541_v34, %v5530_v14  ;;  %v5554_v4 = vmul.f32 %v5550_v0, %v8542_v20  ;;  %v5558_v15 = vmul.f32 %v5550_v0, %v8543_v48  ;;  %v2094_v30 = vadd.f32 %v5415_v3, %v2025_v61  ;;  %v5564_v34 = vld [vmem:[%s7863_s1 + $0x1b] ss:$0 sm:$0xff]  ;;  %v5578_v3 = vld [vmem:[%s7863_s1 + $0x23] ss:$0 sm:$0xff] }
  0xc8   : > { %v1148_v63 = vadd.f32 %v1116_v49, %v1079_v42  ;;  %v1149_v43 = vadd.f32 %v1117_v29, %v1080_v41  ;;  %8575 = vst [vmem:[#allocation68_spill] sm:$0xff] %v5564_v34  ;;  %v5568_v26 = vmul.f32 %v5564_v34, %v5350_v54  ;;  %v2095_v20 = vadd.f32 %v5433_v36, %v2026_v57  ;;  %v8577_v57 = vld [vmem:[#allocation43_spill] sm:$0xff]  ;;  %v8578_v42 = vld [vmem:[#allocation44_spill] sm:$0xff] }
  0xc9   : > { %v5573_v48 = vmul.f32 %v5564_v34, %v5362_v27  ;;  %8576 = vst [vmem:[#allocation83_spill] sm:$0xff] %v5578_v3  ;;  %v5582_v49 = vmul.f32 %v5578_v3, %v5522_v45  ;;  %v5586_v29 = vmul.f32 %v5578_v3, %v5525_v22  ;;  %v2163_v36 = vadd.f32 %v5437_v35, %v2094_v30  ;;  %v3654_v27 = vld [vmem:[%s4101_s19 + $0xf0] sm:$0xff]  ;;  %v8579_v54 = vld [vmem:[#allocation63_spill] sm:$0xff] }
  0xca   : > { %v1257_v61 = vadd.f32 %v8577_v57, %v1148_v63  ;;  %v1258_v41 = vadd.f32 %v8578_v42, %v1149_v43  ;;  %v465_v12 = vmul.f32 %v3654_v27, %v8579_v54  ;;  %v2164_v40 = vadd.f32 %v5441_v56, %v2095_v20  ;;  %v3655_v45 = vld [vmem:[%s4101_s19 + $0xf8] sm:$0xff]  ;;  %v5602_v35 = vld [vmem:[%s4101_s19 + $0x110] sm:$0xff]  ;;  %v5608_v56 = vld [vmem:[%s4101_s19 + $0x120] sm:$0xff] }
  0xcb   : > { %v466_v52 = vmul.f32 %v3655_v45, %v8579_v54  ;;  %v535_v22 = vmul.f32 %v5597_v39, %v5172_v1  ;;  %v536_v30 = vmul.f32 %v5602_v35, %v5172_v1  ;;  %v2232_v63 = vadd.f32 %v5449_v24, %v2163_v36  ;;  %8580 = vst [vmem:[#allocation97_spill] sm:$0xff] %v5608_v56  ;;  %v5614_v57 = vld [vmem:[%s4101_s19 + $0x150] sm:$0xff]  ;;  %v5623_v36 = vld [vmem:[%s4101_s19 + $0x158] sm:$0xff] }
  0xcc   : > { %v1326_v27 = vadd.f32 %v1294_v9, %v1257_v61  ;;  %v1327_v43 = vadd.f32 %v1295_v17, %v1258_v41  ;;  %v605_v45 = vmul.f32 %v5608_v56, %v5186_v47  ;;  %v2233_v20 = vadd.f32 %v5454_v38, %v2164_v40  ;;  %8581 = vst [vmem:[#allocation77_spill] sm:$0xff] %v5614_v57  ;;  %v8584_v61 = vld [vmem:[#allocation23_spill] sm:$0xff] }
  0xcd   : > { %v567_v42 = vadd.f32 %v535_v22, %v465_v12  ;;  %v568_v7 = vadd.f32 %v536_v30, %v466_v52  ;;  %v2301_v24 = vadd.f32 %v5458_v8, %v2232_v63  ;;  %8583 = vst [vmem:[#allocation46_spill] sm:$0xff] %v5623_v36  ;;  %v675_v41 = vmul.f32 %v5211_v44, %v8584_v61  ;;  %v8585_v52 = vld [vmem:[#allocation36_spill] sm:$0xff] }
  0xce   : > { %v1395_v9 = vadd.f32 %v1363_v13, %v1326_v27  ;;  %v1396_v17 = vadd.f32 %v1364_v31, %v1327_v43  ;;  %v2302_v40 = vadd.f32 %v5473_v50, %v2233_v20  ;;  %v676_v22 = vmul.f32 %v5211_v44, %v8585_v52  ;;  %v8586_v30 = vld [vmem:[#allocation100_spill] sm:$0xff] }
  0xcf   : > { %v637_v38 = vadd.f32 %v605_v45, %v567_v42  ;;  %v638_v12 = vadd.f32 %v606_v6, %v568_v7  ;;  %v2340_v62 = vmul.f32 %v8586_v30, %v2301_v24  ;;  %v745_v13 = vmul.f32 %v5220_v23, %v5614_v57  ;;  %v8587_v7 = vld [vmem:[#allocation105_spill] sm:$0xff] }
  0xd0   : > { %v1464_v47 = vadd.f32 %v1432_v2, %v1395_v9  ;;  %v1465_v8 = vadd.f32 %v1433_v58, %v1396_v17  ;;  %v2341_v31 = vmul.f32 %v8586_v30, %v2302_v40  ;;  %v746_v50 = vmul.f32 %v5220_v23, %v5623_v36  ;;  %v5642_v2 = vld [vmem:[%s7863_s1 + $0x1] ss:$0 sm:$0xff]  ;;  %v3661_v58 = vld [vmem:[%s4101_s19 + $0xf1] sm:$0xff] }
  0xd1   : > { %v707_v63 = vadd.f32 %v675_v41, %v637_v38  ;;  %v708_v27 = vadd.f32 %v676_v22, %v638_v12  ;;  %v2379_v6 = vadd.f32 %v8587_v7, %v2340_v62  ;;  %v854_v20 = vmul.f32 %v3661_v58, %v5642_v2  ;;  %v3662_v62 = vld [vmem:[%s4101_s19 + $0xf9] sm:$0xff]  ;;  %v5652_v38 = vld [vmem:[%s4101_s19 + $0x109] sm:$0xff] }
  0xd2   : > { %v1533_v43 = vadd.f32 %v5514_v16, %v1464_v47  ;;  %v1534_v45 = vadd.f32 %v5518_v33, %v1465_v8  ;;  %v2380_v42 = vadd.f32 %v8587_v7, %v2341_v31  ;;  %v855_v47 = vmul.f32 %v3662_v62, %v5642_v2  ;;  %v8588_v33 = vld [vmem:[#allocation59_spill] sm:$0xff]  ;;  %v8589_v41 = vld [vmem:[#allocation60_spill] sm:$0xff] }
  0xd3   : > { %v777_v24 = vadd.f32 %v745_v13, %v707_v63  ;;  %v778_v9 = vadd.f32 %v746_v50, %v708_v27  ;;  %v2411_v16 = vmax.f32 %v2379_v6, 0.0  ;;  %v923_v12 = vmul.f32 %v5652_v38, %v5236_v21  ;;  %v5657_v13 = vld [vmem:[%s4101_s19 + $0x111] sm:$0xff]  ;;  %v5667_v7 = vld [vmem:[%s4101_s19 + $0x159] sm:$0xff]  ;;  %v5670_v6 = vld [vmem:[%s4101_s19 + $0x121] sm:$0xff] }
  0xd4   : > { %v1642_v17 = vadd.f32 %v8588_v33, %v1533_v43  ;;  %v1643_v40 = vadd.f32 %v8589_v41, %v1534_v45  ;;  %v2412_v22 = vmax.f32 %v2380_v42, 0.0  ;;  %v924_v31 = vmul.f32 %v5657_v13, %v5236_v21  ;;  %v5664_v50 = vld [vmem:[%s4101_s19 + $0x151] sm:$0xff]  ;;  %8591 = vst [vmem:[#allocation101_spill] sm:$0xff] %v5667_v7  ;;  %8592 = vst [vmem:[#allocation48_spill] sm:$0xff] %v5670_v6  ;;  %v5675_v45 = vld [vmem:[%s4101_s19 + $0x129] sm:$0xff] }
  0xd5   : > { %v886_v30 = vadd.f32 %v854_v20, %v777_v24  ;;  %v887_v8 = vadd.f32 %v855_v47, %v778_v9  ;;  %8590 = vst [vmem:[#allocation99_spill] sm:$0xff] %v5664_v50  ;;  %v992_v43 = vmul.f32 %v5670_v6, %v5253_v59  ;;  %8593 = vst [vmem:[#allocation102_spill] sm:$0xff] %v5675_v45  ;;  %v8594_v24 = vld [vmem:[#allocation37_spill] sm:$0xff] }
  0xd6   : > { %v1711_v63 = vadd.f32 %v5537_v19, %v1642_v17  ;;  %v1712_v27 = vadd.f32 %v5545_v46, %v1643_v40  ;;  %v993_v58 = vmul.f32 %v5675_v45, %v5253_v59  ;;  %v2441_v20 = vpack.c.bf16 %v2412_v22, %v2411_v16  ;;  %v5684_v47 = vld [vmem:[%s4101_s19 + $0x64] sm:$0xff] }
  0xd7   : > { %v955_v42 = vadd.f32 %v923_v12, %v886_v30  ;;  %v956_v19 = vadd.f32 %v924_v31, %v887_v8  ;;  %v1061_v46 = vmul.f32 %v5279_v51, %v8594_v24  ;;  %8595 = vst [vmem:[#allocation103_spill] sm:$0xff] %v5684_v47  ;;  %v2064_v33 = vmul.f32 %v5684_v47, %v5429_v11  ;;  %v8596_v17 = vld [vmem:[#allocation41_spill] sm:$0xff]  ;;  %v5704_v31 = vld [vmem:[%s7863_s1 + $0x14] ss:$0 sm:$0xff] }
  0xd8   : > { %v1780_v9 = vadd.f32 %v5554_v4, %v1711_v63  ;;  %v1781_v62 = vadd.f32 %v5558_v15, %v1712_v27  ;;  %v1062_v41 = vmul.f32 %v5279_v51, %v8596_v17  ;;  %3490 = vmatprep.mubr.bf16.mxu0 %v2441_v20  ;;  %v1130_v12 = vmul.f32 %v8555_v25, %v5664_v50  ;;  %v5697_v30 = vld [vmem:[%s4101_s19 + $0x6c] sm:$0xff] }
  0xd9   : > { %v1024_v16 = vadd.f32 %v992_v43, %v955_v42  ;;  %v1025_v40 = vadd.f32 %v993_v58, %v956_v19  ;;  %v1131_v4 = vmul.f32 %v8555_v25, %v5667_v7  ;;  %8597 = vst [vmem:[#allocation56_spill] sm:$0xff] %v5697_v30  ;;  %v2065_v8 = vmul.f32 %v5697_v30, %v5429_v11  ;;  %v5709_v27 = vld [vmem:[%s4101_s19 + $0xac] sm:$0xff]  ;;  %v3672_v42 = vld [vmem:[%s4101_s19 + $0xfa] sm:$0xff] }
  0xda   : > { %v1849_v15 = vadd.f32 %v5568_v26, %v1780_v9  ;;  %v1850_v22 = vadd.f32 %v5573_v48, %v1781_v62  ;;  %v2133_v63 = vmul.f32 %v5704_v31, %v5094_v55  ;;  %8598 = vst [vmem:[#allocation104_spill] sm:$0xff] %v5709_v27  ;;  %v5714_v48 = vld [vmem:[%s7863_s1 + $0x2] ss:$0 sm:$0xff]  ;;  %v3671_v58 = vld [vmem:[%s4101_s19 + $0xf2] sm:$0xff]  ;;  %v5727_v62 = vld [vmem:[%s7863_s1 + $0x1c] ss:$0 sm:$0xff] }
  0xdb   : > { %v1093_v26 = vadd.f32 %v1061_v46, %v1024_v16  ;;  %v1094_v43 = vadd.f32 %v1062_v41, %v1025_v40  ;;  %8599 = vst [vmem:[#allocation106_spill] sm:$0xff] %v5714_v48  ;;  %v1239_v20 = vmul.f32 %v3671_v58, %v5714_v48  ;;  %v1240_v19 = vmul.f32 %v3672_v42, %v5714_v48  ;;  %v5732_v16 = vld [vmem:[%s4101_s19 + $0xb4] sm:$0xff]  ;;  %v8610_v48 = vld [vmem:[#allocation33_spill] sm:$0xff] }
  0xdc   : > { %v1918_v9 = vadd.f32 %v5582_v49, %v1849_v15  ;;  %v1919_v55 = vadd.f32 %v5586_v29, %v1850_v22  ;;  %v2134_v46 = vmul.f32 %v5704_v31, %v5110_v10  ;;  %v2202_v41 = vmul.f32 %v5727_v62, %v5422_v37  ;;  %8600 = vst [vmem:[#allocation57_spill] sm:$0xff] %v5732_v16  ;;  %v5735_v29 = vld [vmem:[%s4101_s19 + $0x10a] sm:$0xff]  ;;  %v5740_v15 = vld [vmem:[%s4101_s19 + $0x112] sm:$0xff] }
  0xdd   : > { %v1162_v40 = vadd.f32 %v1130_v12, %v1093_v26  ;;  %v1163_v49 = vadd.f32 %v1131_v4, %v1094_v43  ;;  %8601 = vst [vmem:[#allocation107_spill] sm:$0xff] %v5735_v29  ;;  %v1308_v10 = vmul.f32 %v5735_v29, %v8558_v18  ;;  %8602 = vst [vmem:[#allocation61_spill] sm:$0xff] %v5740_v15  ;;  %v8603_v58 = vld [vmem:[#allocation74_spill] sm:$0xff]  ;;  %v8604_v30 = vld [vmem:[#allocation47_spill] sm:$0xff] }
  0xde   : > { %v1309_v22 = vmul.f32 %v5740_v15, %v8558_v18  ;;  %v2027_v42 = vadd.f32 %v8603_v58, %v1918_v9  ;;  %v2028_v37 = vadd.f32 %v8604_v30, %v1919_v55  ;;  %v2203_v47 = vmul.f32 %v5727_v62, %v5445_v28  ;;  %v5751_v12 = vld [vmem:[%s7863_s1 + $0x24] ss:$0 sm:$0xff]  ;;  %v5756_v26 = vld [vmem:[%s4101_s19 + $0x152] sm:$0xff]  ;;  %v5759_v43 = vld [vmem:[%s4101_s19 + $0x15a] sm:$0xff] }
  0xdf   : > { %v2271_v4 = vmul.f32 %v5751_v12, %v5709_v27  ;;  %8605 = vst [vmem:[#allocation108_spill] sm:$0xff] %v5756_v26  ;;  %8606 = vst [vmem:[#allocation64_spill] sm:$0xff] %v5759_v43  ;;  %v1271_v18 = vadd.f32 %v1239_v20, %v1162_v40  ;;  %v1272_v15 = vadd.f32 %v1240_v19, %v1163_v49  ;;  %v5762_v9 = vld [vmem:[%s4101_s19 + $0x122] sm:$0xff]  ;;  %v5767_v55 = vld [vmem:[%s4101_s19 + $0x12a] sm:$0xff] }
  0xe0   : > { %8607 = vst [vmem:[#allocation109_spill] sm:$0xff] %v5762_v9  ;;  %v1377_v30 = vmul.f32 %v5762_v9, %v8562_v32  ;;  %8608 = vst [vmem:[#allocation111_spill] sm:$0xff] %v5767_v55  ;;  %v1378_v58 = vmul.f32 %v5767_v55, %v8562_v32  ;;  %v2096_v28 = vadd.f32 %v2064_v33, %v2027_v42  ;;  %v8609_v20 = vld [vmem:[#allocation32_spill] sm:$0xff] }
  0xe1   : > { %v2097_v27 = vadd.f32 %v2065_v8, %v2028_v37  ;;  %v2272_v29 = vmul.f32 %v5751_v12, %v5732_v16  ;;  %v1446_v19 = vmul.f32 %v8565_v60, %v8609_v20  ;;  %v1340_v40 = vadd.f32 %v1308_v10, %v1271_v18  ;;  %v5784_v42 = vld [vmem:[%s7863_s1 + $0x3] ss:$0 sm:$0xff]  ;;  %v3680_v18 = vld [vmem:[%s4101_s19 + $0xf3] sm:$0xff] }
  0xe2   : > { %v1341_v49 = vadd.f32 %v1309_v22, %v1272_v15  ;;  %v1447_v9 = vmul.f32 %v8565_v60, %v8610_v48  ;;  %v1515_v25 = vmul.f32 %v8567_v53, %v5756_v26  ;;  %v2165_v33 = vadd.f32 %v2133_v63, %v2096_v28  ;;  %8611 = vst [vmem:[#allocation18_spill] sm:$0xff] %v5784_v42  ;;  %v5789_v16 = vld [vmem:[%s4101_s19 + $0x153] sm:$0xff]  ;;  %v3681_v28 = vld [vmem:[%s4101_s19 + $0xfb] sm:$0xff] }
  0xe3   : > { %v2166_v37 = vadd.f32 %v2134_v46, %v2097_v27  ;;  %v1516_v8 = vmul.f32 %v8567_v53, %v5759_v43  ;;  %v1624_v10 = vmul.f32 %v3680_v18, %v5784_v42  ;;  %v1409_v15 = vadd.f32 %v1377_v30, %v1340_v40  ;;  %8612 = vst [vmem:[#allocation20_spill] sm:$0xff] %v5789_v16  ;;  %v5794_v27 = vld [vmem:[%s4101_s19 + $0x10b] sm:$0xff]  ;;  %v5799_v60 = vld [vmem:[%s4101_s19 + $0x15b] sm:$0xff]  ;;  %v5802_v26 = vld [vmem:[%s4101_s19 + $0x113] sm:$0xff] }
  0xe4   : > { %v1410_v22 = vadd.f32 %v1378_v58, %v1341_v49  ;;  %v1625_v63 = vmul.f32 %v3681_v28, %v5784_v42  ;;  %8613 = vst [vmem:[#allocation110_spill] sm:$0xff] %v5794_v27  ;;  %v1693_v46 = vmul.f32 %v5794_v27, %v5530_v14  ;;  %v2234_v53 = vadd.f32 %v2202_v41, %v2165_v33  ;;  %v5807_v58 = vld [vmem:[%s4101_s19 + $0x123] sm:$0xff]  ;;  %v5812_v28 = vld [vmem:[%s4101_s19 + $0x12b] sm:$0xff] }
  0xe5   : > { %v2235_v43 = vadd.f32 %v2203_v47, %v2166_v37  ;;  %8614 = vst [vmem:[#allocation114_spill] sm:$0xff] %v5799_v60  ;;  %8615 = vst [vmem:[#allocation112_spill] sm:$0xff] %v5802_v26  ;;  %v1694_v30 = vmul.f32 %v5802_v26, %v5530_v14  ;;  %v1762_v40 = vmul.f32 %v5807_v58, %v5550_v0  ;;  %v8618_v41 = vld [vmem:[#allocation42_spill] sm:$0xff]  ;;  %v8619_v14 = vld [vmem:[#allocation71_spill] sm:$0xff] }
  0xe6   : > { %8616 = vst [vmem:[#allocation113_spill] sm:$0xff] %v5807_v58  ;;  %v1478_v49 = vadd.f32 %v1446_v19, %v1409_v15  ;;  %v1479_v18 = vadd.f32 %v1447_v9, %v1410_v22  ;;  %8617 = vst [vmem:[#allocation16_spill] sm:$0xff] %v5812_v28  ;;  %v1763_v47 = vmul.f32 %v5812_v28, %v5550_v0  ;;  %v5827_v15 = vld [vmem:[%s7863_s1 + $0x4] ss:$0 sm:$0xff]  ;;  %v3687_v22 = vld [vmem:[%s4101_s19 + $0xf4] sm:$0xff] }
  0xe7   : > { %v1831_v33 = vmul.f32 %v5564_v34, %v8618_v41  ;;  %v2303_v37 = vadd.f32 %v2271_v4, %v2234_v53  ;;  %v2304_v27 = vadd.f32 %v2272_v29, %v2235_v43  ;;  %v1832_v26 = vmul.f32 %v5564_v34, %v8619_v14  ;;  %8620 = vst [vmem:[#allocation17_spill] sm:$0xff] %v5827_v15  ;;  %v5834_v29 = vld [vmem:[%s7864_s2] ss:$0 sm:$0xff] }
  0xe8   : > { %v1900_v42 = vmul.f32 %v5578_v3, %v5789_v16  ;;  %v1547_v58 = vadd.f32 %v1515_v25, %v1478_v49  ;;  %v1548_v19 = vadd.f32 %v1516_v8, %v1479_v18  ;;  %v1901_v9 = vmul.f32 %v5578_v3, %v5799_v60  ;;  %8621 = vst [vmem:[#allocation24_spill] sm:$0xff] %v5834_v29  ;;  %v3689_v43 = vld [vmem:[%s4101_s19 + $0xfc] sm:$0xff] }
  0xe9   : > { %v2009_v53 = vmul.f32 %v3687_v22, %v5827_v15  ;;  %v2342_v4 = vmul.f32 %v5834_v29, %v2303_v37  ;;  %v2343_v25 = vmul.f32 %v5834_v29, %v2304_v27  ;;  %v2010_v8 = vmul.f32 %v3689_v43, %v5827_v15  ;;  %v5849_v37 = vld [vmem:[%s7865_s3] ss:$0 sm:$0xff] }
  0xea   : > { %v467_v49 = vmul.f32 %v5597_v39, %v8579_v54  ;;  %v1656_v18 = vadd.f32 %v1624_v10, %v1547_v58  ;;  %v1657_v3 = vadd.f32 %v1625_v63, %v1548_v19  ;;  %v468_v22 = vmul.f32 %v5602_v35, %v8579_v54  ;;  %8622 = vst [vmem:[#allocation115_spill] sm:$0xff] %v5849_v37  ;;  %v8623_v10 = vld [vmem:[#allocation72_spill] sm:$0xff]  ;;  %v5858_v19 = vld [vmem:[%s4101_s19 + $0x168] sm:$0xff] }
  0xeb   : > { %v537_v60 = vmul.f32 %v5608_v56, %v5172_v1  ;;  %v2381_v27 = vadd.f32 %v5849_v37, %v2342_v4  ;;  %v2382_v43 = vadd.f32 %v5849_v37, %v2343_v25  ;;  %v538_v39 = vmul.f32 %v5617_v5, %v5172_v1  ;;  %8624 = vst [vmem:[#allocation27_spill] sm:$0xff] %v5858_v19  ;;  %v5861_v56 = vld [vmem:[%s4101_s19 + $0x170] sm:$0xff] }
  0xec   : > { %v607_v63 = vmul.f32 %v8623_v10, %v8584_v61  ;;  %v1725_v58 = vadd.f32 %v1693_v46, %v1656_v18  ;;  %v1726_v35 = vadd.f32 %v1694_v30, %v1657_v3  ;;  %8625 = vst [vmem:[#allocation116_spill] sm:$0xff] %v5861_v56  ;;  %v608_v15 = vmul.f32 %v8623_v10, %v8585_v52 }
  0xed   : > { %v569_v54 = vadd.f32 %v537_v60, %v467_v49  ;;  %v2413_v34 = vmax.f32 %v2381_v27, 0.0  ;;  %v2414_v4 = vmax.f32 %v2382_v43, 0.0  ;;  %v570_v25 = vadd.f32 %v538_v39, %v468_v22  ;;  %v5890_v39 = vld [vmem:[%s4101_s19 + $0x124] sm:$0xff] }
  0xee   : > { %v677_v5 = vmul.f32 %v5211_v44, %v5614_v57  ;;  %v1794_v1 = vadd.f32 %v1762_v40, %v1725_v58  ;;  %v1795_v61 = vadd.f32 %v1763_v47, %v1726_v35  ;;  %v678_v3 = vmul.f32 %v5211_v44, %v5623_v36  ;;  %v5881_v47 = vld [vmem:[%s4101_s19 + $0x114] sm:$0xff]  ;;  %8626 = vst [vmem:[#allocation22_spill] sm:$0xff] %v5890_v39  ;;  %v5895_v58 = vld [vmem:[%s4101_s19 + $0x12c] sm:$0xff] }
  0xef   : > { %v639_v46 = vadd.f32 %v607_v63, %v569_v54  ;;  %v2442_v30 = vpack.c.bf16 %v2414_v4, %v2413_v34  ;;  %v640_v18 = vadd.f32 %v608_v15, %v570_v25  ;;  %v747_v60 = vmul.f32 %v5220_v23, %v5858_v19  ;;  %v5876_v54 = vld [vmem:[%s4101_s19 + $0x10c] sm:$0xff]  ;;  %8627 = vst [vmem:[#allocation49_spill] sm:$0xff] %v5895_v58 }
  0xf0   : > { %v748_v52 = vmul.f32 %v5220_v23, %v5861_v56  ;;  %v1863_v49 = vadd.f32 %v1831_v33, %v1794_v1  ;;  %v1864_v22 = vadd.f32 %v1832_v26, %v1795_v61  ;;  %v856_v40 = vmul.f32 %v5652_v38, %v5642_v2 }
  0xf1   : > { %v709_v27 = vadd.f32 %v677_v5, %v639_v46  ;;  %3491 = vmatmul.mubr.bf16.gmra.mxu0 %v2442_v30  ;;  %v2078_v34 = vmul.f32 %v5876_v54, %v5429_v11  ;;  %v2079_v15 = vmul.f32 %v5881_v47, %v5429_v11  ;;  %v710_v1 = vadd.f32 %v678_v3, %v640_v18  ;;  %v8630_v30 = vld [vmem:[#allocation78_spill] sm:$0xff] }
  0xf2   : > { %v857_v5 = vmul.f32 %v5657_v13, %v5642_v2  ;;  %v1932_v26 = vadd.f32 %v1900_v42, %v1863_v49  ;;  %v1933_v33 = vadd.f32 %v1901_v9, %v1864_v22  ;;  %v925_v43 = vmul.f32 %v5670_v6, %v5236_v21  ;;  %v5902_v42 = vld [vmem:[%s4101_s19 + $0x154] sm:$0xff]  ;;  %v5905_v9 = vld [vmem:[%s4101_s19 + $0x15c] sm:$0xff] }
  0xf3   : > { %v779_v38 = vadd.f32 %v747_v60, %v709_v27  ;;  %v2147_v63 = vmul.f32 %v5890_v39, %v5704_v31  ;;  %v2148_v35 = vmul.f32 %v5895_v58, %v5704_v31  ;;  %v780_v4 = vadd.f32 %v748_v52, %v710_v1  ;;  %8628 = vst [vmem:[#allocation50_spill] sm:$0xff] %v5902_v42  ;;  %v8631_v60 = vld [vmem:[#allocation35_spill] sm:$0xff]  ;;  %v5914_v52 = vld [vmem:[%s4101_s19 + $0x169] sm:$0xff] }
  0xf4   : > { %v926_v13 = vmul.f32 %v5675_v45, %v5236_v21  ;;  %8629 = vst [vmem:[#allocation39_spill] sm:$0xff] %v5905_v9  ;;  %v2041_v25 = vadd.f32 %v2009_v53, %v1932_v26  ;;  %v2042_v61 = vadd.f32 %v2010_v8, %v1933_v33  ;;  %v994_v3 = vmul.f32 %v5253_v59, %v8594_v24  ;;  %v5919_v53 = vld [vmem:[%s4101_s19 + $0x171] sm:$0xff] }
  0xf5   : > { %v888_v46 = vadd.f32 %v856_v40, %v779_v38  ;;  %v2216_v18 = vmul.f32 %v5727_v62, %v8630_v30  ;;  %v2217_v49 = vmul.f32 %v5727_v62, %v8631_v60  ;;  %8632 = vst [vmem:[#allocation52_spill] sm:$0xff] %v5914_v52  ;;  %v889_v22 = vadd.f32 %v857_v5, %v780_v4  ;;  %v8634_v38 = vld [vmem:[#allocation84_spill] sm:$0xff] }
  0xf6   : > { %v995_v27 = vmul.f32 %v5253_v59, %v8596_v17  ;;  %v2110_v1 = vadd.f32 %v2078_v34, %v2041_v25  ;;  %v2111_v45 = vadd.f32 %v2079_v15, %v2042_v61  ;;  %8633 = vst [vmem:[#allocation40_spill] sm:$0xff] %v5919_v53  ;;  %v1063_v24 = vmul.f32 %v5279_v51, %v5664_v50  ;;  %v8635_v61 = vld [vmem:[#allocation106_spill] sm:$0xff] }
  0xf7   : > { %v957_v8 = vadd.f32 %v925_v43, %v888_v46  ;;  %v2285_v40 = vmul.f32 %v5751_v12, %v5902_v42  ;;  %v2286_v26 = vmul.f32 %v5751_v12, %v5905_v9  ;;  %v958_v5 = vadd.f32 %v926_v13, %v889_v22  ;;  %v8636_v46 = vld [vmem:[#allocation107_spill] sm:$0xff]  ;;  %v5936_v13 = vld [vmem:[%s4101_s19 + $0x16a] sm:$0xff] }
  0xf8   : > { %v1064_v17 = vmul.f32 %v5279_v51, %v5667_v7  ;;  %v2179_v34 = vadd.f32 %v2147_v63, %v2110_v1  ;;  %v2180_v15 = vadd.f32 %v2148_v35, %v2111_v45  ;;  %v1132_v43 = vmul.f32 %v8634_v38, %v5914_v52  ;;  %8637 = vst [vmem:[#allocation58_spill] sm:$0xff] %v5936_v13  ;;  %v8638_v22 = vld [vmem:[#allocation61_spill] sm:$0xff]  ;;  %v5941_v35 = vld [vmem:[%s4101_s19 + $0x172] sm:$0xff] }
  0xf9   : > { %v1026_v33 = vadd.f32 %v994_v3, %v957_v8  ;;  %v1027_v4 = vadd.f32 %v995_v27, %v958_v5  ;;  %v1133_v25 = vmul.f32 %v8634_v38, %v5919_v53  ;;  %v1241_v50 = vmul.f32 %v8636_v46, %v8635_v61  ;;  %8639 = vst [vmem:[#allocation28_spill] sm:$0xff] %v5941_v35  ;;  %v8640_v3 = vld [vmem:[#allocation19_spill] sm:$0xff]  ;;  %v8641_v1 = vld [vmem:[#allocation109_spill] sm:$0xff]  ;;  %v8644_v46 = vld [vmem:[#allocation64_spill] sm:$0xff] }
  0xfa   : > { %v2248_v6 = vadd.f32 %v2216_v18, %v2179_v34  ;;  %v2249_v56 = vadd.f32 %v2217_v49, %v2180_v15  ;;  %v1242_v63 = vmul.f32 %v8638_v22, %v8635_v61  ;;  %v1310_v27 = vmul.f32 %v8641_v1, %v8640_v3 }
  0xfb   : > { %v1095_v19 = vadd.f32 %v1063_v24, %v1026_v33  ;;  %v1096_v45 = vadd.f32 %v1064_v17, %v1027_v4  ;;  %v1311_v8 = vmul.f32 %v5767_v55, %v8640_v3  ;;  %v1379_v5 = vmul.f32 %v8562_v32, %v8609_v20  ;;  %v8642_v17 = vld [vmem:[#allocation108_spill] sm:$0xff]  ;;  %v8643_v33 = vld [vmem:[#allocation53_spill] sm:$0xff] }
  0xfc   : > { %v2317_v18 = vadd.f32 %v2285_v40, %v2248_v6  ;;  %v2318_v49 = vadd.f32 %v2286_v26, %v2249_v56  ;;  %v1380_v34 = vmul.f32 %v8562_v32, %v8610_v48  ;;  %v1448_v4 = vmul.f32 %v8643_v33, %v8642_v17  ;;  %v8645_v55 = vld [vmem:[#allocation89_spill] sm:$0xff]  ;;  %v8646_v40 = vld [vmem:[#allocation18_spill] sm:$0xff]  ;;  %v8649_v17 = vld [vmem:[#allocation95_spill] sm:$0xff] }
  0xfd   : > { %v1164_v24 = vadd.f32 %v1132_v43, %v1095_v19  ;;  %v1165_v15 = vadd.f32 %v1133_v25, %v1096_v45  ;;  %v1449_v22 = vmul.f32 %v8643_v33, %v8644_v46  ;;  %v1517_v1 = vmul.f32 %v8645_v55, %v5936_v13  ;;  %v8647_v26 = vld [vmem:[#allocation110_spill] sm:$0xff]  ;;  %v8648_v25 = vld [vmem:[#allocation112_spill] sm:$0xff]  ;;  %v8650_v46 = vld [vmem:[#allocation113_spill] sm:$0xff] }
  0xfe   : > { %v2356_v20 = vmul.f32 %v5834_v29, %v2317_v18  ;;  %v2357_v56 = vmul.f32 %v5834_v29, %v2318_v49  ;;  %v1518_v48 = vmul.f32 %v8645_v55, %v5941_v35  ;;  %v1626_v43 = vmul.f32 %v8647_v26, %v8646_v40  ;;  %v5970_v49 = vld [vmem:[%s4101_s19 + $0x16b] sm:$0xff]  ;;  %v8665_v29 = vld [vmem:[#allocation91_spill] sm:$0xff] }
  0xff   : > { %v1273_v6 = vadd.f32 %v1241_v50, %v1164_v24  ;;  %v1274_v19 = vadd.f32 %v1242_v63, %v1165_v15  ;;  %v1627_v45 = vmul.f32 %v8648_v25, %v8646_v40  ;;  %v1695_v53 = vmul.f32 %v8650_v46, %v8649_v17  ;;  %8651 = vst [vmem:[#allocation21_spill] sm:$0xff] %v5970_v49  ;;  %v5973_v50 = vld [vmem:[%s4101_s19 + $0x173] sm:$0xff] }
 0x100   : > { %v2395_v13 = vadd.f32 %v5849_v37, %v2356_v20  ;;  %v2396_v18 = vadd.f32 %v5849_v37, %v2357_v56  ;;  %8652 = vst [vmem:[#allocation54_spill] sm:$0xff] %v5973_v50  ;;  %v1696_v63 = vmul.f32 %v5812_v28, %v8649_v17  ;;  %v1764_v15 = vmul.f32 %v5550_v0, %v8618_v41  ;;  %v8653_v20 = vld [vmem:[#allocation68_spill] sm:$0xff]  ;;  %v8654_v46 = vld [vmem:[#allocation114_spill] sm:$0xff]  ;;  %v8656_v28 = vld [vmem:[#allocation17_spill] sm:$0xff] }
 0x101   : > { %v1342_v52 = vadd.f32 %v1310_v27, %v1273_v6  ;;  %v1343_v24 = vadd.f32 %v1311_v8, %v1274_v19  ;;  %v1765_v26 = vmul.f32 %v5550_v0, %v8619_v14  ;;  %v1833_v25 = vmul.f32 %v8653_v20, %v5789_v16  ;;  %v8655_v8 = vld [vmem:[#allocation83_spill] sm:$0xff] }
 0x102   : > { %v2427_v27 = vmax.f32 %v2395_v13, 0.0  ;;  %v2428_v56 = vmax.f32 %v2396_v18, 0.0  ;;  %v1834_v35 = vmul.f32 %v8653_v20, %v8654_v46  ;;  %v1902_v19 = vmul.f32 %v8655_v8, %v5970_v49  ;;  %v8657_v13 = vld [vmem:[#allocation73_spill] sm:$0xff]  ;;  %v8658_v18 = vld [vmem:[#allocation63_spill] sm:$0xff]  ;;  %v8661_v49 = vld [vmem:[#allocation14_spill] sm:$0xff] }
 0x103   : > { %v1411_v6 = vadd.f32 %v1379_v5, %v1342_v52  ;;  %v1412_v7 = vadd.f32 %v1380_v34, %v1343_v24  ;;  %v5989_v41 = vmul.f32 %v8655_v8, %v5973_v50  ;;  %v5993_v14 = vmul.f32 %v5876_v54, %v8656_v28  ;;  %v8659_v5 = vld [vmem:[#allocation75_spill] sm:$0xff]  ;;  %v6005_v50 = vld [vmem:[%s4101_s19 + $0x80] sm:$0xff] }
 0x104   : > { %v2449_v16 = vpack.c.bf16 %v2428_v56, %v2427_v27  ;;  %v453_v52 = vmul.f32 %v8658_v18, %v8657_v13  ;;  %v454_v46 = vmul.f32 %v8658_v18, %v8659_v5  ;;  %v6000_v24 = vld [vmem:[%s4101_s19 + $0x78] sm:$0xff]  ;;  %v524_v54 = vmul.f32 %v6005_v50, %v8661_v49  ;;  %v8664_v13 = vld [vmem:[#allocation30_spill] sm:$0xff] }
 0x105   : > { %v1480_v36 = vadd.f32 %v1448_v4, %v1411_v6  ;;  %v1481_v34 = vadd.f32 %v1449_v22, %v1412_v7  ;;  %8660 = vst [vmem:[#allocation55_spill] sm:$0xff] %v6000_v24  ;;  %v523_v57 = vmul.f32 %v6000_v24, %v8661_v49  ;;  %v8662_v27 = vld [vmem:[#allocation15_spill] sm:$0xff]  ;;  %v2012_v7 = vmul.f32 %v5881_v47, %v8656_v28  ;;  %v8663_v22 = vld [vmem:[#allocation76_spill] sm:$0xff] }
 0x106   : > { %v593_v4 = vmul.f32 %v8623_v10, %v8662_v27  ;;  %3506 = vmatprep.mubr.bf16.mxu1 %v2449_v16  ;;  %v594_v6 = vmul.f32 %v8623_v10, %v8663_v22  ;;  %v663_v5 = vmul.f32 %v5211_v44, %v8664_v13  ;;  %v556_v18 = vadd.f32 %v524_v54, %v454_v46  ;;  %v6024_v47 = vld [vmem:[%s4101_s19 + $0xc0] sm:$0xff]  ;;  %v8668_v54 = vld [vmem:[#allocation38_spill] sm:$0xff]  ;;  %v8671_v22 = vld [vmem:[#allocation81_spill] sm:$0xff] }
 0x107   : > { %v1549_v56 = vadd.f32 %v1517_v1, %v1480_v36  ;;  %v1550_v37 = vadd.f32 %v1518_v48, %v1481_v34  ;;  %v555_v24 = vadd.f32 %v523_v57, %v453_v52  ;;  %v664_v49 = vmul.f32 %v5211_v44, %v8665_v29  ;;  %8666 = vst [vmem:[#allocation29_spill] sm:$0xff] %v6024_v47  ;;  %v6029_v48 = vld [vmem:[%s4101_s19 + $0xc8] sm:$0xff] }
 0x108   : > { %v2080_v36 = vmul.f32 %v5890_v39, %v5429_v11  ;;  %v2081_v16 = vmul.f32 %v5895_v58, %v5429_v11  ;;  %v733_v10 = vmul.f32 %v6024_v47, %v5220_v23  ;;  %v626_v46 = vadd.f32 %v594_v6, %v556_v18  ;;  %8667 = vst [vmem:[#allocation31_spill] sm:$0xff] %v6029_v48  ;;  %v6043_v18 = vld [vmem:[%s4101_s19 + $0x174] sm:$0xff] }
 0x109   : > { %v1658_v27 = vadd.f32 %v1626_v43, %v1549_v56  ;;  %v1659_v1 = vadd.f32 %v1627_v45, %v1550_v37  ;;  %v625_v57 = vadd.f32 %v593_v4, %v555_v24  ;;  %v734_v44 = vmul.f32 %v6029_v48, %v5220_v23  ;;  %v6040_v45 = vld [vmem:[%s4101_s19 + $0x16c] sm:$0xff]  ;;  %8670 = vst [vmem:[#allocation87_spill] sm:$0xff] %v6043_v18  ;;  %v6052_v6 = vld [vmem:[%s4101_s19 + $0x79] sm:$0xff] }
 0x10a   : > { %v2149_v52 = vmul.f32 %v5704_v31, %v8630_v30  ;;  %v2150_v34 = vmul.f32 %v5704_v31, %v8631_v60  ;;  %v842_v56 = vmul.f32 %v5642_v2, %v8668_v54  ;;  %8669 = vst [vmem:[#allocation25_spill] sm:$0xff] %v6040_v45  ;;  %v696_v4 = vadd.f32 %v664_v49, %v626_v46  ;;  %v6057_v49 = vld [vmem:[%s4101_s19 + $0x81] sm:$0xff]  ;;  %v8672_v54 = vld [vmem:[#allocation79_spill] sm:$0xff]  ;;  %v8691_v58 = vld [vmem:[#allocation82_spill] sm:$0xff] }
 0x10b   : > { %v1727_v43 = vadd.f32 %v1695_v53, %v1658_v27  ;;  %v1728_v37 = vadd.f32 %v1696_v63, %v1659_v1  ;;  %v695_v24 = vadd.f32 %v663_v5, %v625_v57  ;;  %v843_v23 = vmul.f32 %v5642_v2, %v8671_v22 }
 0x10c   : > { %v2218_v30 = vmul.f32 %v5727_v62, %v5902_v42  ;;  %v2219_v60 = vmul.f32 %v5727_v62, %v5905_v9  ;;  %v911_v63 = vmul.f32 %v6052_v6, %v5236_v21  ;;  %v766_v5 = vadd.f32 %v734_v44, %v696_v4  ;;  %v8673_v44 = vld [vmem:[#allocation45_spill] sm:$0xff] }
 0x10d   : > { %v1796_v53 = vadd.f32 %v1764_v15, %v1727_v43  ;;  %v1797_v27 = vadd.f32 %v1765_v26, %v1728_v37  ;;  %v765_v1 = vadd.f32 %v733_v10, %v695_v24  ;;  %v912_v15 = vmul.f32 %v6057_v49, %v5236_v21  ;;  %v8674_v21 = vld [vmem:[#allocation65_spill] sm:$0xff] }
 0x10e   : > { %v2287_v46 = vmul.f32 %v5751_v12, %v6040_v45  ;;  %v2288_v43 = vmul.f32 %v5751_v12, %v6043_v18  ;;  %v980_v22 = vmul.f32 %v5253_v59, %v8672_v54  ;;  %v875_v10 = vadd.f32 %v843_v23, %v766_v5  ;;  %v6074_v9 = vld [vmem:[%s4101_s19 + $0xc1] sm:$0xff]  ;;  %v8679_v5 = vld [vmem:[#allocation51_spill] sm:$0xff] }
 0x10f   : > { %v1865_v57 = vadd.f32 %v1833_v25, %v1796_v53  ;;  %v1866_v26 = vadd.f32 %v1834_v35, %v1797_v27  ;;  %v874_v37 = vadd.f32 %v842_v56, %v765_v1  ;;  %v981_v24 = vmul.f32 %v5253_v59, %v8673_v44  ;;  %v8675_v53 = vld [vmem:[#allocation66_spill] sm:$0xff]  ;;  %8676 = vst [vmem:[#allocation26_spill] sm:$0xff] %v6074_v9  ;;  %v8678_v1 = vld [vmem:[#allocation88_spill] sm:$0xff]  ;;  %v8682_v18 = vld [vmem:[#allocation93_spill] sm:$0xff] }
 0x110   : > { %v1049_v25 = vmul.f32 %v5279_v51, %v8674_v21  ;;  %v1050_v45 = vmul.f32 %v5279_v51, %v8675_v53  ;;  %v1118_v54 = vmul.f32 %v6074_v9, %v8634_v38  ;;  %v944_v23 = vadd.f32 %v912_v15, %v875_v10  ;;  %v6080_v27 = vld [vmem:[%s4101_s19 + $0xc9] sm:$0xff]  ;;  %v6090_v44 = vld [vmem:[%s4101_s19 + $0x7a] sm:$0xff] }
 0x111   : > { %v1934_v4 = vadd.f32 %v1902_v19, %v1865_v57  ;;  %v1935_v35 = vadd.f32 %v5989_v41, %v1866_v26  ;;  %v943_v56 = vadd.f32 %v911_v63, %v874_v37  ;;  %8677 = vst [vmem:[#allocation69_spill] sm:$0xff] %v6080_v27  ;;  %v1119_v59 = vmul.f32 %v6080_v27, %v8634_v38  ;;  %v6095_v37 = vld [vmem:[%s4101_s19 + $0x82] sm:$0xff] }
 0x112   : > { %v1227_v51 = vmul.f32 %v8635_v61, %v8678_v1  ;;  %v1228_v57 = vmul.f32 %v8635_v61, %v8679_v5  ;;  %v1296_v41 = vmul.f32 %v6090_v44, %v8640_v3  ;;  %v1013_v26 = vadd.f32 %v981_v24, %v944_v23  ;;  %v8680_v10 = vld [vmem:[#allocation85_spill] sm:$0xff]  ;;  %v8681_v1 = vld [vmem:[#allocation86_spill] sm:$0xff] }
 0x113   : > { %v2043_v19 = vadd.f32 %v5993_v14, %v1934_v4  ;;  %v2044_v63 = vadd.f32 %v2012_v7, %v1935_v35  ;;  %v1012_v15 = vadd.f32 %v980_v22, %v943_v56  ;;  %v1297_v38 = vmul.f32 %v6095_v37, %v8640_v3  ;;  %v8683_v24 = vld [vmem:[#allocation94_spill] sm:$0xff]  ;;  %v6108_v3 = vld [vmem:[%s4101_s19 + $0xc2] sm:$0xff] }
 0x114   : > { %v1365_v4 = vmul.f32 %v8562_v32, %v8680_v10  ;;  %v1366_v5 = vmul.f32 %v8562_v32, %v8681_v1  ;;  %v1434_v42 = vmul.f32 %v8643_v33, %v8682_v18  ;;  %v1082_v22 = vadd.f32 %v1050_v45, %v1013_v26  ;;  %8684 = vst [vmem:[#allocation70_spill] sm:$0xff] %v6108_v3  ;;  %v8686_v10 = vld [vmem:[#allocation96_spill] sm:$0xff] }
 0x115   : > { %v2112_v14 = vadd.f32 %v2080_v36, %v2043_v19  ;;  %v2113_v7 = vadd.f32 %v2081_v16, %v2044_v63  ;;  %v1081_v35 = vadd.f32 %v1049_v25, %v1012_v15  ;;  %v1435_v56 = vmul.f32 %v8643_v33, %v8683_v24  ;;  %v6113_v19 = vld [vmem:[%s4101_s19 + $0xca] sm:$0xff]  ;;  %v8687_v15 = vld [vmem:[#allocation67_spill] sm:$0xff] }
 0x116   : > { %v1503_v36 = vmul.f32 %v6108_v3, %v8645_v55  ;;  %8685 = vst [vmem:[#allocation43_spill] sm:$0xff] %v6113_v19  ;;  %v1504_v32 = vmul.f32 %v6113_v19, %v8645_v55  ;;  %v1612_v16 = vmul.f32 %v8646_v40, %v8686_v10  ;;  %v1151_v45 = vadd.f32 %v1119_v59, %v1082_v22  ;;  %v6122_v26 = vld [vmem:[%s4101_s19 + $0x7b] sm:$0xff]  ;;  %v6129_v1 = vld [vmem:[%s4101_s19 + $0x83] sm:$0xff] }
 0x117   : > { %v2181_v23 = vadd.f32 %v2149_v52, %v2112_v14  ;;  %v2182_v25 = vadd.f32 %v2150_v34, %v2113_v7  ;;  %v1150_v63 = vadd.f32 %v1118_v54, %v1081_v35  ;;  %v1613_v33 = vmul.f32 %v8646_v40, %v8687_v15  ;;  %v8688_v34 = vld [vmem:[#allocation90_spill] sm:$0xff]  ;;  %v8690_v10 = vld [vmem:[#allocation80_spill] sm:$0xff] }
 0x118   : > { %v6126_v14 = vmul.f32 %v6122_v26, %v8649_v17  ;;  %v6133_v55 = vmul.f32 %v6129_v1, %v8649_v17  ;;  %v6137_v54 = vmul.f32 %v5550_v0, %v8688_v34  ;;  %v8689_v35 = vld [vmem:[#allocation62_spill] sm:$0xff]  ;;  %v6145_v15 = vmul.f32 %v8653_v20, %v8690_v10  ;;  %v6152_v17 = vld [vmem:[%s4101_s19 + $0xc3] sm:$0xff]  ;;  %v8695_v34 = vld [vmem:[#allocation103_spill] sm:$0xff] }
 0x119   : > { %v2250_v52 = vadd.f32 %v2218_v30, %v2181_v23  ;;  %v2251_v59 = vadd.f32 %v2219_v60, %v2182_v25  ;;  %v1259_v7 = vadd.f32 %v1227_v51, %v1150_v63  ;;  %v1260_v30 = vadd.f32 %v1228_v57, %v1151_v45  ;;  %8692 = vst [vmem:[#allocation44_spill] sm:$0xff] %v6152_v17  ;;  %v8694_v45 = vld [vmem:[#allocation24_spill] sm:$0xff] }
 0x11a   : > { %v6141_v22 = vmul.f32 %v5550_v0, %v8689_v35  ;;  %v6149_v39 = vmul.f32 %v8653_v20, %v8691_v58  ;;  %v6156_v60 = vmul.f32 %v6152_v17, %v8655_v8  ;;  %v6168_v35 = vmul.f32 %v8656_v28, %v8695_v34  ;;  %v8696_v20 = vld [vmem:[#allocation63_spill] sm:$0xff] }
 0x11b   : > { %v2319_v23 = vadd.f32 %v2287_v46, %v2250_v52  ;;  %v2320_v51 = vadd.f32 %v2288_v43, %v2251_v59  ;;  %v1328_v57 = vadd.f32 %v1296_v41, %v1259_v7  ;;  %v1329_v25 = vadd.f32 %v1297_v38, %v1260_v30  ;;  %v6159_v46 = vld [vmem:[%s4101_s19 + $0xcb] sm:$0xff]  ;;  %v8697_v58 = vld [vmem:[#allocation55_spill] sm:$0xff]  ;;  %v6178_v7 = vld [vmem:[%s7863_s1 + $0x8] ss:$0 sm:$0xff] }
 0x11c   : > { %8693 = vst [vmem:[#allocation23_spill] sm:$0xff] %v6159_v46  ;;  %v6163_v63 = vmul.f32 %v6159_v46, %v8655_v8  ;;  %v455_v17 = vmul.f32 %v8697_v58, %v8696_v20  ;;  %v456_v43 = vmul.f32 %v6005_v50, %v8696_v20  ;;  %8698 = vst [vmem:[#allocation36_spill] sm:$0xff] %v6178_v7  ;;  %v6181_v30 = vld [vmem:[%s4101_s19 + $0x90] sm:$0xff]  ;;  %v8700_v34 = vld [vmem:[#allocation115_spill] sm:$0xff] }
 0x11d   : > { %v2358_v52 = vmul.f32 %v8694_v45, %v2319_v23  ;;  %v2359_v41 = vmul.f32 %v8694_v45, %v2320_v51  ;;  %v1397_v38 = vadd.f32 %v1365_v4, %v1328_v57  ;;  %v1398_v59 = vadd.f32 %v1366_v5, %v1329_v25  ;;  %8699 = vst [vmem:[#allocation100_spill] sm:$0xff] %v6181_v30  ;;  %v6187_v58 = vld [vmem:[%s4101_s19 + $0x98] sm:$0xff]  ;;  %v6194_v20 = vld [vmem:[%s7863_s1 + $0x10] ss:$0 sm:$0xff] }
 0x11e   : > { %v525_v23 = vmul.f32 %v6181_v30, %v6178_v7  ;;  %8701 = vst [vmem:[#allocation105_spill] sm:$0xff] %v6187_v58  ;;  %v526_v50 = vmul.f32 %v6187_v58, %v6178_v7  ;;  %8702 = vst [vmem:[#allocation59_spill] sm:$0xff] %v6194_v20  ;;  %v595_v4 = vmul.f32 %v6194_v20, %v8664_v13  ;;  %v6204_v7 = vld [vmem:[%s7863_s1 + $0x18] ss:$0 sm:$0xff] }
 0x11f   : > { %v2397_v8 = vadd.f32 %v8700_v34, %v2358_v52  ;;  %v596_v5 = vmul.f32 %v6194_v20, %v8665_v29  ;;  %v2398_v51 = vadd.f32 %v8700_v34, %v2359_v41  ;;  %v1466_v57 = vadd.f32 %v1434_v42, %v1397_v38 }
 0x120   : > { %v1467_v25 = vadd.f32 %v1435_v56, %v1398_v59  ;;  %v557_v52 = vadd.f32 %v525_v23, %v455_v17  ;;  %v558_v58 = vadd.f32 %v526_v50, %v456_v43  ;;  %v665_v13 = vmul.f32 %v6204_v7, %v6024_v47  ;;  %v6213_v17 = vld [vmem:[%s7863_s1 + $0x20] ss:$0 sm:$0xff] }
 0x121   : > { %v2429_v30 = vmax.f32 %v2397_v8, 0.0  ;;  %v666_v29 = vmul.f32 %v6204_v7, %v6029_v48  ;;  %v2430_v20 = vmax.f32 %v2398_v51, 0.0  ;;  %v1535_v41 = vadd.f32 %v1503_v36, %v1466_v57  ;;  %v6216_v8 = vld [vmem:[%s4101_s19 + $0xd8] sm:$0xff]  ;;  %v6221_v59 = vld [vmem:[%s4101_s19 + $0xe0] sm:$0xff] }
 0x122   : > { %v1536_v42 = vadd.f32 %v1504_v32, %v1467_v25  ;;  %v627_v38 = vadd.f32 %v595_v4, %v557_v52  ;;  %v628_v56 = vadd.f32 %v596_v5, %v558_v58  ;;  %8703 = vst [vmem:[#allocation60_spill] sm:$0xff] %v6216_v8  ;;  %v735_v43 = vmul.f32 %v6216_v8, %v6213_v17  ;;  %v8705_v5 = vld [vmem:[#allocation56_spill] sm:$0xff] }
 0x123   : > { %8704 = vst [vmem:[#allocation37_spill] sm:$0xff] %v6221_v59  ;;  %v736_v23 = vmul.f32 %v6221_v59, %v6213_v17  ;;  %v844_v36 = vmul.f32 %v6052_v6, %v5642_v2  ;;  %v2450_v32 = vpack.c.bf16 %v2430_v20, %v2429_v30  ;;  %v1644_v58 = vadd.f32 %v1612_v16, %v1535_v41  ;;  %v6230_v57 = vld [vmem:[%s4101_s19 + $0x7c] sm:$0xff]  ;;  %v6241_v30 = vld [vmem:[%s7863_s1 + $0x9] ss:$0 sm:$0xff]  ;;  %v6244_v20 = vld [vmem:[%s4101_s19 + $0x91] sm:$0xff] }
 0x124   : > { %v1645_v50 = vadd.f32 %v1613_v33, %v1536_v42  ;;  %v697_v4 = vadd.f32 %v665_v13, %v627_v38  ;;  %v1998_v51 = vmul.f32 %v8656_v28, %v8705_v5  ;;  %v2066_v25 = vmul.f32 %v6230_v57, %v5429_v11  ;;  %8706 = vst [vmem:[#allocation41_spill] sm:$0xff] %v6241_v30  ;;  %v8708_v41 = vld [vmem:[#allocation92_spill] sm:$0xff] }
 0x125   : > { %v698_v52 = vadd.f32 %v666_v29, %v628_v56  ;;  %v845_v59 = vmul.f32 %v6057_v49, %v5642_v2  ;;  %3507 = vmatmul.mubr.bf16.gmra.mxu1 %v2450_v32  ;;  %v1713_v6 = vadd.f32 %v6126_v14, %v1644_v58  ;;  %8707 = vst [vmem:[#allocation74_spill] sm:$0xff] %v6244_v20  ;;  %v6249_v29 = vld [vmem:[%s4101_s19 + $0x84] sm:$0xff]  ;;  %v6256_v42 = vld [vmem:[%s4101_s19 + $0x99] sm:$0xff]  ;;  %v6265_v58 = vld [vmem:[%s7863_s1 + $0x11] ss:$0 sm:$0xff] }
 0x126   : > { %v1714_v16 = vadd.f32 %v6133_v55, %v1645_v50  ;;  %v767_v33 = vadd.f32 %v735_v43, %v697_v4  ;;  %v913_v13 = vmul.f32 %v6244_v20, %v6241_v30  ;;  %v2067_v49 = vmul.f32 %v6249_v29, %v5429_v11  ;;  %8709 = vst [vmem:[#allocation47_spill] sm:$0xff] %v6256_v42  ;;  %v8711_v4 = vld [vmem:[#allocation104_spill] sm:$0xff] }
 0x127   : > { %v2135_v14 = vmul.f32 %v5704_v31, %v8708_v41  ;;  %v768_v55 = vadd.f32 %v736_v23, %v698_v52  ;;  %v914_v38 = vmul.f32 %v6256_v42, %v6241_v30  ;;  %v1782_v56 = vadd.f32 %v6137_v54, %v1713_v6  ;;  %v8710_v23 = vld [vmem:[#allocation34_spill] sm:$0xff]  ;;  %v6287_v41 = vld [vmem:[%s4101_s19 + $0xc4] sm:$0xff]  ;;  %v8725_v42 = vld [vmem:[#allocation95_spill] sm:$0xff] }
 0x128   : > { %v1783_v43 = vadd.f32 %v6141_v22, %v1714_v16  ;;  %v876_v32 = vadd.f32 %v844_v36, %v767_v33  ;;  %v982_v11 = vmul.f32 %v6265_v58, %v8674_v21  ;;  %v2136_v50 = vmul.f32 %v5704_v31, %v8710_v23  ;;  %v6280_v21 = vld [vmem:[%s7863_s1 + $0x19] ss:$0 sm:$0xff]  ;;  %8713 = vst [vmem:[#allocation32_spill] sm:$0xff] %v6287_v41  ;;  %v6306_v23 = vld [vmem:[%s4101_s19 + $0xcc] sm:$0xff] }
 0x129   : > { %v2204_v5 = vmul.f32 %v5727_v62, %v8711_v4  ;;  %v877_v52 = vadd.f32 %v845_v59, %v768_v55  ;;  %v983_v54 = vmul.f32 %v6265_v58, %v8675_v53  ;;  %v1851_v22 = vadd.f32 %v6145_v15, %v1782_v56  ;;  %v8712_v59 = vld [vmem:[#allocation57_spill] sm:$0xff]  ;;  %8716 = vst [vmem:[#allocation71_spill] sm:$0xff] %v6306_v23 }
 0x12a   : > { %v1852_v36 = vadd.f32 %v6149_v39, %v1783_v43  ;;  %v945_v6 = vadd.f32 %v913_v13, %v876_v32  ;;  %v1051_v16 = vmul.f32 %v6280_v21, %v6074_v9  ;;  %v2205_v33 = vmul.f32 %v5727_v62, %v8712_v59  ;;  %v6298_v43 = vld [vmem:[%s7863_s1 + $0x21] ss:$0 sm:$0xff]  ;;  %v6301_v32 = vld [vmem:[%s4101_s19 + $0xd9] sm:$0xff] }
 0x12b   : > { %v2273_v53 = vmul.f32 %v6287_v41, %v5751_v12  ;;  %v946_v15 = vadd.f32 %v914_v38, %v877_v52  ;;  %v1052_v39 = vmul.f32 %v6280_v21, %v6080_v27  ;;  %v1920_v13 = vadd.f32 %v6156_v60, %v1851_v22  ;;  %8714 = vst [vmem:[#allocation33_spill] sm:$0xff] %v6298_v43 }
 0x12c   : > { %v1921_v55 = vadd.f32 %v6163_v63, %v1852_v36  ;;  %v1014_v56 = vadd.f32 %v982_v11, %v945_v6  ;;  %8715 = vst [vmem:[#allocation42_spill] sm:$0xff] %v6301_v32  ;;  %v1120_v38 = vmul.f32 %v6301_v32, %v6298_v43  ;;  %v2274_v60 = vmul.f32 %v6306_v23, %v5751_v12  ;;  %v6311_v63 = vld [vmem:[%s4101_s19 + $0xe1] sm:$0xff] }
 0x12d   : > { %v1015_v52 = vadd.f32 %v983_v54, %v946_v15  ;;  %8717 = vst [vmem:[#allocation72_spill] sm:$0xff] %v6311_v63  ;;  %v1121_v11 = vmul.f32 %v6311_v63, %v6298_v43  ;;  %v1229_v22 = vmul.f32 %v6090_v44, %v8635_v61  ;;  %v2029_v36 = vadd.f32 %v6168_v35, %v1920_v13  ;;  %v6323_v54 = vld [vmem:[%s7863_s1 + $0xa] ss:$0 sm:$0xff]  ;;  %v6326_v15 = vld [vmem:[%s4101_s19 + $0x92] sm:$0xff]  ;;  %v6331_v44 = vld [vmem:[%s4101_s19 + $0x9a] sm:$0xff] }
 0x12e   : > { %v2030_v6 = vadd.f32 %v1998_v51, %v1921_v55  ;;  %v1083_v27 = vadd.f32 %v1051_v16, %v1014_v56  ;;  %v1230_v32 = vmul.f32 %v6095_v37, %v8635_v61  ;;  %8718 = vst [vmem:[#allocation78_spill] sm:$0xff] %v6323_v54  ;;  %8719 = vst [vmem:[#allocation35_spill] sm:$0xff] %v6326_v15  ;;  %v6338_v37 = vld [vmem:[%s7863_s1 + $0x12] ss:$0 sm:$0xff] }
 0x12f   : > { %v1084_v9 = vadd.f32 %v1052_v39, %v1015_v52  ;;  %v1298_v63 = vmul.f32 %v6326_v15, %v6323_v54  ;;  %8720 = vst [vmem:[#allocation84_spill] sm:$0xff] %v6331_v44  ;;  %v1299_v35 = vmul.f32 %v6331_v44, %v6323_v54  ;;  %v1367_v51 = vmul.f32 %v6338_v37, %v8682_v18  ;;  %v6347_v52 = vld [vmem:[%s7863_s1 + $0x1a] ss:$0 sm:$0xff]  ;;  %v6356_v18 = vld [vmem:[%s7863_s1 + $0x22] ss:$0 sm:$0xff] }
 0x130   : > { %v2098_v16 = vadd.f32 %v2066_v25, %v2029_v36  ;;  %v2099_v39 = vadd.f32 %v2067_v49, %v2030_v6  ;;  %v1152_v13 = vadd.f32 %v1120_v38, %v1083_v27  ;;  %v1368_v55 = vmul.f32 %v6338_v37, %v8683_v24  ;;  %8721 = vst [vmem:[#allocation106_spill] sm:$0xff] %v6356_v18  ;;  %v6359_v27 = vld [vmem:[%s4101_s19 + $0xda] sm:$0xff]  ;;  %v6364_v38 = vld [vmem:[%s4101_s19 + $0xe2] sm:$0xff] }
 0x131   : > { %v1153_v56 = vadd.f32 %v1121_v11, %v1084_v9  ;;  %v1436_v44 = vmul.f32 %v6347_v52, %v6108_v3  ;;  %v1437_v15 = vmul.f32 %v6347_v52, %v6113_v19  ;;  %8722 = vst [vmem:[#allocation107_spill] sm:$0xff] %v6359_v27  ;;  %v1505_v9 = vmul.f32 %v6359_v27, %v6356_v18  ;;  %v6373_v3 = vld [vmem:[%s4101_s19 + $0x93] sm:$0xff]  ;;  %v8729_v27 = vld [vmem:[#allocation44_spill] sm:$0xff] }
 0x132   : > { %v2167_v24 = vadd.f32 %v2135_v14, %v2098_v16  ;;  %v2168_v25 = vadd.f32 %v2136_v50, %v2099_v39  ;;  %v1261_v49 = vadd.f32 %v1229_v22, %v1152_v13  ;;  %8723 = vst [vmem:[#allocation61_spill] sm:$0xff] %v6364_v38  ;;  %v1506_v11 = vmul.f32 %v6364_v38, %v6356_v18  ;;  %v6378_v39 = vld [vmem:[%s4101_s19 + $0x9b] sm:$0xff] }
 0x133   : > { %v1262_v36 = vadd.f32 %v1230_v32, %v1153_v56  ;;  %v1614_v6 = vmul.f32 %v6122_v26, %v8646_v40  ;;  %v1615_v19 = vmul.f32 %v6129_v1, %v8646_v40  ;;  %8724 = vst [vmem:[#allocation19_spill] sm:$0xff] %v6373_v3  ;;  %v1683_v14 = vmul.f32 %v6373_v3, %v8725_v42  ;;  %v8727_v1 = vld [vmem:[#allocation82_spill] sm:$0xff]  ;;  %v8728_v38 = vld [vmem:[#allocation68_spill] sm:$0xff] }
 0x134   : > { %v2236_v50 = vadd.f32 %v2204_v5, %v2167_v24  ;;  %v2237_v22 = vadd.f32 %v2205_v33, %v2168_v25  ;;  %v1330_v16 = vadd.f32 %v1298_v63, %v1261_v49  ;;  %8726 = vst [vmem:[#allocation53_spill] sm:$0xff] %v6378_v39  ;;  %v1684_v32 = vmul.f32 %v6378_v39, %v8725_v42  ;;  %v6391_v42 = vld [vmem:[%s4101_s19 + $0xdb] sm:$0xff]  ;;  %v6398_v25 = vld [vmem:[%s4101_s19 + $0xe3] sm:$0xff]  ;;  %v8743_v39 = vld [vmem:[#allocation46_spill] sm:$0xff] }
 0x135   : > { %v1331_v13 = vadd.f32 %v1299_v35, %v1262_v36  ;;  %v1752_v26 = vmul.f32 %v5550_v0, %v8690_v10  ;;  %v1753_v56 = vmul.f32 %v5550_v0, %v8727_v1  ;;  %v1821_v20 = vmul.f32 %v8729_v27, %v8728_v38  ;;  %8730 = vst [vmem:[#allocation89_spill] sm:$0xff] %v6391_v42  ;;  %v8731_v35 = vld [vmem:[#allocation83_spill] sm:$0xff]  ;;  %v6413_v49 = vld [vmem:[%s7863_s1] ss:$0 sm:$0xff] }
 0x136   : > { %v2305_v3 = vadd.f32 %v2273_v53, %v2236_v50  ;;  %v2306_v5 = vadd.f32 %v2274_v60, %v2237_v22  ;;  %v1399_v33 = vadd.f32 %v1367_v51, %v1330_v16  ;;  %v1822_v63 = vmul.f32 %v6159_v46, %v8728_v38  ;;  %8732 = vst [vmem:[#allocation18_spill] sm:$0xff] %v6398_v25  ;;  %v8734_v38 = vld [vmem:[#allocation97_spill] sm:$0xff]  ;;  %v8735_v22 = vld [vmem:[#allocation98_spill] sm:$0xff]  ;;  %v6420_v16 = vld [vmem:[%s4101_s19 + $0x138] sm:$0xff] }
 0x137   : > { %v1400_v24 = vadd.f32 %v1368_v55, %v1331_v13  ;;  %v6395_v10 = vmul.f32 %v6391_v42, %v8731_v35  ;;  %v6402_v0 = vmul.f32 %v6398_v25, %v8731_v35  ;;  %v6406_v53 = vmul.f32 %v6230_v57, %v8656_v28  ;;  %8733 = vst [vmem:[#allocation110_spill] sm:$0xff] %v6413_v49  ;;  %v6425_v1 = vld [vmem:[%s4101_s19 + $0x140] sm:$0xff]  ;;  %v6437_v42 = vld [vmem:[%s4101_s19 + $0x188] sm:$0xff] }
 0x138   : > { %v2344_v60 = vmul.f32 %v8694_v45, %v2305_v3  ;;  %v2345_v51 = vmul.f32 %v8694_v45, %v2306_v5  ;;  %v1468_v55 = vadd.f32 %v1436_v44, %v1399_v33  ;;  %v469_v36 = vmul.f32 %v6413_v49, %v8734_v38  ;;  %8736 = vst [vmem:[#allocation112_spill] sm:$0xff] %v6420_v16  ;;  %v8737_v3 = vld [vmem:[#allocation36_spill] sm:$0xff]  ;;  %v8739_v38 = vld [vmem:[#allocation77_spill] sm:$0xff] }
 0x139   : > { %v1469_v50 = vadd.f32 %v1437_v15, %v1400_v24  ;;  %v470_v57 = vmul.f32 %v6413_v49, %v8735_v22  ;;  %v539_v13 = vmul.f32 %v6420_v16, %v8737_v3  ;;  %8738 = vst [vmem:[#allocation17_spill] sm:$0xff] %v6425_v1  ;;  %v540_v44 = vmul.f32 %v6425_v1, %v8737_v3  ;;  %v8740_v15 = vld [vmem:[#allocation59_spill] sm:$0xff]  ;;  %v6434_v22 = vld [vmem:[%s4101_s19 + $0x180] sm:$0xff] }
 0x13a   : > { %v2383_v5 = vadd.f32 %v8700_v34, %v2344_v60  ;;  %v2384_v33 = vadd.f32 %v8700_v34, %v2345_v51  ;;  %v1537_v35 = vadd.f32 %v1505_v9, %v1468_v55  ;;  %v609_v24 = vmul.f32 %v8740_v15, %v8739_v38  ;;  %8741 = vst [vmem:[#allocation73_spill] sm:$0xff] %v6434_v22  ;;  %v8744_v60 = vld [vmem:[#allocation27_spill] sm:$0xff] }
 0x13b   : > { %v1538_v25 = vadd.f32 %v1506_v11, %v1469_v50  ;;  %8742 = vst [vmem:[#allocation75_spill] sm:$0xff] %v6437_v42  ;;  %v571_v46 = vadd.f32 %v539_v13, %v469_v36  ;;  %v572_v27 = vadd.f32 %v540_v44, %v470_v57  ;;  %v610_v8 = vmul.f32 %v8740_v15, %v8743_v39  ;;  %v8745_v11 = vld [vmem:[#allocation116_spill] sm:$0xff] }
 0x13c   : > { %v2415_v48 = vmax.f32 %v2383_v5, 0.0  ;;  %v2416_v47 = vmax.f32 %v2384_v33, 0.0  ;;  %v1646_v3 = vadd.f32 %v1614_v6, %v1537_v35  ;;  %v679_v51 = vmul.f32 %v6204_v7, %v8744_v60  ;;  %v6461_v5 = vld [vmem:[%s4101_s19 + $0x141] sm:$0xff]  ;;  %v8750_v35 = vld [vmem:[#allocation99_spill] sm:$0xff] }
 0x13d   : > { %v1647_v9 = vadd.f32 %v1615_v19, %v1538_v25  ;;  %v641_v55 = vadd.f32 %v609_v24, %v571_v46  ;;  %v642_v38 = vadd.f32 %v610_v8, %v572_v27  ;;  %v680_v50 = vmul.f32 %v6204_v7, %v8745_v11  ;;  %v8746_v19 = vld [vmem:[#allocation48_spill] sm:$0xff] }
 0x13e   : > { %v2443_v1 = vpack.c.bf16 %v2416_v47, %v2415_v48  ;;  %v1715_v16 = vadd.f32 %v1683_v14, %v1646_v3  ;;  %v749_v36 = vmul.f32 %v6213_v17, %v6434_v22  ;;  %v750_v39 = vmul.f32 %v6213_v17, %v6437_v42  ;;  %v8747_v48 = vld [vmem:[#allocation102_spill] sm:$0xff]  ;;  %v6456_v14 = vld [vmem:[%s4101_s19 + $0x139] sm:$0xff] }
 0x13f   : > { %v1716_v6 = vadd.f32 %v1684_v32, %v1647_v9  ;;  %v711_v57 = vadd.f32 %v679_v51, %v641_v55  ;;  %v712_v13 = vadd.f32 %v680_v50, %v642_v38  ;;  %v858_v46 = vmul.f32 %v8746_v19, %v5642_v2  ;;  %v8752_v38 = vld [vmem:[#allocation101_spill] sm:$0xff] }
 0x140   : > { %3494 = vmatprep.mubr.bf16.mxu0 %v2443_v1  ;;  %v1784_v8 = vadd.f32 %v1752_v26, %v1715_v16  ;;  %v2000_v47 = vmul.f32 %v6249_v29, %v8656_v28  ;;  %v859_v27 = vmul.f32 %v8747_v48, %v5642_v2  ;;  %v927_v32 = vmul.f32 %v6456_v14, %v6241_v30  ;;  %v6468_v2 = vld [vmem:[%s7863_s1 + $0xc] ss:$0 sm:$0xff]  ;;  %v6471_v29 = vld [vmem:[%s4101_s19 + $0x94] sm:$0xff]  ;;  %v8755_v48 = vld [vmem:[#allocation40_spill] sm:$0xff] }
 0x141   : > { %v1785_v25 = vadd.f32 %v1753_v56, %v1716_v6  ;;  %v781_v3 = vadd.f32 %v749_v36, %v711_v57  ;;  %v782_v44 = vadd.f32 %v750_v39, %v712_v13  ;;  %v928_v26 = vmul.f32 %v6461_v5, %v6241_v30  ;;  %8748 = vst [vmem:[#allocation14_spill] sm:$0xff] %v6471_v29  ;;  %v6476_v56 = vld [vmem:[%s4101_s19 + $0x9c] sm:$0xff]  ;;  %v6493_v57 = vld [vmem:[%s4101_s19 + $0x189] sm:$0xff] }
 0x142   : > { %v1853_v16 = vadd.f32 %v1821_v20, %v1784_v8  ;;  %v2068_v1 = vmul.f32 %v6471_v29, %v6468_v2  ;;  %8749 = vst [vmem:[#allocation15_spill] sm:$0xff] %v6476_v56  ;;  %v2069_v33 = vmul.f32 %v6476_v56, %v6468_v2  ;;  %v996_v24 = vmul.f32 %v6265_v58, %v8750_v35  ;;  %v6483_v20 = vld [vmem:[%s4101_s19 + $0x181] sm:$0xff]  ;;  %v8777_v56 = vld [vmem:[#allocation54_spill] sm:$0xff] }
 0x143   : > { %v1854_v51 = vadd.f32 %v1822_v63, %v1785_v25  ;;  %8751 = vst [vmem:[#allocation76_spill] sm:$0xff] %v6483_v20  ;;  %v890_v9 = vadd.f32 %v858_v46, %v781_v3  ;;  %v891_v55 = vadd.f32 %v859_v27, %v782_v44  ;;  %v997_v50 = vmul.f32 %v6265_v58, %v8752_v38  ;;  %v8754_v13 = vld [vmem:[#allocation52_spill] sm:$0xff] }
 0x144   : > { %v1922_v36 = vadd.f32 %v6395_v10, %v1853_v16  ;;  %v2137_v39 = vmul.f32 %v5704_v31, %v8711_v4  ;;  %v2138_v6 = vmul.f32 %v5704_v31, %v8712_v59  ;;  %8753 = vst [vmem:[#allocation30_spill] sm:$0xff] %v6493_v57  ;;  %v1065_v63 = vmul.f32 %v6280_v21, %v8754_v13  ;;  %v6510_v44 = vld [vmem:[%s4101_s19 + $0xdc] sm:$0xff]  ;;  %v6515_v16 = vld [vmem:[%s4101_s19 + $0xe4] sm:$0xff] }
 0x145   : > { %v1923_v19 = vadd.f32 %v6402_v0, %v1854_v51  ;;  %v959_v46 = vadd.f32 %v927_v32, %v890_v9  ;;  %v960_v8 = vadd.f32 %v928_v26, %v891_v55  ;;  %v1066_v10 = vmul.f32 %v6280_v21, %v8755_v48  ;;  %8756 = vst [vmem:[#allocation91_spill] sm:$0xff] %v6510_v44  ;;  %v6522_v55 = vld [vmem:[%s4101_s19 + $0x182] sm:$0xff] }
 0x146   : > { %v2031_v27 = vadd.f32 %v6406_v53, %v1922_v36  ;;  %v2206_v4 = vmul.f32 %v6287_v41, %v5727_v62  ;;  %v2207_v31 = vmul.f32 %v6306_v23, %v5727_v62  ;;  %v1134_v59 = vmul.f32 %v6298_v43, %v6483_v20  ;;  %8757 = vst [vmem:[#allocation38_spill] sm:$0xff] %v6515_v16  ;;  %v6527_v36 = vld [vmem:[%s4101_s19 + $0x18a] sm:$0xff] }
 0x147   : > { %v2032_v25 = vadd.f32 %v2000_v47, %v1923_v19  ;;  %v1028_v0 = vadd.f32 %v996_v24, %v959_v46  ;;  %v1029_v32 = vadd.f32 %v997_v50, %v960_v8  ;;  %v1135_v3 = vmul.f32 %v6298_v43, %v6493_v57  ;;  %v8758_v47 = vld [vmem:[#allocation109_spill] sm:$0xff]  ;;  %8759 = vst [vmem:[#allocation81_spill] sm:$0xff] %v6522_v55  ;;  %v6530_v19 = vld [vmem:[%s4101_s19 + $0x13a] sm:$0xff] }
 0x148   : > { %v2100_v53 = vadd.f32 %v2068_v1, %v2031_v27  ;;  %v2275_v26 = vmul.f32 %v6510_v44, %v5751_v12  ;;  %v2276_v62 = vmul.f32 %v6515_v16, %v5751_v12  ;;  %v1243_v35 = vmul.f32 %v8758_v47, %v8635_v61  ;;  %v8760_v1 = vld [vmem:[#allocation111_spill] sm:$0xff]  ;;  %8761 = vst [vmem:[#allocation79_spill] sm:$0xff] %v6527_v36  ;;  %v6535_v12 = vld [vmem:[%s4101_s19 + $0x142] sm:$0xff] }
 0x149   : > { %v2101_v24 = vadd.f32 %v2069_v33, %v2032_v25  ;;  %v1097_v51 = vadd.f32 %v1065_v63, %v1028_v0  ;;  %v1098_v9 = vadd.f32 %v1066_v10, %v1029_v32  ;;  %v1244_v38 = vmul.f32 %v8760_v1, %v8635_v61  ;;  %v8762_v63 = vld [vmem:[#allocation108_spill] sm:$0xff]  ;;  %v8764_v32 = vld [vmem:[#allocation58_spill] sm:$0xff] }
 0x14a   : > { %v2169_v50 = vadd.f32 %v2137_v39, %v2100_v53  ;;  %v1312_v46 = vmul.f32 %v6530_v19, %v6323_v54  ;;  %v1313_v33 = vmul.f32 %v6535_v12, %v6323_v54  ;;  %v1381_v8 = vmul.f32 %v6338_v37, %v8762_v63  ;;  %v8763_v39 = vld [vmem:[#allocation64_spill] sm:$0xff] }
 0x14b   : > { %v2170_v10 = vadd.f32 %v2138_v6, %v2101_v24  ;;  %v1166_v27 = vadd.f32 %v1134_v59, %v1097_v51  ;;  %v1167_v61 = vadd.f32 %v1135_v3, %v1098_v9  ;;  %v1382_v25 = vmul.f32 %v6338_v37, %v8763_v39  ;;  %v8765_v47 = vld [vmem:[#allocation28_spill] sm:$0xff]  ;;  %v6558_v39 = vld [vmem:[%s7863_s1 + $0xb] ss:$0 sm:$0xff] }
 0x14c   : > { %v2238_v0 = vadd.f32 %v2206_v4, %v2169_v50  ;;  %v1450_v53 = vmul.f32 %v6347_v52, %v8764_v32  ;;  %v1451_v1 = vmul.f32 %v6347_v52, %v8765_v47  ;;  %v1519_v16 = vmul.f32 %v6356_v18, %v6522_v55  ;;  %v8766_v4 = vld [vmem:[#allocation113_spill] sm:$0xff]  ;;  %v8767_v50 = vld [vmem:[#allocation16_spill] sm:$0xff]  ;;  %8768 = vst [vmem:[#allocation45_spill] sm:$0xff] %v6558_v39 }
 0x14d   : > { %v2239_v6 = vadd.f32 %v2207_v31, %v2170_v10  ;;  %v1275_v24 = vadd.f32 %v1243_v35, %v1166_v27  ;;  %v1276_v59 = vadd.f32 %v1244_v38, %v1167_v61  ;;  %v1520_v3 = vmul.f32 %v6356_v18, %v6527_v36  ;;  %v6561_v44 = vld [vmem:[%s4101_s19 + $0x13b] sm:$0xff]  ;;  %v6569_v27 = vld [vmem:[%s4101_s19 + $0x18b] sm:$0xff]  ;;  %v6572_v61 = vld [vmem:[%s4101_s19 + $0x143] sm:$0xff] }
 0x14e   : > { %v2307_v51 = vadd.f32 %v2275_v26, %v2238_v0  ;;  %v1628_v9 = vmul.f32 %v8766_v4, %v8646_v40  ;;  %v1629_v63 = vmul.f32 %v8767_v50, %v8646_v40  ;;  %v1697_v31 = vmul.f32 %v6561_v44, %v6558_v39  ;;  %v6566_v26 = vld [vmem:[%s4101_s19 + $0x183] sm:$0xff]  ;;  %8770 = vst [vmem:[#allocation66_spill] sm:$0xff] %v6569_v27  ;;  %v6580_v4 = vld [vmem:[%s7863_s1 + $0x13] ss:$0 sm:$0xff] }
 0x14f   : > { %v2308_v35 = vadd.f32 %v2276_v62, %v2239_v6  ;;  %v1344_v38 = vadd.f32 %v1312_v46, %v1275_v24  ;;  %v1345_v10 = vadd.f32 %v1313_v33, %v1276_v59  ;;  %8769 = vst [vmem:[#allocation65_spill] sm:$0xff] %v6566_v26  ;;  %8771 = vst [vmem:[#allocation88_spill] sm:$0xff] %v6572_v61  ;;  %v8773_v50 = vld [vmem:[#allocation20_spill] sm:$0xff]  ;;  %v8774_v46 = vld [vmem:[#allocation114_spill] sm:$0xff] }
 0x150   : > { %v1698_v40 = vmul.f32 %v6572_v61, %v6558_v39  ;;  %v2346_v0 = vmul.f32 %v8694_v45, %v2307_v51  ;;  %8772 = vst [vmem:[#allocation51_spill] sm:$0xff] %v6580_v4  ;;  %v1766_v62 = vmul.f32 %v6580_v4, %v8773_v50  ;;  %v1767_v33 = vmul.f32 %v6580_v4, %v8774_v46  ;;  %v6589_v6 = vld [vmem:[%s7863_s1 + $0x1b] ss:$0 sm:$0xff]  ;;  %v8776_v24 = vld [vmem:[#allocation21_spill] sm:$0xff]  ;;  %v6600_v46 = vld [vmem:[%s7863_s1 + $0x23] ss:$0 sm:$0xff] }
 0x151   : > { %8775 = vst [vmem:[#allocation85_spill] sm:$0xff] %v6589_v6  ;;  %v1835_v59 = vmul.f32 %v6589_v6, %v8776_v24  ;;  %v2347_v51 = vmul.f32 %v8694_v45, %v2308_v35  ;;  %v1413_v23 = vadd.f32 %v1381_v8, %v1344_v38  ;;  %v1414_v41 = vadd.f32 %v1382_v25, %v1345_v10  ;;  %v8779_v8 = vld [vmem:[#allocation22_spill] sm:$0xff]  ;;  %v6625_v61 = vld [vmem:[%s4101_s19 + $0x158] sm:$0xff] }
 0x152   : > { %v1836_v50 = vmul.f32 %v6589_v6, %v8777_v56  ;;  %v2385_v29 = vadd.f32 %v8700_v34, %v2346_v0  ;;  %8778 = vst [vmem:[#allocation86_spill] sm:$0xff] %v6600_v46  ;;  %v6604_v4 = vmul.f32 %v6600_v46, %v6566_v26  ;;  %v6608_v45 = vmul.f32 %v6600_v46, %v6569_v27  ;;  %v8780_v0 = vld [vmem:[#allocation112_spill] sm:$0xff]  ;;  %v8781_v26 = vld [vmem:[#allocation17_spill] sm:$0xff]  ;;  %v6620_v39 = vld [vmem:[%s4101_s19 + $0x150] sm:$0xff] }
 0x153   : > { %v6612_v25 = vmul.f32 %v8779_v8, %v8656_v28  ;;  %v2386_v35 = vadd.f32 %v8700_v34, %v2347_v51  ;;  %v1482_v38 = vadd.f32 %v1450_v53, %v1413_v23  ;;  %v1483_v10 = vadd.f32 %v1451_v1, %v1414_v41  ;;  %8782 = vst [vmem:[#allocation93_spill] sm:$0xff] %v6620_v39  ;;  %v8783_v46 = vld [vmem:[#allocation36_spill] sm:$0xff]  ;;  %v6630_v53 = vld [vmem:[%s4101_s19 + $0x198] sm:$0xff] }
 0x154   : > { %v471_v6 = vmul.f32 %v8780_v0, %v6413_v49  ;;  %v2417_v56 = vmax.f32 %v2385_v29, 0.0  ;;  %v472_v24 = vmul.f32 %v8781_v26, %v6413_v49  ;;  %v541_v27 = vmul.f32 %v6620_v39, %v8783_v46  ;;  %8784 = vst [vmem:[#allocation94_spill] sm:$0xff] %v6625_v61  ;;  %8785 = vst [vmem:[#allocation96_spill] sm:$0xff] %v6630_v53  ;;  %v6633_v1 = vld [vmem:[%s4101_s19 + $0x1a0] sm:$0xff] }
 0x155   : > { %v542_v8 = vmul.f32 %v6625_v61, %v8783_v46  ;;  %v2418_v34 = vmax.f32 %v2386_v35, 0.0  ;;  %v1551_v23 = vadd.f32 %v1519_v16, %v1482_v38  ;;  %v1552_v41 = vadd.f32 %v1520_v3, %v1483_v10  ;;  %8786 = vst [vmem:[#allocation67_spill] sm:$0xff] %v6633_v1 }
 0x156   : > { %v611_v29 = vmul.f32 %v8740_v15, %v8744_v60  ;;  %v573_v26 = vadd.f32 %v541_v27, %v471_v6  ;;  %v612_v0 = vmul.f32 %v8740_v15, %v8745_v11  ;;  %v681_v39 = vmul.f32 %v6204_v7, %v6434_v22  ;;  %v8822_v22 = vld [vmem:[#allocation29_spill] sm:$0xff] }
 0x157   : > { %v574_v51 = vadd.f32 %v542_v8, %v472_v24  ;;  %v2444_v61 = vpack.c.bf16 %v2418_v34, %v2417_v56  ;;  %v1660_v35 = vadd.f32 %v1628_v9, %v1551_v23  ;;  %v1661_v16 = vadd.f32 %v1629_v63, %v1552_v41  ;;  %v8787_v56 = vld [vmem:[#allocation49_spill] sm:$0xff]  ;;  %v6650_v63 = vld [vmem:[%s4101_s19 + $0x13c] sm:$0xff] }
 0x158   : > { %v682_v3 = vmul.f32 %v6204_v7, %v6437_v42  ;;  %v643_v38 = vadd.f32 %v611_v29, %v573_v26  ;;  %v751_v60 = vmul.f32 %v6213_v17, %v6630_v53  ;;  %v752_v27 = vmul.f32 %v6213_v17, %v6633_v1  ;;  %v6657_v23 = vld [vmem:[%s7863_s1 + $0x1] ss:$0 sm:$0xff]  ;;  %v6664_v41 = vld [vmem:[%s4101_s19 + $0x144] sm:$0xff]  ;;  %v6671_v29 = vld [vmem:[%s7863_s1 + $0x14] ss:$0 sm:$0xff] }
 0x159   : > { %v644_v10 = vadd.f32 %v612_v0, %v574_v51  ;;  %3495 = vmatmul.mubr.bf16.gmra.mxu0 %v2444_v61  ;;  %v1729_v11 = vadd.f32 %v1697_v31, %v1660_v35  ;;  %v1730_v6 = vadd.f32 %v1698_v40, %v1661_v16  ;;  %v2014_v9 = vmul.f32 %v8787_v56, %v8656_v28  ;;  %v8788_v26 = vld [vmem:[#allocation50_spill] sm:$0xff]  ;;  %v6676_v51 = vld [vmem:[%s4101_s19 + $0x184] sm:$0xff]  ;;  %v6684_v35 = vld [vmem:[%s4101_s19 + $0x159] sm:$0xff] }
 0x15a   : > { %v2082_v24 = vmul.f32 %v6650_v63, %v6468_v2  ;;  %v713_v8 = vadd.f32 %v681_v39, %v643_v38  ;;  %v860_v31 = vmul.f32 %v6657_v23, %v6456_v14  ;;  %v861_v28 = vmul.f32 %v6657_v23, %v6461_v5  ;;  %8789 = vst [vmem:[#allocation90_spill] sm:$0xff] %v6676_v51  ;;  %v6698_v56 = vld [vmem:[%s4101_s19 + $0x18c] sm:$0xff] }
 0x15b   : > { %v714_v34 = vadd.f32 %v682_v3, %v644_v10  ;;  %v1798_v61 = vadd.f32 %v1766_v62, %v1729_v11  ;;  %v1799_v40 = vadd.f32 %v1767_v33, %v1730_v6  ;;  %v2083_v39 = vmul.f32 %v6664_v41, %v6468_v2  ;;  %v6679_v33 = vld [vmem:[%s4101_s19 + $0x151] sm:$0xff]  ;;  %8791 = vst [vmem:[#allocation80_spill] sm:$0xff] %v6684_v35 }
 0x15c   : > { %v2151_v14 = vmul.f32 %v6671_v29, %v8788_v26  ;;  %v783_v5 = vadd.f32 %v751_v60, %v713_v8  ;;  %8790 = vst [vmem:[#allocation62_spill] sm:$0xff] %v6679_v33  ;;  %v929_v0 = vmul.f32 %v6679_v33, %v6241_v30  ;;  %v930_v16 = vmul.f32 %v6684_v35, %v6241_v30  ;;  %v8792_v10 = vld [vmem:[#allocation39_spill] sm:$0xff]  ;;  %v6714_v33 = vld [vmem:[%s7863_s1 + $0x24] ss:$0 sm:$0xff]  ;;  %v6845_v53 = vld [vmem:[%s4101_s19 + $0xb0] sm:$0xff] }
 0x15d   : > { %v784_v62 = vadd.f32 %v752_v27, %v714_v34  ;;  %v1867_v3 = vadd.f32 %v1835_v59, %v1798_v61  ;;  %v1868_v38 = vadd.f32 %v1836_v50, %v1799_v40  ;;  %v2152_v11 = vmul.f32 %v6671_v29, %v8792_v10  ;;  %v6693_v60 = vld [vmem:[%s7863_s1 + $0x1c] ss:$0 sm:$0xff]  ;;  %v8793_v27 = vld [vmem:[#allocation25_spill] sm:$0xff]  ;;  %8794 = vst [vmem:[#allocation24_spill] sm:$0xff] %v6698_v56 }
 0x15e   : > { %v2220_v6 = vmul.f32 %v6693_v60, %v8793_v27  ;;  %v6701_v8 = vld [vmem:[%s4101_s19 + $0x199] sm:$0xff]  ;;  %v892_v34 = vadd.f32 %v860_v31, %v783_v5  ;;  %v998_v59 = vmul.f32 %v6265_v58, %v8754_v13  ;;  %v999_v50 = vmul.f32 %v6265_v58, %v8755_v48 }
 0x15f   : > { %8795 = vst [vmem:[#allocation103_spill] sm:$0xff] %v6701_v8  ;;  %v893_v26 = vadd.f32 %v861_v28, %v784_v62  ;;  %v1936_v61 = vadd.f32 %v6604_v4, %v1867_v3  ;;  %v1937_v40 = vadd.f32 %v6608_v45, %v1868_v38  ;;  %v8796_v10 = vld [vmem:[#allocation87_spill] sm:$0xff]  ;;  %v2289_v31 = vmul.f32 %v6714_v33, %v6676_v51  ;;  %v6719_v28 = vld [vmem:[%s4101_s19 + $0x1a1] sm:$0xff] }
 0x160   : > { %v2221_v35 = vmul.f32 %v6693_v60, %v8796_v10  ;;  %8797 = vst [vmem:[#allocation63_spill] sm:$0xff] %v6719_v28  ;;  %v961_v13 = vadd.f32 %v929_v0, %v892_v34  ;;  %v1067_v4 = vmul.f32 %v6280_v21, %v6483_v20  ;;  %v1068_v45 = vmul.f32 %v6280_v21, %v6493_v57  ;;  %v6753_v57 = vld [vmem:[%s4101_s19 + $0x15a] sm:$0xff]  ;;  %v8814_v20 = vld [vmem:[#allocation85_spill] sm:$0xff] }
 0x161   : > { %v962_v48 = vadd.f32 %v930_v16, %v893_v26  ;;  %v2045_v5 = vadd.f32 %v6612_v25, %v1936_v61  ;;  %v2046_v62 = vadd.f32 %v2014_v9, %v1937_v40  ;;  %v2290_v3 = vmul.f32 %v6714_v33, %v6698_v56  ;;  %v6735_v26 = vld [vmem:[%s7863_s1 + $0x2] ss:$0 sm:$0xff]  ;;  %v6740_v40 = vld [vmem:[%s4101_s19 + $0x19a] sm:$0xff]  ;;  %8802 = vst [vmem:[#allocation34_spill] sm:$0xff] %v6753_v57 }
 0x162   : > { %v1136_v38 = vmul.f32 %v6298_v43, %v6701_v8  ;;  %v1030_v0 = vadd.f32 %v998_v59, %v961_v13  ;;  %v1137_v34 = vmul.f32 %v6298_v43, %v6719_v28  ;;  %8798 = vst [vmem:[#allocation55_spill] sm:$0xff] %v6735_v26  ;;  %v1245_v25 = vmul.f32 %v6735_v26, %v6530_v19  ;;  %v6745_v59 = vld [vmem:[%s4101_s19 + $0x152] sm:$0xff]  ;;  %v6750_v28 = vld [vmem:[%s4101_s19 + $0x1a2] sm:$0xff] }
 0x163   : > { %v1031_v16 = vadd.f32 %v999_v50, %v962_v48  ;;  %v2114_v9 = vadd.f32 %v2082_v24, %v2045_v5  ;;  %v2115_v61 = vadd.f32 %v2083_v39, %v2046_v62  ;;  %8799 = vst [vmem:[#allocation115_spill] sm:$0xff] %v6740_v40  ;;  %v1246_v8 = vmul.f32 %v6735_v26, %v6535_v12 }
 0x164   : > { %8800 = vst [vmem:[#allocation56_spill] sm:$0xff] %v6745_v59  ;;  %v1314_v50 = vmul.f32 %v6745_v59, %v6323_v54  ;;  %v1099_v13 = vadd.f32 %v1067_v4, %v1030_v0  ;;  %8801 = vst [vmem:[#allocation92_spill] sm:$0xff] %v6750_v28  ;;  %v1315_v19 = vmul.f32 %v6753_v57, %v6323_v54  ;;  %v8813_v59 = vld [vmem:[#allocation65_spill] sm:$0xff] }
 0x165   : > { %v1100_v48 = vadd.f32 %v1068_v45, %v1031_v16  ;;  %v1383_v24 = vmul.f32 %v6338_v37, %v8764_v32  ;;  %v2183_v39 = vadd.f32 %v2151_v14, %v2114_v9  ;;  %v2184_v12 = vadd.f32 %v2152_v11, %v2115_v61  ;;  %v6777_v61 = vld [vmem:[%s4101_s19 + $0x19b] sm:$0xff] }
 0x166   : > { %v1384_v5 = vmul.f32 %v6338_v37, %v8765_v47  ;;  %v1452_v4 = vmul.f32 %v6347_v52, %v6522_v55  ;;  %v1168_v45 = vadd.f32 %v1136_v38, %v1099_v13  ;;  %v1453_v0 = vmul.f32 %v6347_v52, %v6527_v36  ;;  %v6772_v47 = vld [vmem:[%s7863_s1 + $0x3] ss:$0 sm:$0xff]  ;;  %8804 = vst [vmem:[#allocation57_spill] sm:$0xff] %v6777_v61  ;;  %v6790_v36 = vld [vmem:[%s4101_s19 + $0x15b] sm:$0xff] }
 0x167   : > { %v1169_v62 = vadd.f32 %v1137_v34, %v1100_v48  ;;  %v1521_v32 = vmul.f32 %v6356_v18, %v6740_v40  ;;  %v2252_v16 = vadd.f32 %v2220_v6, %v2183_v39  ;;  %v2253_v14 = vadd.f32 %v2221_v35, %v2184_v12  ;;  %8803 = vst [vmem:[#allocation104_spill] sm:$0xff] %v6772_v47  ;;  %v8805_v13 = vld [vmem:[#allocation88_spill] sm:$0xff]  ;;  %v6782_v6 = vld [vmem:[%s4101_s19 + $0x153] sm:$0xff]  ;;  %v8807_v35 = vld [vmem:[#allocation45_spill] sm:$0xff] }
 0x168   : > { %v1522_v11 = vmul.f32 %v6356_v18, %v6750_v28  ;;  %v1630_v38 = vmul.f32 %v6772_v47, %v6561_v44  ;;  %v1277_v34 = vadd.f32 %v1245_v25, %v1168_v45  ;;  %v1631_v48 = vmul.f32 %v6772_v47, %v8805_v13  ;;  %8806 = vst [vmem:[#allocation95_spill] sm:$0xff] %v6782_v6  ;;  %v6787_v40 = vld [vmem:[%s4101_s19 + $0x1a3] sm:$0xff]  ;;  %v8811_v25 = vld [vmem:[#allocation51_spill] sm:$0xff]  ;;  %v8812_v13 = vld [vmem:[#allocation54_spill] sm:$0xff] }
 0x169   : > { %v1278_v9 = vadd.f32 %v1246_v8, %v1169_v62  ;;  %v1699_v39 = vmul.f32 %v6782_v6, %v8807_v35  ;;  %v2321_v12 = vadd.f32 %v2289_v31, %v2252_v16  ;;  %v2322_v28 = vadd.f32 %v2290_v3, %v2253_v14  ;;  %8808 = vst [vmem:[#allocation82_spill] sm:$0xff] %v6787_v40  ;;  %v8810_v8 = vld [vmem:[#allocation21_spill] sm:$0xff]  ;;  %v6805_v31 = vld [vmem:[%s7864_s2] ss:$0 sm:$0xff]  ;;  %v8816_v14 = vld [vmem:[#allocation66_spill] sm:$0xff] }
 0x16a   : > { %8809 = vst [vmem:[#allocation68_spill] sm:$0xff] %v6790_v36  ;;  %v1700_v44 = vmul.f32 %v6790_v36, %v8807_v35  ;;  %v1768_v45 = vmul.f32 %v8811_v25, %v8810_v8  ;;  %v1346_v62 = vadd.f32 %v1314_v50, %v1277_v34  ;;  %v1769_v57 = vmul.f32 %v8811_v25, %v8812_v13 }
 0x16b   : > { %v1347_v55 = vadd.f32 %v1315_v19, %v1278_v9  ;;  %v6800_v6 = vmul.f32 %v8814_v20, %v8813_v59  ;;  %8815 = vst [vmem:[#allocation83_spill] sm:$0xff] %v6805_v31  ;;  %v2360_v3 = vmul.f32 %v6805_v31, %v2321_v12  ;;  %v2361_v16 = vmul.f32 %v6805_v31, %v2322_v28  ;;  %v8817_v19 = vld [vmem:[#allocation86_spill] sm:$0xff]  ;;  %v6822_v12 = vld [vmem:[%s7863_s1 + $0x4] ss:$0 sm:$0xff] }
 0x16c   : > { %v1838_v50 = vmul.f32 %v8814_v20, %v8816_v14  ;;  %v6813_v34 = vmul.f32 %v8817_v19, %v6777_v61  ;;  %v1415_v9 = vadd.f32 %v1383_v24, %v1346_v62  ;;  %v6817_v13 = vmul.f32 %v8817_v19, %v6787_v40  ;;  %v6831_v61 = vld [vmem:[%s7865_s3] ss:$0 sm:$0xff]  ;;  %v8820_v40 = vld [vmem:[#allocation105_spill] sm:$0xff] }
 0x16d   : > { %v1416_v8 = vadd.f32 %v1384_v5, %v1347_v55  ;;  %v6826_v28 = vmul.f32 %v6822_v12, %v6650_v63  ;;  %8818 = vst [vmem:[#allocation97_spill] sm:$0xff] %v6831_v61  ;;  %v2399_v55 = vadd.f32 %v6831_v61, %v2360_v3  ;;  %v2400_v24 = vadd.f32 %v6831_v61, %v2361_v16  ;;  %v8819_v5 = vld [vmem:[#allocation100_spill] sm:$0xff]  ;;  %v6840_v63 = vld [vmem:[%s4101_s19 + $0xa8] sm:$0xff]  ;;  %v8823_v61 = vld [vmem:[#allocation31_spill] sm:$0xff] }
 0x16e   : > { %v457_v62 = vmul.f32 %v6413_v49, %v8819_v5  ;;  %v458_v14 = vmul.f32 %v6413_v49, %v8820_v40  ;;  %v1484_v59 = vadd.f32 %v1452_v4, %v1415_v9  ;;  %8821 = vst [vmem:[#allocation98_spill] sm:$0xff] %v6840_v63  ;;  %v527_v1 = vmul.f32 %v6840_v63, %v8783_v46  ;;  %v8824_v63 = vld [vmem:[#allocation60_spill] sm:$0xff]  ;;  %v8825_v19 = vld [vmem:[#allocation37_spill] sm:$0xff] }
 0x16f   : > { %v1485_v36 = vadd.f32 %v1453_v0, %v1416_v8  ;;  %v528_v3 = vmul.f32 %v6845_v53, %v8783_v46  ;;  %v2431_v16 = vmax.f32 %v2399_v55, 0.0  ;;  %v2432_v42 = vmax.f32 %v2400_v24, 0.0  ;;  %v6858_v55 = vld [vmem:[%s4101_s19 + $0xf0] sm:$0xff] }
 0x170   : > { %v597_v5 = vmul.f32 %v8740_v15, %v8822_v22  ;;  %v598_v40 = vmul.f32 %v8740_v15, %v8823_v61  ;;  %v1553_v4 = vadd.f32 %v1521_v32, %v1484_v59  ;;  %v559_v9 = vadd.f32 %v527_v1, %v457_v62  ;;  %v6865_v1 = vld [vmem:[%s4101_s19 + $0xf8] sm:$0xff] }
 0x171   : > { %v1554_v0 = vadd.f32 %v1522_v11, %v1485_v36  ;;  %v560_v8 = vadd.f32 %v528_v3, %v458_v14  ;;  %v2451_v49 = vpack.c.bf16 %v2432_v42, %v2431_v16  ;;  %v667_v31 = vmul.f32 %v8824_v63, %v6204_v7  ;;  %v8826_v11 = vld [vmem:[#allocation74_spill] sm:$0xff]  ;;  %v8827_v62 = vld [vmem:[#allocation47_spill] sm:$0xff] }
 0x172   : > { %v668_v46 = vmul.f32 %v8825_v19, %v6204_v7  ;;  %v737_v22 = vmul.f32 %v6858_v55, %v6213_v17  ;;  %v1662_v24 = vadd.f32 %v1630_v38, %v1553_v4  ;;  %v629_v59 = vadd.f32 %v597_v5, %v559_v9 }
 0x173   : > { %v1663_v61 = vadd.f32 %v1631_v48, %v1554_v0  ;;  %v630_v36 = vadd.f32 %v598_v40, %v560_v8  ;;  %3510 = vmatprep.mubr.bf16.mxu1 %v2451_v49  ;;  %v2016_v42 = vmul.f32 %v6822_v12, %v6664_v41  ;;  %v738_v32 = vmul.f32 %v6865_v1, %v6213_v17  ;;  %v6874_v49 = vld [vmem:[%s4101_s19 + $0x154] sm:$0xff]  ;;  %v6879_v40 = vld [vmem:[%s4101_s19 + $0x15c] sm:$0xff]  ;;  %v6884_v0 = vld [vmem:[%s4101_s19 + $0xa9] sm:$0xff] }
 0x174   : > { %v846_v14 = vmul.f32 %v6657_v23, %v8826_v11  ;;  %v847_v38 = vmul.f32 %v6657_v23, %v8827_v62  ;;  %v1731_v48 = vadd.f32 %v1699_v39, %v1662_v24  ;;  %v699_v16 = vadd.f32 %v667_v31, %v629_v59  ;;  %8828 = vst [vmem:[#allocation77_spill] sm:$0xff] %v6874_v49  ;;  %v8831_v62 = vld [vmem:[#allocation69_spill] sm:$0xff] }
 0x175   : > { %v1732_v3 = vadd.f32 %v1700_v44, %v1663_v61  ;;  %v700_v5 = vadd.f32 %v668_v46, %v630_v36  ;;  %v2084_v41 = vmul.f32 %v6874_v49, %v6468_v2  ;;  %8829 = vst [vmem:[#allocation59_spill] sm:$0xff] %v6879_v40  ;;  %v2085_v4 = vmul.f32 %v6879_v40, %v6468_v2  ;;  %v6889_v44 = vld [vmem:[%s4101_s19 + $0xb1] sm:$0xff] }
 0x176   : > { %v915_v39 = vmul.f32 %v6884_v0, %v6241_v30  ;;  %v916_v46 = vmul.f32 %v6889_v44, %v6241_v30  ;;  %v1800_v31 = vadd.f32 %v1768_v45, %v1731_v48  ;;  %v769_v8 = vadd.f32 %v737_v22, %v699_v16  ;;  %v8830_v36 = vld [vmem:[#allocation26_spill] sm:$0xff]  ;;  %v6903_v45 = vld [vmem:[%s4101_s19 + $0x19c] sm:$0xff] }
 0x177   : > { %v1801_v9 = vadd.f32 %v1769_v57, %v1732_v3  ;;  %v770_v24 = vadd.f32 %v738_v32, %v700_v5  ;;  %v2153_v61 = vmul.f32 %v6671_v29, %v8793_v27  ;;  %v2154_v59 = vmul.f32 %v6671_v29, %v8796_v10  ;;  %8832 = vst [vmem:[#allocation46_spill] sm:$0xff] %v6903_v45  ;;  %v6906_v57 = vld [vmem:[%s4101_s19 + $0x1a4] sm:$0xff]  ;;  %v8834_v48 = vld [vmem:[#allocation42_spill] sm:$0xff] }
 0x178   : > { %v984_v11 = vmul.f32 %v6265_v58, %v8830_v36  ;;  %v985_v40 = vmul.f32 %v6265_v58, %v8831_v62  ;;  %v1869_v49 = vadd.f32 %v6800_v6, %v1800_v31  ;;  %8833 = vst [vmem:[#allocation27_spill] sm:$0xff] %v6906_v57  ;;  %v878_v22 = vadd.f32 %v846_v14, %v769_v8  ;;  %v8835_v6 = vld [vmem:[#allocation72_spill] sm:$0xff]  ;;  %v6923_v8 = vld [vmem:[%s4101_s19 + $0xf1] sm:$0xff] }
 0x179   : > { %v1870_v30 = vadd.f32 %v1838_v50, %v1801_v9  ;;  %v879_v27 = vadd.f32 %v847_v38, %v770_v24  ;;  %v2222_v10 = vmul.f32 %v6693_v60, %v6676_v51  ;;  %v2223_v32 = vmul.f32 %v6693_v60, %v6698_v56  ;;  %v6928_v36 = vld [vmem:[%s4101_s19 + $0xf9] sm:$0xff] }
 0x17a   : > { %v1053_v3 = vmul.f32 %v8834_v48, %v6280_v21  ;;  %v1054_v16 = vmul.f32 %v8835_v6, %v6280_v21  ;;  %v1938_v50 = vadd.f32 %v6813_v34, %v1869_v49  ;;  %v947_v31 = vadd.f32 %v915_v39, %v878_v22  ;;  %v8837_v22 = vld [vmem:[#allocation84_spill] sm:$0xff]  ;;  %v6943_v56 = vld [vmem:[%s4101_s19 + $0xb2] sm:$0xff] }
 0x17b   : > { %v1939_v5 = vadd.f32 %v6817_v13, %v1870_v30  ;;  %v948_v14 = vadd.f32 %v916_v46, %v879_v27  ;;  %v2291_v38 = vmul.f32 %v6714_v33, %v6903_v45  ;;  %v2292_v9 = vmul.f32 %v6714_v33, %v6906_v57  ;;  %v8836_v46 = vld [vmem:[#allocation35_spill] sm:$0xff]  ;;  %v6938_v57 = vld [vmem:[%s4101_s19 + $0xaa] sm:$0xff] }
 0x17c   : > { %v1122_v24 = vmul.f32 %v6923_v8, %v6298_v43  ;;  %v1123_v34 = vmul.f32 %v6928_v36, %v6298_v43  ;;  %v2047_v30 = vadd.f32 %v6826_v28, %v1938_v50  ;;  %v1016_v49 = vadd.f32 %v984_v11, %v947_v31  ;;  %8838 = vst [vmem:[#allocation116_spill] sm:$0xff] %v6938_v57 }
 0x17d   : > { %v2048_v13 = vadd.f32 %v2016_v42, %v1939_v5  ;;  %v1017_v39 = vadd.f32 %v985_v40, %v948_v14  ;;  %v1231_v62 = vmul.f32 %v6735_v26, %v8836_v46  ;;  %v1232_v27 = vmul.f32 %v6735_v26, %v8837_v22  ;;  %v8839_v5 = vld [vmem:[#allocation70_spill] sm:$0xff]  ;;  %v8840_v14 = vld [vmem:[#allocation43_spill] sm:$0xff] }
 0x17e   : > { %v1300_v45 = vmul.f32 %v6938_v57, %v6323_v54  ;;  %v1301_v28 = vmul.f32 %v6943_v56, %v6323_v54  ;;  %v2116_v42 = vadd.f32 %v2084_v41, %v2047_v30  ;;  %v1085_v11 = vadd.f32 %v1053_v3, %v1016_v49  ;;  %v8841_v22 = vld [vmem:[#allocation107_spill] sm:$0xff]  ;;  %v8842_v57 = vld [vmem:[#allocation61_spill] sm:$0xff] }
 0x17f   : > { %v2117_v40 = vadd.f32 %v2085_v4, %v2048_v13  ;;  %v1086_v50 = vadd.f32 %v1054_v16, %v1017_v39  ;;  %v1369_v31 = vmul.f32 %v6338_v37, %v8839_v5  ;;  %v1370_v46 = vmul.f32 %v6338_v37, %v8840_v14  ;;  %v6956_v3 = vld [vmem:[%s4101_s19 + $0xf2] sm:$0xff]  ;;  %v6961_v30 = vld [vmem:[%s4101_s19 + $0xfa] sm:$0xff]  ;;  %v8845_v5 = vld [vmem:[#allocation53_spill] sm:$0xff] }
 0x180   : > { %v1438_v51 = vmul.f32 %v8841_v22, %v6347_v52  ;;  %v1439_v26 = vmul.f32 %v8842_v57, %v6347_v52  ;;  %v2185_v43 = vadd.f32 %v2153_v61, %v2116_v42  ;;  %v1154_v41 = vadd.f32 %v1122_v24, %v1085_v11  ;;  %8843 = vst [vmem:[#allocation48_spill] sm:$0xff] %v6961_v30  ;;  %v8844_v49 = vld [vmem:[#allocation19_spill] sm:$0xff] }
 0x181   : > { %v2186_v54 = vadd.f32 %v2154_v59, %v2117_v40  ;;  %v1155_v4 = vadd.f32 %v1123_v34, %v1086_v50  ;;  %v1507_v16 = vmul.f32 %v6956_v3, %v6356_v18  ;;  %v1508_v13 = vmul.f32 %v6961_v30, %v6356_v18  ;;  %v6970_v40 = vld [vmem:[%s4101_s19 + $0xab] sm:$0xff]  ;;  %v6975_v50 = vld [vmem:[%s4101_s19 + $0xb3] sm:$0xff] }
 0x182   : > { %v1616_v39 = vmul.f32 %v6772_v47, %v8844_v49  ;;  %v1617_v61 = vmul.f32 %v6772_v47, %v8845_v5  ;;  %v2254_v42 = vadd.f32 %v2222_v10, %v2185_v43  ;;  %v1263_v24 = vadd.f32 %v1231_v62, %v1154_v41  ;;  %8846 = vst [vmem:[#allocation102_spill] sm:$0xff] %v6970_v40  ;;  %v8848_v49 = vld [vmem:[#allocation44_spill] sm:$0xff]  ;;  %v8849_v5 = vld [vmem:[#allocation23_spill] sm:$0xff] }
 0x183   : > { %v2255_v59 = vadd.f32 %v2223_v32, %v2186_v54  ;;  %v1264_v34 = vadd.f32 %v1232_v27, %v1155_v4  ;;  %v1685_v11 = vmul.f32 %v6970_v40, %v8807_v35  ;;  %8847 = vst [vmem:[#allocation99_spill] sm:$0xff] %v6975_v50  ;;  %v1686_v14 = vmul.f32 %v6975_v50, %v8807_v35  ;;  %v8850_v27 = vld [vmem:[#allocation89_spill] sm:$0xff]  ;;  %v8851_v4 = vld [vmem:[#allocation18_spill] sm:$0xff]  ;;  %v8859_v47 = vld [vmem:[#allocation36_spill] sm:$0xff] }
 0x184   : > { %v1754_v18 = vmul.f32 %v8811_v25, %v8848_v49  ;;  %v1755_v43 = vmul.f32 %v8811_v25, %v8849_v5  ;;  %v2323_v54 = vadd.f32 %v2291_v38, %v2254_v42  ;;  %v1332_v32 = vadd.f32 %v1300_v45, %v1263_v24  ;;  %v6992_v35 = vld [vmem:[%s4101_s19 + $0xf3] sm:$0xff]  ;;  %v6999_v38 = vld [vmem:[%s4101_s19 + $0xfb] sm:$0xff] }
 0x185   : > { %v2324_v10 = vadd.f32 %v2292_v9, %v2255_v59  ;;  %v1333_v62 = vadd.f32 %v1301_v28, %v1264_v34  ;;  %v6985_v41 = vmul.f32 %v8814_v20, %v8850_v27  ;;  %v6989_v40 = vmul.f32 %v8814_v20, %v8851_v4  ;;  %8852 = vst [vmem:[#allocation101_spill] sm:$0xff] %v6992_v35  ;;  %v8853_v50 = vld [vmem:[#allocation86_spill] sm:$0xff]  ;;  %v8855_v9 = vld [vmem:[#allocation83_spill] sm:$0xff]  ;;  %v3798_v27 = vld [vmem:[%s4101_s19 + $0xc0] sm:$0xff] }
 0x186   : > { %v6996_v49 = vmul.f32 %v6992_v35, %v8853_v50  ;;  %8854 = vst [vmem:[#allocation52_spill] sm:$0xff] %v6999_v38  ;;  %v7003_v45 = vmul.f32 %v6999_v38, %v8853_v50  ;;  %v2362_v28 = vmul.f32 %v8855_v9, %v2323_v54  ;;  %v1401_v59 = vadd.f32 %v1369_v31, %v1332_v32  ;;  %v8856_v34 = vld [vmem:[#allocation14_spill] sm:$0xff]  ;;  %v8860_v38 = vld [vmem:[#allocation97_spill] sm:$0xff] }
 0x187   : > { %v2363_v42 = vmul.f32 %v8855_v9, %v2324_v10  ;;  %v1402_v24 = vadd.f32 %v1370_v46, %v1333_v62  ;;  %v7009_v5 = vmul.f32 %v6822_v12, %v8856_v34  ;;  %v8857_v20 = vld [vmem:[#allocation110_spill] sm:$0xff]  ;;  %v529_v50 = vmul.f32 %v3798_v27, %v8859_v47  ;;  %v3799_v46 = vld [vmem:[%s4101_s19 + $0xc8] sm:$0xff] }
 0x188   : > { %v8858_v35 = vld [vmem:[#allocation98_spill] sm:$0xff]  ;;  %v460_v25 = vmul.f32 %v6845_v53, %v8857_v20  ;;  %v2401_v30 = vadd.f32 %v8860_v38, %v2362_v28  ;;  %v1470_v10 = vadd.f32 %v1438_v51, %v1401_v59  ;;  %v530_v32 = vmul.f32 %v3799_v46, %v8859_v47  ;;  %v8863_v46 = vld [vmem:[#allocation32_spill] sm:$0xff] }
 0x189   : > { %v459_v4 = vmul.f32 %v8858_v35, %v8857_v20  ;;  %v2402_v54 = vadd.f32 %v8860_v38, %v2363_v42  ;;  %v1471_v31 = vadd.f32 %v1439_v26, %v1402_v24  ;;  %v599_v35 = vmul.f32 %v8824_v63, %v8740_v15  ;;  %v3803_v24 = vld [vmem:[%s4101_s19 + $0xc1] sm:$0xff] }
 0x18a   : > { %v600_v53 = vmul.f32 %v8825_v19, %v8740_v15  ;;  %v2433_v34 = vmax.f32 %v2401_v30, 0.0  ;;  %v1539_v20 = vadd.f32 %v1507_v16, %v1470_v10  ;;  %v562_v9 = vadd.f32 %v530_v32, %v460_v25  ;;  %v3801_v16 = vld [vmem:[%s4101_s19 + $0x110] sm:$0xff] }
 0x18b   : > { %v561_v62 = vadd.f32 %v529_v50, %v459_v4  ;;  %v2434_v27 = vmax.f32 %v2402_v54, 0.0  ;;  %v1540_v28 = vadd.f32 %v1508_v13, %v1471_v31  ;;  %v669_v51 = vmul.f32 %v6858_v55, %v6204_v7  ;;  %v3800_v4 = vld [vmem:[%s4101_s19 + $0x108] sm:$0xff] }
 0x18c   : > { %v670_v26 = vmul.f32 %v6865_v1, %v6204_v7  ;;  %v1648_v50 = vadd.f32 %v1616_v39, %v1539_v20  ;;  %v739_v15 = vmul.f32 %v3800_v4, %v6213_v17  ;;  %v632_v19 = vadd.f32 %v600_v53, %v562_v9  ;;  %v8861_v7 = vld [vmem:[#allocation15_spill] sm:$0xff]  ;;  %v7038_v1 = vld [vmem:[%s4101_s19 + $0xac] sm:$0xff] }
 0x18d   : > { %v631_v42 = vadd.f32 %v599_v35, %v561_v62  ;;  %v2452_v47 = vpack.c.bf16 %v2434_v27, %v2433_v34  ;;  %v1649_v63 = vadd.f32 %v1617_v61, %v1540_v28  ;;  %v740_v25 = vmul.f32 %v3801_v16, %v6213_v17  ;;  %v8862_v54 = vld [vmem:[#allocation41_spill] sm:$0xff]  ;;  %v8864_v27 = vld [vmem:[#allocation71_spill] sm:$0xff] }
 0x18e   : > { %v848_v55 = vmul.f32 %v6884_v0, %v6657_v23  ;;  %v1717_v13 = vadd.f32 %v1685_v11, %v1648_v50  ;;  %v2002_v20 = vmul.f32 %v6822_v12, %v8861_v7  ;;  %v2070_v39 = vmul.f32 %v7038_v1, %v6468_v2  ;;  %v3805_v53 = vld [vmem:[%s4101_s19 + $0xc9] sm:$0xff] }
 0x18f   : > { %v701_v30 = vadd.f32 %v669_v51, %v631_v42  ;;  %3511 = vmatmul.mubr.bf16.gmra.mxu1 %v2452_v47  ;;  %v1718_v59 = vadd.f32 %v1686_v14, %v1649_v63  ;;  %v702_v61 = vadd.f32 %v670_v26, %v632_v19  ;;  %v849_v17 = vmul.f32 %v6889_v44, %v6657_v23  ;;  %v7047_v14 = vld [vmem:[%s4101_s19 + $0xb4] sm:$0xff] }
 0x190   : > { %v917_v0 = vmul.f32 %v3803_v24, %v8862_v54  ;;  %v1786_v10 = vadd.f32 %v1754_v18, %v1717_v13  ;;  %v2071_v31 = vmul.f32 %v7047_v14, %v6468_v2  ;;  %v2139_v32 = vmul.f32 %v6671_v29, %v8863_v46  ;;  %v8865_v42 = vld [vmem:[#allocation91_spill] sm:$0xff]  ;;  %v8866_v63 = vld [vmem:[#allocation38_spill] sm:$0xff]  ;;  %v8869_v24 = vld [vmem:[#allocation116_spill] sm:$0xff] }
 0x191   : > { %v771_v9 = vadd.f32 %v739_v15, %v701_v30  ;;  %v1787_v11 = vadd.f32 %v1755_v43, %v1718_v59  ;;  %v772_v62 = vadd.f32 %v740_v25, %v702_v61  ;;  %v918_v34 = vmul.f32 %v3805_v53, %v8862_v54  ;;  %v7072_v15 = vld [vmem:[%s4101_s19 + $0xf4] sm:$0xff] }
 0x192   : > { %v986_v44 = vmul.f32 %v8834_v48, %v6265_v58  ;;  %v1855_v18 = vadd.f32 %v6985_v41, %v1786_v10  ;;  %v2140_v28 = vmul.f32 %v6671_v29, %v8864_v27  ;;  %v2208_v51 = vmul.f32 %v6693_v60, %v8865_v42  ;;  %v3809_v59 = vld [vmem:[%s4101_s19 + $0x111] sm:$0xff] }
 0x193   : > { %v880_v35 = vadd.f32 %v848_v55, %v771_v9  ;;  %v1856_v43 = vadd.f32 %v6989_v40, %v1787_v11  ;;  %v881_v26 = vadd.f32 %v849_v17, %v772_v62  ;;  %v987_v50 = vmul.f32 %v8835_v6, %v6265_v58  ;;  %v3807_v6 = vld [vmem:[%s4101_s19 + $0x109] sm:$0xff]  ;;  %v7082_v55 = vld [vmem:[%s4101_s19 + $0xfc] sm:$0xff] }
 0x194   : > { %v1055_v48 = vmul.f32 %v6923_v8, %v6280_v21  ;;  %v1924_v41 = vadd.f32 %v6996_v49, %v1855_v18  ;;  %v2209_v4 = vmul.f32 %v6693_v60, %v8866_v63  ;;  %v2277_v19 = vmul.f32 %v7072_v15, %v6714_v33  ;;  %v8867_v8 = vld [vmem:[#allocation33_spill] sm:$0xff]  ;;  %v8868_v17 = vld [vmem:[#allocation55_spill] sm:$0xff] }
 0x195   : > { %v949_v47 = vadd.f32 %v917_v0, %v880_v35  ;;  %v1925_v40 = vadd.f32 %v7003_v45, %v1856_v43  ;;  %v950_v30 = vadd.f32 %v918_v34, %v881_v26  ;;  %v1056_v58 = vmul.f32 %v6928_v36, %v6280_v21  ;;  %v8870_v0 = vld [vmem:[#allocation78_spill] sm:$0xff] }
 0x196   : > { %v1124_v49 = vmul.f32 %v3807_v6, %v8867_v8  ;;  %v2033_v45 = vadd.f32 %v7009_v5, %v1924_v41  ;;  %v2278_v13 = vmul.f32 %v7082_v55, %v6714_v33  ;;  %v1125_v7 = vmul.f32 %v3809_v59, %v8867_v8  ;;  %v3811_v11 = vld [vmem:[%s4101_s19 + $0xca] sm:$0xff] }
 0x197   : > { %v1018_v16 = vadd.f32 %v986_v44, %v949_v47  ;;  %v2034_v25 = vadd.f32 %v2002_v20, %v1925_v40  ;;  %v1019_v61 = vadd.f32 %v987_v50, %v950_v30  ;;  %v1233_v21 = vmul.f32 %v8869_v24, %v8868_v17  ;;  %v3810_v20 = vld [vmem:[%s4101_s19 + $0xc2] sm:$0xff]  ;;  %v3812_v26 = vld [vmem:[%s4101_s19 + $0x10a] sm:$0xff]  ;;  %v8875_v40 = vld [vmem:[#allocation99_spill] sm:$0xff] }
 0x198   : > { %v1234_v36 = vmul.f32 %v6943_v56, %v8868_v17  ;;  %v2102_v54 = vadd.f32 %v2070_v39, %v2033_v45  ;;  %v1302_v10 = vmul.f32 %v3810_v20, %v8870_v0  ;;  %v1303_v46 = vmul.f32 %v3811_v11, %v8870_v0  ;;  %v8872_v47 = vld [vmem:[#allocation106_spill] sm:$0xff]  ;;  %v8883_v0 = vld [vmem:[#allocation83_spill] sm:$0xff] }
 0x199   : > { %v1087_v9 = vadd.f32 %v1055_v48, %v1018_v16  ;;  %v2103_v5 = vadd.f32 %v2071_v31, %v2034_v25  ;;  %v1088_v62 = vadd.f32 %v1056_v58, %v1019_v61  ;;  %v1371_v53 = vmul.f32 %v8841_v22, %v6338_v37  ;;  %v8871_v31 = vld [vmem:[#allocation48_spill] sm:$0xff]  ;;  %v3813_v48 = vld [vmem:[%s4101_s19 + $0x112] sm:$0xff]  ;;  %v8876_v58 = vld [vmem:[#allocation45_spill] sm:$0xff] }
 0x19a   : > { %v1372_v34 = vmul.f32 %v8842_v57, %v6338_v37  ;;  %v2171_v44 = vadd.f32 %v2139_v32, %v2102_v54  ;;  %v1440_v39 = vmul.f32 %v6956_v3, %v6347_v52  ;;  %v1441_v18 = vmul.f32 %v8871_v31, %v6347_v52  ;;  %v8873_v57 = vld [vmem:[#allocation104_spill] sm:$0xff]  ;;  %v8874_v32 = vld [vmem:[#allocation102_spill] sm:$0xff] }
 0x19b   : > { %v1156_v35 = vadd.f32 %v1124_v49, %v1087_v9  ;;  %v2172_v56 = vadd.f32 %v2140_v28, %v2103_v5  ;;  %v1157_v43 = vadd.f32 %v1125_v7, %v1088_v62  ;;  %v1509_v50 = vmul.f32 %v3812_v26, %v8872_v47  ;;  %v3814_v52 = vld [vmem:[%s4101_s19 + $0xc3] sm:$0xff]  ;;  %v3815_v8 = vld [vmem:[%s4101_s19 + $0xcb] sm:$0xff] }
 0x19c   : > { %v1510_v22 = vmul.f32 %v3813_v48, %v8872_v47  ;;  %v2240_v41 = vadd.f32 %v2208_v51, %v2171_v44  ;;  %v1618_v28 = vmul.f32 %v8874_v32, %v8873_v57  ;;  %v1619_v3 = vmul.f32 %v8875_v40, %v8873_v57  ;;  %v8877_v51 = vld [vmem:[#allocation89_spill] sm:$0xff]  ;;  %v8879_v7 = vld [vmem:[#allocation18_spill] sm:$0xff]  ;;  %v8882_v5 = vld [vmem:[#allocation52_spill] sm:$0xff] }
 0x19d   : > { %v1265_v27 = vadd.f32 %v1233_v21, %v1156_v35  ;;  %v2241_v37 = vadd.f32 %v2209_v4, %v2172_v56  ;;  %v1266_v30 = vadd.f32 %v1234_v36, %v1157_v43  ;;  %v1687_v6 = vmul.f32 %v3814_v52, %v8876_v58  ;;  %v8878_v4 = vld [vmem:[#allocation51_spill] sm:$0xff]  ;;  %v8880_v21 = vld [vmem:[#allocation85_spill] sm:$0xff]  ;;  %v8884_v11 = vld [vmem:[#allocation86_spill] sm:$0xff] }
 0x19e   : > { %v1688_v49 = vmul.f32 %v3815_v8, %v8876_v58  ;;  %v2309_v45 = vadd.f32 %v2277_v19, %v2240_v41  ;;  %v1756_v59 = vmul.f32 %v8878_v4, %v8877_v51  ;;  %v7120_v61 = vmul.f32 %v8878_v4, %v8879_v7  ;;  %v8881_v36 = vld [vmem:[#allocation101_spill] sm:$0xff]  ;;  %v8885_v31 = vld [vmem:[#allocation110_spill] sm:$0xff]  ;;  %v7174_v7 = vld [vmem:[%s4101_s19 + $0x1b8] sm:$0xff] }
 0x19f   : > { %v1334_v16 = vadd.f32 %v1302_v10, %v1265_v27  ;;  %v2310_v25 = vadd.f32 %v2278_v13, %v2241_v37  ;;  %v1335_v9 = vadd.f32 %v1303_v46, %v1266_v30  ;;  %v1825_v54 = vmul.f32 %v8881_v36, %v8880_v21  ;;  %v3816_v10 = vld [vmem:[%s4101_s19 + $0x10b] sm:$0xff]  ;;  %v3817_v46 = vld [vmem:[%s4101_s19 + $0x113] sm:$0xff] }
 0x1a0   : > { %v7126_v20 = vmul.f32 %v8882_v5, %v8880_v21  ;;  %v2348_v19 = vmul.f32 %v8883_v0, %v2309_v45  ;;  %v7132_v62 = vmul.f32 %v3816_v10, %v8884_v11  ;;  %v7136_v35 = vmul.f32 %v3817_v46, %v8884_v11  ;;  %v8886_v43 = vld [vmem:[#allocation93_spill] sm:$0xff]  ;;  %v8887_v48 = vld [vmem:[#allocation94_spill] sm:$0xff] }
 0x1a1   : > { %v1403_v24 = vadd.f32 %v1371_v53, %v1334_v16  ;;  %v2349_v13 = vmul.f32 %v8883_v0, %v2310_v25  ;;  %v1404_v53 = vadd.f32 %v1372_v34, %v1335_v9  ;;  %v7140_v56 = vmul.f32 %v7038_v1, %v6822_v12  ;;  %v7151_v34 = vld [vmem:[%s7863_s1 + $0x8] ss:$0 sm:$0xff]  ;;  %v7159_v40 = vld [vmem:[%s4101_s19 + $0x1b0] sm:$0xff] }
 0x1a2   : > { %v473_v27 = vmul.f32 %v8886_v43, %v8885_v31  ;;  %v2387_v26 = vadd.f32 %v8860_v38, %v2348_v19  ;;  %v474_v41 = vmul.f32 %v8887_v48, %v8885_v31  ;;  %v7162_v30 = vld [vmem:[%s4101_s19 + $0x170] sm:$0xff]  ;;  %v8888_v8 = vld [vmem:[#allocation73_spill] sm:$0xff]  ;;  %v7181_v19 = vld [vmem:[%s7863_s1 + $0x18] ss:$0 sm:$0xff]  ;;  %v2004_v48 = vmul.f32 %v7047_v14, %v6822_v12 }
 0x1a3   : > { %v1472_v44 = vadd.f32 %v1440_v39, %v1403_v24  ;;  %v2388_v47 = vadd.f32 %v8860_v38, %v2349_v13  ;;  %v7154_v39 = vld [vmem:[%s4101_s19 + $0x168] sm:$0xff]  ;;  %v1473_v37 = vadd.f32 %v1441_v18, %v1404_v53  ;;  %v544_v16 = vmul.f32 %v7162_v30, %v7151_v34  ;;  %v7169_v52 = vld [vmem:[%s7863_s1 + $0x10] ss:$0 sm:$0xff]  ;;  %v8890_v13 = vld [vmem:[#allocation96_spill] sm:$0xff] }
 0x1a4   : > { %v543_v1 = vmul.f32 %v7154_v39, %v7151_v34  ;;  %v613_v45 = vmul.f32 %v7169_v52, %v8888_v8  ;;  %v2419_v25 = vmax.f32 %v2387_v26, 0.0  ;;  %v683_v10 = vmul.f32 %v7181_v19, %v8890_v13 }
 0x1a5   : > { %v1541_v32 = vadd.f32 %v1509_v50, %v1472_v44  ;;  %v2420_v51 = vmax.f32 %v2388_v47, 0.0  ;;  %v8889_v50 = vld [vmem:[#allocation75_spill] sm:$0xff]  ;;  %v1542_v24 = vadd.f32 %v1510_v22, %v1473_v37  ;;  %v576_v5 = vadd.f32 %v544_v16, %v474_v41  ;;  %v7190_v22 = vld [vmem:[%s7863_s1 + $0x20] ss:$0 sm:$0xff]  ;;  %v3824_v41 = vld [vmem:[%s4101_s19 + $0xc4] sm:$0xff] }
 0x1a6   : > { %v575_v18 = vadd.f32 %v543_v1, %v473_v27  ;;  %v614_v9 = vmul.f32 %v7169_v52, %v8889_v50  ;;  %v8891_v44 = vld [vmem:[#allocation67_spill] sm:$0xff]  ;;  %v754_v47 = vmul.f32 %v7190_v22, %v7174_v7  ;;  %v2072_v1 = vmul.f32 %v3824_v41, %v6468_v2 }
 0x1a7   : > { %v1650_v36 = vadd.f32 %v1618_v28, %v1541_v32  ;;  %v2445_v46 = vpack.c.bf16 %v2420_v51, %v2419_v25  ;;  %v684_v31 = vmul.f32 %v7181_v19, %v8891_v44  ;;  %v753_v28 = vmul.f32 %v7190_v22, %v7159_v40  ;;  %v8892_v32 = vld [vmem:[#allocation62_spill] sm:$0xff] }
 0x1a8   : > { %v645_v53 = vadd.f32 %v613_v45, %v575_v18  ;;  %v1651_v43 = vadd.f32 %v1619_v3, %v1542_v24  ;;  %v646_v26 = vadd.f32 %v614_v9, %v576_v5  ;;  %v862_v16 = vmul.f32 %v8892_v32, %v6657_v23  ;;  %v8893_v45 = vld [vmem:[#allocation80_spill] sm:$0xff]  ;;  %v3825_v51 = vld [vmem:[%s4101_s19 + $0xcc] sm:$0xff]  ;;  %v7211_v9 = vld [vmem:[%s7863_s1 + $0x9] ss:$0 sm:$0xff] }
 0x1a9   : > { %v1719_v27 = vadd.f32 %v1687_v6, %v1650_v36  ;;  %3498 = vmatprep.mubr.bf16.mxu0 %v2445_v46  ;;  %v863_v25 = vmul.f32 %v8893_v45, %v6657_v23  ;;  %v2073_v18 = vmul.f32 %v3825_v51, %v6468_v2  ;;  %v2141_v14 = vmul.f32 %v6671_v29, %v8865_v42  ;;  %v7220_v5 = vld [vmem:[%s4101_s19 + $0x171] sm:$0xff] }
 0x1aa   : > { %v715_v37 = vadd.f32 %v683_v10, %v645_v53  ;;  %v1720_v8 = vadd.f32 %v1688_v49, %v1651_v43  ;;  %v716_v6 = vadd.f32 %v684_v31, %v646_v26  ;;  %v7214_v49 = vld [vmem:[%s4101_s19 + $0x169] sm:$0xff]  ;;  %v932_v42 = vmul.f32 %v7220_v5, %v7211_v9  ;;  %v7231_v31 = vld [vmem:[%s7863_s1 + $0x11] ss:$0 sm:$0xff]  ;;  %v3832_v51 = vld [vmem:[%s4101_s19 + $0x114] sm:$0xff] }
 0x1ab   : > { %v1788_v3 = vadd.f32 %v1756_v59, %v1719_v27  ;;  %v931_v59 = vmul.f32 %v7214_v49, %v7211_v9  ;;  %v2142_v10 = vmul.f32 %v6671_v29, %v8866_v63  ;;  %v2210_v46 = vmul.f32 %v7072_v15, %v6693_v60  ;;  %v7238_v27 = vld [vmem:[%s4101_s19 + $0x1b1] sm:$0xff]  ;;  %v7241_v63 = vld [vmem:[%s4101_s19 + $0x1b9] sm:$0xff] }
 0x1ac   : > { %v785_v50 = vadd.f32 %v753_v28, %v715_v37  ;;  %v1789_v24 = vadd.f32 %v7120_v61, %v1720_v8  ;;  %v786_v2 = vadd.f32 %v754_v47, %v716_v6  ;;  %v8894_v61 = vld [vmem:[#allocation76_spill] sm:$0xff]  ;;  %v8895_v15 = vld [vmem:[#allocation30_spill] sm:$0xff]  ;;  %v2211_v41 = vmul.f32 %v7082_v55, %v6693_v60 }
 0x1ad   : > { %v1857_v36 = vadd.f32 %v1825_v54, %v1788_v3  ;;  %v1000_v54 = vmul.f32 %v7231_v31, %v8894_v61  ;;  %v1001_v47 = vmul.f32 %v7231_v31, %v8895_v15  ;;  %v3830_v37 = vld [vmem:[%s4101_s19 + $0x10c] sm:$0xff]  ;;  %v7281_v15 = vld [vmem:[%s7863_s1 + $0xa] ss:$0 sm:$0xff] }
 0x1ae   : > { %v894_v53 = vadd.f32 %v862_v16, %v785_v50  ;;  %v1858_v28 = vadd.f32 %v7126_v20, %v1789_v24  ;;  %v895_v26 = vadd.f32 %v863_v25, %v786_v2  ;;  %v2279_v32 = vmul.f32 %v3830_v37, %v6714_v33  ;;  %v7252_v20 = vld [vmem:[%s7863_s1 + $0x19] ss:$0 sm:$0xff]  ;;  %v7265_v24 = vld [vmem:[%s7863_s1 + $0x21] ss:$0 sm:$0xff]  ;;  %8900 = vst [vmem:[#allocation40_spill] sm:$0xff] %v7281_v15  ;;  %v7284_v37 = vld [vmem:[%s4101_s19 + $0x16a] sm:$0xff] }
 0x1af   : > { %v1926_v43 = vadd.f32 %v7132_v62, %v1857_v36  ;;  %v8896_v62 = vld [vmem:[#allocation103_spill] sm:$0xff]  ;;  %v2280_v50 = vmul.f32 %v3832_v51, %v6714_v33  ;;  %8901 = vst [vmem:[#allocation109_spill] sm:$0xff] %v7284_v37  ;;  %v8905_v51 = vld [vmem:[#allocation81_spill] sm:$0xff] }
 0x1b0   : > { %v963_v16 = vadd.f32 %v931_v59, %v894_v53  ;;  %v1069_v8 = vmul.f32 %v7252_v20, %v8896_v62  ;;  %v1927_v3 = vadd.f32 %v7136_v35, %v1858_v28  ;;  %v964_v45 = vadd.f32 %v932_v42, %v895_v26  ;;  %v8897_v25 = vld [vmem:[#allocation63_spill] sm:$0xff]  ;;  %v8898_v53 = vld [vmem:[#allocation56_spill] sm:$0xff] }
 0x1b1   : > { %v2035_v6 = vadd.f32 %v7140_v56, %v1926_v43  ;;  %v1070_v55 = vmul.f32 %v7252_v20, %v8897_v25  ;;  %v1138_v35 = vmul.f32 %v7265_v24, %v7238_v27  ;;  %v1139_v56 = vmul.f32 %v7265_v24, %v7241_v63  ;;  %v8899_v43 = vld [vmem:[#allocation34_spill] sm:$0xff] }
 0x1b2   : > { %v1032_v59 = vadd.f32 %v1000_v54, %v963_v16  ;;  %v2036_v36 = vadd.f32 %v2004_v48, %v1927_v3  ;;  %v1033_v42 = vadd.f32 %v1001_v47, %v964_v45  ;;  %v1247_v61 = vmul.f32 %v8898_v53, %v8868_v17  ;;  %v7274_v54 = vld [vmem:[%s4101_s19 + $0x1b2] sm:$0xff] }
 0x1b3   : > { %v2104_v2 = vadd.f32 %v2072_v1, %v2035_v6  ;;  %v1248_v26 = vmul.f32 %v8899_v43, %v8868_v17  ;;  %v1316_v48 = vmul.f32 %v7284_v37, %v7281_v15  ;;  %v7289_v1 = vld [vmem:[%s4101_s19 + $0x172] sm:$0xff]  ;;  %v7294_v6 = vld [vmem:[%s4101_s19 + $0x1ba] sm:$0xff] }
 0x1b4   : > { %v1101_v28 = vadd.f32 %v1069_v8, %v1032_v59  ;;  %8902 = vst [vmem:[#allocation111_spill] sm:$0xff] %v7289_v1  ;;  %v1317_v47 = vmul.f32 %v7289_v1, %v7281_v15  ;;  %v2105_v16 = vadd.f32 %v2073_v18, %v2036_v36  ;;  %v1102_v3 = vadd.f32 %v1070_v55, %v1033_v42  ;;  %v7299_v45 = vld [vmem:[%s7863_s1 + $0x12] ss:$0 sm:$0xff]  ;;  %v8906_v43 = vld [vmem:[#allocation79_spill] sm:$0xff]  ;;  %v8909_v36 = vld [vmem:[#allocation92_spill] sm:$0xff] }
 0x1b5   : > { %v2173_v8 = vadd.f32 %v2141_v14, %v2104_v2  ;;  %8903 = vst [vmem:[#allocation108_spill] sm:$0xff] %v7294_v6  ;;  %8904 = vst [vmem:[#allocation64_spill] sm:$0xff] %v7299_v45  ;;  %v1385_v59 = vmul.f32 %v7299_v45, %v8905_v51  ;;  %v1386_v37 = vmul.f32 %v7299_v45, %v8906_v43  ;;  %v7308_v18 = vld [vmem:[%s7863_s1 + $0x1a] ss:$0 sm:$0xff] }
 0x1b6   : > { %v1170_v53 = vadd.f32 %v1138_v35, %v1101_v28  ;;  %8907 = vst [vmem:[#allocation58_spill] sm:$0xff] %v7308_v18  ;;  %v8908_v14 = vld [vmem:[#allocation115_spill] sm:$0xff]  ;;  %v1455_v2 = vmul.f32 %v7308_v18, %v8909_v36  ;;  %v2174_v42 = vadd.f32 %v2142_v10, %v2105_v16  ;;  %v1171_v35 = vadd.f32 %v1139_v56, %v1102_v3  ;;  %v7317_v28 = vld [vmem:[%s7863_s1 + $0x22] ss:$0 sm:$0xff]  ;;  %v7334_v36 = vld [vmem:[%s4101_s19 + $0x16b] sm:$0xff] }
 0x1b7   : > { %v1454_v55 = vmul.f32 %v7308_v18, %v8908_v14  ;;  %v2242_v51 = vadd.f32 %v2210_v46, %v2173_v8  ;;  %8910 = vst [vmem:[#allocation28_spill] sm:$0xff] %v7317_v28  ;;  %v1523_v43 = vmul.f32 %v7317_v28, %v7274_v54  ;;  %v1524_v14 = vmul.f32 %v7317_v28, %v7294_v6  ;;  %v8911_v15 = vld [vmem:[#allocation95_spill] sm:$0xff]  ;;  %v8912_v10 = vld [vmem:[#allocation68_spill] sm:$0xff]  ;;  %v8916_v6 = vld [vmem:[#allocation65_spill] sm:$0xff] }
 0x1b8   : > { %v1279_v45 = vadd.f32 %v1247_v61, %v1170_v53  ;;  %v1632_v1 = vmul.f32 %v8911_v15, %v8873_v57  ;;  %v1633_v46 = vmul.f32 %v8912_v10, %v8873_v57  ;;  %v2243_v16 = vadd.f32 %v2211_v41, %v2174_v42  ;;  %v7328_v3 = vld [vmem:[%s4101_s19 + $0x1b3] sm:$0xff]  ;;  %v7331_v18 = vld [vmem:[%s4101_s19 + $0x1bb] sm:$0xff]  ;;  %8915 = vst [vmem:[#allocation20_spill] sm:$0xff] %v7334_v36  ;;  %v8918_v10 = vld [vmem:[#allocation57_spill] sm:$0xff] }
 0x1b9   : > { %v2311_v56 = vadd.f32 %v2279_v32, %v2242_v51  ;;  %v1280_v8 = vadd.f32 %v1248_v26, %v1171_v35  ;;  %8913 = vst [vmem:[#allocation113_spill] sm:$0xff] %v7328_v3  ;;  %8914 = vst [vmem:[#allocation16_spill] sm:$0xff] %v7331_v18  ;;  %v1701_v61 = vmul.f32 %v7334_v36, %v8876_v58  ;;  %v7339_v28 = vld [vmem:[%s4101_s19 + $0x173] sm:$0xff] }
 0x1ba   : > { %v1348_v53 = vadd.f32 %v1316_v48, %v1279_v45  ;;  %v1702_v15 = vmul.f32 %v7339_v28, %v8876_v58  ;;  %v1770_v41 = vmul.f32 %v8878_v4, %v8916_v6  ;;  %v8917_v32 = vld [vmem:[#allocation66_spill] sm:$0xff]  ;;  %v2312_v42 = vadd.f32 %v2280_v50, %v2243_v16 }
 0x1bb   : > { %v1771_v26 = vmul.f32 %v8878_v4, %v8917_v32  ;;  %v2350_v51 = vmul.f32 %v8883_v0, %v2311_v56  ;;  %v1349_v35 = vadd.f32 %v1317_v47, %v1280_v8  ;;  %v1839_v36 = vmul.f32 %v8880_v21, %v8918_v10  ;;  %v8919_v45 = vld [vmem:[#allocation82_spill] sm:$0xff]  ;;  %v3842_v56 = vld [vmem:[%s7863_s1] ss:$0 sm:$0xff] }
 0x1bc   : > { %v1417_v48 = vadd.f32 %v1385_v59, %v1348_v53  ;;  %v7352_v57 = vmul.f32 %v8880_v21, %v8919_v45  ;;  %v7356_v58 = vmul.f32 %v8884_v11, %v7328_v3  ;;  %v7360_v4 = vmul.f32 %v8884_v11, %v7331_v18  ;;  %v8920_v59 = vld [vmem:[#allocation77_spill] sm:$0xff]  ;;  %v3843_v53 = vld [vmem:[%s4101_s19 + $0x180] sm:$0xff] }
 0x1bd   : > { %v2351_v50 = vmul.f32 %v8883_v0, %v2312_v42  ;;  %v2389_v47 = vadd.f32 %v8860_v38, %v2350_v51  ;;  %v1418_v6 = vadd.f32 %v1386_v37, %v1349_v35  ;;  %v7366_v21 = vmul.f32 %v8920_v59, %v6822_v12  ;;  %v438_v35 = vld [vmem:[%s4101_s19 + $0x1c8] sm:$0xff] }
 0x1be   : > { %v1486_v16 = vadd.f32 %v1454_v55, %v1417_v48  ;;  %v475_v8 = vmul.f32 %v3842_v56, %v7154_v39  ;;  %v476_v11 = vmul.f32 %v3842_v56, %v7162_v30  ;;  %v545_v32 = vmul.f32 %v3843_v53, %v7151_v34  ;;  %v3844_v18 = vld [vmem:[%s4101_s19 + $0x188] sm:$0xff]  ;;  %v439_v48 = vld [vmem:[%s4101_s19 + $0x1d0] sm:$0xff] }
 0x1bf   : > { %v2390_v42 = vadd.f32 %v8860_v38, %v2351_v50  ;;  %v2421_v51 = vmax.f32 %v2389_v47, 0.0  ;;  %v1487_v37 = vadd.f32 %v1455_v2, %v1418_v6  ;;  %v546_v59 = vmul.f32 %v3844_v18, %v7151_v34 }
 0x1c0   : > { %v1555_v55 = vadd.f32 %v1523_v43, %v1486_v16  ;;  %v577_v0 = vadd.f32 %v545_v32, %v475_v8  ;;  %v615_v3 = vmul.f32 %v7169_v52, %v8890_v13  ;;  %v616_v39 = vmul.f32 %v7169_v52, %v8891_v44 }
 0x1c1   : > { %v2422_v30 = vmax.f32 %v2390_v42, 0.0  ;;  %v1556_v56 = vadd.f32 %v1524_v14, %v1487_v37  ;;  %v578_v53 = vadd.f32 %v546_v59, %v476_v11  ;;  %v685_v50 = vmul.f32 %v7181_v19, %v7159_v40  ;;  %v8921_v14 = vld [vmem:[#allocation59_spill] sm:$0xff]  ;;  %v3848_v11 = vld [vmem:[%s4101_s19 + $0x181] sm:$0xff]  ;;  %v3849_v59 = vld [vmem:[%s4101_s19 + $0x189] sm:$0xff] }
 0x1c2   : > { %v1664_v2 = vadd.f32 %v1632_v1, %v1555_v55  ;;  %v647_v47 = vadd.f32 %v615_v3, %v577_v0  ;;  %v686_v34 = vmul.f32 %v7181_v19, %v7174_v7  ;;  %v755_v18 = vmul.f32 %v7190_v22, %v438_v35  ;;  %v7397_v19 = vld [vmem:[%s7863_s1 + $0xc] ss:$0 sm:$0xff]  ;;  %v8923_v55 = vld [vmem:[#allocation24_spill] sm:$0xff] }
 0x1c3   : > { %v2446_v43 = vpack.c.bf16 %v2422_v30, %v2421_v51  ;;  %v1665_v13 = vadd.f32 %v1633_v46, %v1556_v56  ;;  %v648_v6 = vadd.f32 %v616_v39, %v578_v53  ;;  %v756_v52 = vmul.f32 %v7190_v22, %v439_v48  ;;  %v7400_v1 = vld [vmem:[%s4101_s19 + $0x16c] sm:$0xff]  ;;  %v7426_v56 = vld [vmem:[%s4101_s19 + $0x1bc] sm:$0xff] }
 0x1c4   : > { %v1733_v44 = vadd.f32 %v1701_v61, %v1664_v2  ;;  %v2018_v16 = vmul.f32 %v8921_v14, %v6822_v12  ;;  %v717_v40 = vadd.f32 %v685_v50, %v647_v47  ;;  %v864_v0 = vmul.f32 %v7214_v49, %v6657_v23  ;;  %v7407_v49 = vld [vmem:[%s4101_s19 + $0x174] sm:$0xff]  ;;  %v827_v2 = vld [vmem:[%s4101_s19 + $0x1c9] sm:$0xff] }
 0x1c5   : > { %3499 = vmatmul.mubr.bf16.gmra.mxu0 %v2446_v43  ;;  %v1734_v7 = vadd.f32 %v1702_v15, %v1665_v13  ;;  %v2086_v22 = vmul.f32 %v7400_v1, %v7397_v19  ;;  %v718_v46 = vadd.f32 %v686_v34, %v648_v6  ;;  %v865_v3 = vmul.f32 %v7220_v5, %v6657_v23  ;;  %v8922_v51 = vld [vmem:[#allocation90_spill] sm:$0xff]  ;;  %v8925_v34 = vld [vmem:[#allocation27_spill] sm:$0xff] }
 0x1c6   : > { %v1802_v61 = vadd.f32 %v1770_v41, %v1733_v44  ;;  %v2087_v15 = vmul.f32 %v7407_v49, %v7397_v19  ;;  %v787_v8 = vadd.f32 %v755_v18, %v717_v40  ;;  %v933_v32 = vmul.f32 %v3848_v11, %v7211_v9  ;;  %v7418_v41 = vld [vmem:[%s4101_s19 + $0x1b4] sm:$0xff]  ;;  %v8926_v40 = vld [vmem:[#allocation109_spill] sm:$0xff] }
 0x1c7   : > { %v1803_v42 = vadd.f32 %v1771_v26, %v1734_v7  ;;  %v2155_v37 = vmul.f32 %v6671_v29, %v8922_v51  ;;  %v788_v35 = vadd.f32 %v756_v52, %v718_v46  ;;  %v934_v23 = vmul.f32 %v3849_v59, %v7211_v9  ;;  %v8924_v53 = vld [vmem:[#allocation46_spill] sm:$0xff]  ;;  %v8927_v46 = vld [vmem:[#allocation111_spill] sm:$0xff] }
 0x1c8   : > { %v1871_v5 = vadd.f32 %v1839_v36, %v1802_v61  ;;  %v2156_v48 = vmul.f32 %v6671_v29, %v8923_v55  ;;  %v896_v39 = vadd.f32 %v864_v0, %v787_v8  ;;  %v1002_v30 = vmul.f32 %v7231_v31, %v8896_v62  ;;  %v7433_v36 = vpop.f32.mrf.mxu0  ;;  %v828_v62 = vld [vmem:[%s4101_s19 + $0x1d1] sm:$0xff]  ;;  %v8928_v61 = vld [vmem:[#allocation40_spill] sm:$0xff] }
 0x1c9   : > { %v1872_v26 = vadd.f32 %v7352_v57, %v1803_v42  ;;  %v2224_v50 = vmul.f32 %v6693_v60, %v8924_v53  ;;  %v897_v47 = vadd.f32 %v865_v3, %v788_v35  ;;  %v1003_v9 = vmul.f32 %v7231_v31, %v8897_v25  ;;  %v3850_v3 = vld [vmem:[%s4101_s19 + $0x182] sm:$0xff]  ;;  %v3851_v42 = vld [vmem:[%s4101_s19 + $0x18a] sm:$0xff]  ;;  %v8929_v51 = vld [vmem:[#allocation115_spill] sm:$0xff] }
 0x1ca   : > { %v1940_v29 = vadd.f32 %v7356_v58, %v1871_v5  ;;  %v2225_v18 = vmul.f32 %v6693_v60, %v8925_v34  ;;  %v965_v43 = vadd.f32 %v933_v32, %v896_v39  ;;  %v1071_v57 = vmul.f32 %v7252_v20, %v7238_v27  ;;  %v7453_v7 = vpop.f32.mrf.mxu0  ;;  %v8930_v35 = vld [vmem:[#allocation64_spill] sm:$0xff] }
 0x1cb   : > { %v1941_v13 = vadd.f32 %v7360_v4, %v1872_v26  ;;  %v2293_v6 = vmul.f32 %v6714_v33, %v7418_v41  ;;  %v966_v31 = vadd.f32 %v934_v23, %v897_v47  ;;  %v1072_v25 = vmul.f32 %v7252_v20, %v7241_v63  ;;  %v8931_v5 = vld [vmem:[#allocation92_spill] sm:$0xff] }
 0x1cc   : > { %v2049_v58 = vadd.f32 %v7366_v21, %v1940_v29  ;;  %v2294_v60 = vmul.f32 %v6714_v33, %v7426_v56  ;;  %v1034_v52 = vadd.f32 %v1002_v30, %v965_v43  ;;  %v1140_v27 = vmul.f32 %v7265_v24, %v827_v2  ;;  %v1212_v21 = vld [vmem:[%s4101_s19 + $0x1ca] sm:$0xff]  ;;  %v8933_v26 = vld [vmem:[#allocation108_spill] sm:$0xff]  ;;  %v3504_v29 = vpop.f32.mrf.mxu1 }
 0x1cd   : > { %v2050_v44 = vadd.f32 %v2018_v16, %v1941_v13  ;;  %v1035_v4 = vadd.f32 %v1003_v9, %v966_v31  ;;  %v1141_v14 = vmul.f32 %v7265_v24, %v828_v62  ;;  %v1249_v0 = vmul.f32 %v8926_v40, %v8868_v17  ;;  %v1213_v16 = vld [vmem:[%s4101_s19 + $0x1d2] sm:$0xff]  ;;  %v8934_v47 = vld [vmem:[#allocation28_spill] sm:$0xff] }
 0x1ce   : > { %v2118_v63 = vadd.f32 %v2086_v22, %v2049_v58  ;;  %v1103_v20 = vadd.f32 %v1071_v57, %v1034_v52  ;;  %v1250_v33 = vmul.f32 %v8927_v46, %v8868_v17  ;;  %v1318_v8 = vmul.f32 %v3850_v3, %v8928_v61  ;;  %v8932_v17 = vld [vmem:[#allocation58_spill] sm:$0xff]  ;;  %v8935_v13 = vld [vmem:[#allocation104_spill] sm:$0xff]  ;;  %v8937_v3 = vld [vmem:[#allocation113_spill] sm:$0xff] }
 0x1cf   : > { %v2119_v11 = vadd.f32 %v2087_v15, %v2050_v44  ;;  %v1104_v32 = vadd.f32 %v1072_v25, %v1035_v4  ;;  %v1319_v24 = vmul.f32 %v3851_v42, %v8928_v61  ;;  %v1387_v59 = vmul.f32 %v8930_v35, %v8929_v51  ;;  %v8936_v31 = vld [vmem:[#allocation20_spill] sm:$0xff]  ;;  %v1598_v40 = vld [vmem:[%s4101_s19 + $0x1d3] sm:$0xff] }
 0x1d0   : > { %v2187_v23 = vadd.f32 %v2155_v37, %v2118_v63  ;;  %v1172_v22 = vadd.f32 %v1140_v27, %v1103_v20  ;;  %v1388_v55 = vmul.f32 %v8930_v35, %v8931_v5  ;;  %v1456_v39 = vmul.f32 %v8932_v17, %v7274_v54  ;;  %v3489_v37 = vpop.f32.mrf.mxu0  ;;  %v3852_v27 = vld [vmem:[%s7863_s1 + $0xb] ss:$0 sm:$0xff]  ;;  %v3853_v44 = vld [vmem:[%s4101_s19 + $0x183] sm:$0xff]  ;;  %v7498_v61 = vld [vmem:[%s7867_s5] ss:$0 sm:$0xff] }
 0x1d1   : > { %v2188_v30 = vadd.f32 %v2156_v48, %v2119_v11  ;;  %v1173_v15 = vadd.f32 %v1141_v14, %v1104_v32  ;;  %v1457_v2 = vmul.f32 %v8932_v17, %v8933_v26  ;;  %v1525_v9 = vmul.f32 %v8934_v47, %v1212_v21  ;;  %v1597_v48 = vld [vmem:[%s4101_s19 + $0x1cb] sm:$0xff]  ;;  %v8938_v32 = vld [vmem:[#allocation83_spill] sm:$0xff] }
 0x1d2   : > { %v2256_v62 = vadd.f32 %v2224_v50, %v2187_v23  ;;  %v1281_v43 = vadd.f32 %v1249_v0, %v1172_v22  ;;  %v1526_v57 = vmul.f32 %v8934_v47, %v1213_v16  ;;  %v1634_v25 = vmul.f32 %v8936_v31, %v8935_v13  ;;  %v3854_v0 = vld [vmem:[%s4101_s19 + $0x18b] sm:$0xff]  ;;  %v2516_v11 = vpop.f32.mrf.mxu0  ;;  %v8939_v16 = vld [vmem:[#allocation16_spill] sm:$0xff] }
 0x1d3   : > { %v2257_v54 = vadd.f32 %v2225_v18, %v2188_v30  ;;  %v1282_v58 = vadd.f32 %v1250_v33, %v1173_v15  ;;  %v1635_v52 = vmul.f32 %v7339_v28, %v8935_v13  ;;  %v1703_v4 = vmul.f32 %v3853_v44, %v3852_v27  ;;  %v3855_v18 = vld [vmem:[%s7863_s1 + $0x13] ss:$0 sm:$0xff]  ;;  %v3856_v33 = vld [vmem:[%s7863_s1 + $0x1b] ss:$0 sm:$0xff]  ;;  %v3858_v31 = vld [vmem:[%s4101_s19 + $0x184] sm:$0xff] }
 0x1d4   : > { %v2325_v14 = vadd.f32 %v2293_v6, %v2256_v62  ;;  %v1350_v50 = vadd.f32 %v1318_v8, %v1281_v43  ;;  %v1704_v63 = vmul.f32 %v3854_v0, %v3852_v27  ;;  %v1772_v20 = vmul.f32 %v3855_v18, %v8918_v10  ;;  %v2577_v8 = vpop.f32.mrf.mxu1  ;;  %v3492_v43 = vpop.f32.mrf.mxu0 }
 0x1d5   : > { %v2326_v21 = vadd.f32 %v2294_v60, %v2257_v54  ;;  %v1351_v46 = vadd.f32 %v1319_v24, %v1282_v58  ;;  %v1773_v28 = vmul.f32 %v3855_v18, %v8919_v45  ;;  %v7493_v6 = vmul.f32 %v3856_v33, %v8937_v3  ;;  %v3857_v45 = vld [vmem:[%s7863_s1 + $0x23] ss:$0 sm:$0xff] }
 0x1d6   : > { %v2364_v10 = vmul.f32 %v8938_v32, %v2325_v14  ;;  %v1419_v60 = vadd.f32 %v1387_v59, %v1350_v50  ;;  %v1842_v42 = vmul.f32 %v3856_v33, %v8939_v16  ;;  %v7505_v24 = vmul.f32 %v3857_v45, %v1597_v48  ;;  %v7517_v59 = vld [vmem:[%s7868_s6] ss:$0 sm:$0xff]  ;;  %v3505_v62 = vpop.f32.mrf.mxu1  ;;  %v3859_v14 = vld [vmem:[%s4101_s19 + $0x18c] sm:$0xff]  ;;  %v3860_v50 = vld [vmem:[%s7863_s1 + $0x14] ss:$0 sm:$0xff]  ;;  %v2529_v0 = vpop.f32.mrf.mxu0 }
 0x1d7   : > { %v2365_v51 = vmul.f32 %v8938_v32, %v2326_v21  ;;  %v1420_v35 = vadd.f32 %v1388_v55, %v1351_v46  ;;  %v7508_v23 = vmul.f32 %v3857_v45, %v1598_v40  ;;  %v7512_v22 = vmul.f32 %v7400_v1, %v6822_v12 }
 0x1d8   : > { %v2403_v5 = vadd.f32 %v8860_v38, %v2364_v10  ;;  %v1488_v17 = vadd.f32 %v1456_v39, %v1419_v60  ;;  %v2649_v30 = vmul.f32 %v7433_v36, %v7498_v61  ;;  %v2665_v55 = vmul.f32 %v3504_v29, %v7498_v61  ;;  %v2580_v40 = vpop.f32.mrf.mxu1  ;;  %v3493_v45 = vpop.f32.mrf.mxu0 }
 0x1d9   : > { %v2404_v15 = vadd.f32 %v8860_v38, %v2365_v51  ;;  %v1489_v26 = vadd.f32 %v1457_v2, %v1420_v35  ;;  %v7526_v1 = vmul.f32 %v7407_v49, %v6822_v12  ;;  %v2647_v47 = vmul.f32 %v7498_v61, %v7453_v7 }
 0x1da   : > { %v2435_v13 = vmax.f32 %v2403_v5, 0.0  ;;  %v1557_v39 = vadd.f32 %v1525_v9, %v1488_v17  ;;  %v7532_v36 = vmul.f32 %v3858_v31, %v7397_v19  ;;  %v2704_v29 = vadd.f32 %v7517_v59, %v2665_v55  ;;  %v7542_v9 = vld [vmem:[%s7869_s7] ss:$0 sm:$0xff] }
 0x1db   : > { %v2436_v38 = vmax.f32 %v2404_v15, 0.0  ;;  %v1558_v2 = vadd.f32 %v1526_v57, %v1489_v26  ;;  %v2688_v54 = vadd.f32 %v7517_v59, %v2649_v30  ;;  %v2663_v12 = vmul.f32 %v7498_v61, %v2577_v8 }
 0x1dc   : > { %v1666_v49 = vadd.f32 %v1634_v25, %v1557_v39  ;;  %v2736_v58 = vmax.f32 %v2704_v29, 0.0  ;;  %v2686_v7 = vadd.f32 %v7517_v59, %v2647_v47  ;;  %v2650_v48 = vmul.f32 %v3489_v37, %v7498_v61 }
 0x1dd   : > { %v2453_v27 = vpack.c.bf16 %v2436_v38, %v2435_v13  ;;  %v1667_v44 = vadd.f32 %v1635_v52, %v1558_v2  ;;  %v2089_v57 = vmul.f32 %v3859_v14, %v7397_v19  ;;  %v2157_v25 = vmul.f32 %v3860_v50, %v8924_v53  ;;  %v1983_v2 = vld [vmem:[%s4101_s19 + $0x1d4] sm:$0xff] }
 0x1de   : > { %v1735_v18 = vadd.f32 %v1703_v4, %v1666_v49  ;;  %v2689_v37 = vadd.f32 %v7517_v59, %v2650_v48  ;;  %v2666_v21 = vmul.f32 %v3505_v62, %v7498_v61  ;;  %v2648_v46 = vmul.f32 %v7498_v61, %v2516_v11  ;;  %v1982_v62 = vld [vmem:[%s4101_s19 + $0x1cc] sm:$0xff] }
 0x1df   : > { %3514 = vmatprep.mubr.bf16.mxu1 %v2453_v27  ;;  %v1736_v52 = vadd.f32 %v1704_v63, %v1667_v44  ;;  %v2720_v33 = vmax.f32 %v2688_v54, 0.0  ;;  %v2702_v19 = vadd.f32 %v7517_v59, %v2663_v12  ;;  %v2775_v3 = vmul.f32 %v7542_v9, %v2736_v58 }
 0x1e0   : > { %v1804_v8 = vadd.f32 %v1772_v20, %v1735_v18  ;;  %v2158_v32 = vmul.f32 %v3860_v50, %v8925_v34  ;;  %v2718_v53 = vmax.f32 %v2686_v7, 0.0  ;;  %v2664_v10 = vmul.f32 %v7498_v61, %v2580_v40  ;;  %v3861_v34 = vld [vmem:[%s7863_s1 + $0x1c] ss:$0 sm:$0xff]  ;;  %v2532_v7 = vpop.f32.mrf.mxu0 }
 0x1e1   : > { %v1805_v4 = vadd.f32 %v1773_v28, %v1736_v52  ;;  %v2721_v60 = vmax.f32 %v2689_v37, 0.0  ;;  %v2705_v16 = vadd.f32 %v7517_v59, %v2666_v21  ;;  %v2687_v63 = vadd.f32 %v7517_v59, %v2648_v46 }
 0x1e2   : > { %v1873_v11 = vadd.f32 %v7493_v6, %v1804_v8  ;;  %v2653_v51 = vmul.f32 %v3492_v43, %v7498_v61  ;;  %v2844_v20 = vsel %vm2789_vm0, %v2775_v3, 0.0  ;;  %v2226_v28 = vmul.f32 %v3861_v34, %v7418_v41 }
 0x1e3   : > { %v1874_v35 = vadd.f32 %v1842_v42, %v1805_v4  ;;  %v2734_v5 = vmax.f32 %v2702_v19, 0.0  ;;  %2845 = vadd.xlane.f32.xlu0 %v2844_v20  ;;  %v2759_v17 = vmul.f32 %v7542_v9, %v2720_v33  ;;  %v2703_v30 = vadd.f32 %v7517_v59, %v2664_v10 }
 0x1e4   : > { %v1942_v6 = vadd.f32 %v7505_v24, %v1873_v11  ;;  %v2654_v55 = vmul.f32 %v3493_v45, %v7498_v61  ;;  %v2757_v15 = vmul.f32 %v7542_v9, %v2718_v53  ;;  %v2737_v26 = vmax.f32 %v2705_v16, 0.0 }
 0x1e5   : > { %v1943_v42 = vadd.f32 %v7508_v23, %v1874_v35  ;;  %v2796_v47 = vsel %vm2789_vm0, %v2759_v17, 0.0  ;;  %v2760_v41 = vmul.f32 %v7542_v9, %v2721_v60  ;;  %v2719_v13 = vmax.f32 %v2687_v63, 0.0 }
 0x1e6   : > { %v2051_v43 = vadd.f32 %v7512_v22, %v1942_v6  ;;  %v2692_v24 = vadd.f32 %v7517_v59, %v2653_v51  ;;  %2797 = vadd.xlane.f32.xlu1 %v2796_v47  ;;  %v2790_v39 = vsel %vm2789_vm0, %v2757_v15, 0.0  ;;  %v2227_v29 = vmul.f32 %v3861_v34, %v7426_v56  ;;  %v3508_v22 = vpop.f32.mrf.mxu1  ;;  %v3862_v56 = vld [vmem:[%s7863_s1 + $0x24] ss:$0 sm:$0xff]  ;;  %v3863_v51 = vld [vmem:[%s7864_s2] ss:$0 sm:$0xff] }
 0x1e7   : > { %v2052_v31 = vadd.f32 %v7526_v1, %v1943_v42  ;;  %2791 = vadd.xlane.f32.xlu0 %v2790_v39  ;;  %v2799_v23 = vsel %vm2789_vm0, %v2760_v41, 0.0  ;;  %v2773_v38 = vmul.f32 %v7542_v9, %v2734_v5  ;;  %v2735_v12 = vmax.f32 %v2703_v30, 0.0 }
 0x1e8   : > { %v2120_v54 = vadd.f32 %v7532_v36, %v2051_v43  ;;  %v2651_v49 = vmul.f32 %v7498_v61, %v2529_v0  ;;  %v2693_v58 = vadd.f32 %v7517_v59, %v2654_v55  ;;  %v2295_v1 = vmul.f32 %v3862_v56, %v1982_v62  ;;  %v2593_v36 = vpop.f32.mrf.mxu1  ;;  %v3864_v55 = vld [vmem:[%s7865_s3] ss:$0 sm:$0xff] }
 0x1e9   : > { %v2121_v48 = vadd.f32 %v2089_v57, %v2052_v31  ;;  %v2669_v27 = vmul.f32 %v3508_v22, %v7498_v61  ;;  %v2776_v44 = vmul.f32 %v7542_v9, %v2737_v26  ;;  %v2724_v50 = vmax.f32 %v2692_v24, 0.0 }
 0x1ea   : > { %v2189_v14 = vadd.f32 %v2157_v25, %v2120_v54  ;;  %2800 = vadd.xlane.f32.xlu1 %v2799_v23  ;;  %v2838_v40 = vsel %vm2789_vm0, %v2773_v38, 0.0  ;;  %v2758_v0 = vmul.f32 %v7542_v9, %v2719_v13  ;;  %v2296_v37 = vmul.f32 %v3862_v56, %v1983_v2  ;;  %v3509_v19 = vpop.f32.mrf.mxu1 }
 0x1eb   : > { %v2190_v18 = vadd.f32 %v2158_v32, %v2121_v48  ;;  %v2708_v57 = vadd.f32 %v7517_v59, %v2669_v27  ;;  %v2652_v21 = vmul.f32 %v7498_v61, %v2532_v7  ;;  %2839 = vadd.xlane.f32.xlu0 %v2838_v40  ;;  %v2690_v52 = vadd.f32 %v7517_v59, %v2651_v49 }
 0x1ec   : > { %v2258_v46 = vadd.f32 %v2226_v28, %v2189_v14  ;;  %v2725_v33 = vmax.f32 %v2693_v58, 0.0  ;;  %v2774_v25 = vmul.f32 %v7542_v9, %v2735_v12  ;;  %v2667_v8 = vmul.f32 %v7498_v61, %v2593_v36  ;;  %v2596_v60 = vpop.f32.mrf.mxu1 }
 0x1ed   : > { %v2259_v3 = vadd.f32 %v2227_v29, %v2190_v18  ;;  %v2670_v53 = vmul.f32 %v3509_v19, %v7498_v61  ;;  %v2847_v32 = vsel %vm2789_vm0, %v2776_v44, 0.0  ;;  %v2740_v4 = vmax.f32 %v2708_v57, 0.0 }
 0x1ee   : > { %v2327_v10 = vadd.f32 %v2295_v1, %v2258_v46  ;;  %2848 = vadd.xlane.f32.xlu1 %v2847_v32  ;;  %v2793_v16 = vsel %vm2789_vm0, %v2758_v0, 0.0  ;;  %v2763_v45 = vmul.f32 %v7542_v9, %v2724_v50  ;;  %v2722_v35 = vmax.f32 %v2690_v52, 0.0 }
 0x1ef   : > { %v2328_v11 = vadd.f32 %v2296_v37, %v2259_v3  ;;  %v2709_v63 = vadd.f32 %v7517_v59, %v2670_v53  ;;  %2794 = vadd.xlane.f32.xlu0 %v2793_v16  ;;  %v2691_v34 = vadd.f32 %v7517_v59, %v2652_v21  ;;  %v2841_v28 = vsel %vm2789_vm0, %v2774_v25, 0.0 }
 0x1f0   : > { %v2366_v20 = vmul.f32 %v3863_v51, %v2327_v10  ;;  %v2668_v6 = vmul.f32 %v7498_v61, %v2596_v60  ;;  %v2764_v30 = vmul.f32 %v7542_v9, %v2725_v33  ;;  %v2706_v42 = vadd.f32 %v7517_v59, %v2667_v8 }
 0x1f1   : > { %v2367_v5 = vmul.f32 %v3863_v51, %v2328_v11  ;;  %v2741_v17 = vmax.f32 %v2709_v63, 0.0  ;;  %v2808_v26 = vsel %vm2789_vm0, %v2763_v45, 0.0  ;;  %v2779_v47 = vmul.f32 %v7542_v9, %v2740_v4 }
 0x1f2   : > { %v2405_v15 = vadd.f32 %v3864_v55, %v2366_v20  ;;  %2842 = vadd.xlane.f32.xlu1 %v2841_v28  ;;  %v2723_v43 = vmax.f32 %v2691_v34, 0.0  ;;  %v2707_v24 = vadd.f32 %v7517_v59, %v2668_v6  ;;  %v2811_v39 = vsel %vm2789_vm0, %v2764_v30, 0.0 }
 0x1f3   : > { %v2406_v41 = vadd.f32 %v3864_v55, %v2367_v5  ;;  %2809 = vadd.xlane.f32.xlu0 %v2808_v26  ;;  %v2780_v31 = vmul.f32 %v7542_v9, %v2741_v17  ;;  %v2738_v29 = vmax.f32 %v2706_v42, 0.0  ;;  %v2856_v23 = vsel %vm2789_vm0, %v2779_v47, 0.0 }
 0x1f4   : > { %v2437_v62 = vmax.f32 %v2405_v15, 0.0  ;;  %v2761_v38 = vmul.f32 %v7542_v9, %v2722_v35  ;;  %v2739_v54 = vmax.f32 %v2707_v24, 0.0  ;;  %v2762_v22 = vmul.f32 %v7542_v9, %v2723_v43 }
 0x1f5   : > { %v2438_v13 = vmax.f32 %v2406_v41, 0.0  ;;  %v2859_v12 = vsel %vm2789_vm0, %v2780_v31, 0.0  ;;  %v2777_v58 = vmul.f32 %v7542_v9, %v2738_v29  ;;  %v2918_v29 = vlaneseq }
 0x1f6   : > { %2812 = vadd.xlane.f32.xlu1 %v2811_v39  ;;  %v2802_v49 = vsel %vm2789_vm0, %v2761_v38, 0.0  ;;  %v2805_v7 = vsel %vm2789_vm0, %v2762_v22, 0.0  ;;  %v2778_v48 = vmul.f32 %v7542_v9, %v2739_v54 }
 0x1f7   : > { %v2454_v2 = vpack.c.bf16 %v2438_v13, %v2437_v62  ;;  %2857 = vadd.xlane.f32.xlu0 %v2856_v23  ;;  %v2850_v56 = vsel %vm2789_vm0, %v2777_v58, 0.0  ;;  %v2921_v54 = vshrl.u32 %v2918_v29, 7 }
 0x1f8   : > { %v2853_v1 = vsel %vm2789_vm0, %v2778_v48, 0.0 }
 0x1f9   : > { %3515 = vmatmul.mubr.bf16.gmra.mxu1 %v2454_v2  ;;  %v2919_v2 = vand.u32 127, %v2918_v29 }
 0x1fa   : > { %2860 = vadd.xlane.f32.xlu1 %v2859_v12 }
 0x1fb   : > { %2803 = vadd.xlane.f32.xlu0 %v2802_v49  ;;  %v2924_v22 = vadd.s32 4294967288, %v2919_v2  ;;  %v7667_v58 = vsub.s32 %v2919_v2, %v2921_v54 }
 0x1fd   : > { %v7669_v48 = vsub.s32 %v2924_v22, %v2921_v54 }
 0x1fe   : > { %2806 = vadd.xlane.f32.xlu1 %v2805_v7 }
 0x1ff   : > { %2851 = vadd.xlane.f32.xlu0 %v2850_v56 }
 0x202   : > { %2854 = vadd.xlane.f32.xlu1 %v2853_v1 }
 0x219   : > { %v3496_v27 = vpop.f32.mrf.mxu0 }
 0x21a   : > { %v2657_v44 = vmul.f32 %v3496_v27, %v7498_v61 }
 0x21b   : > { %v2545_v14 = vpop.f32.mrf.mxu0 }
 0x21c   : > { %v2696_v50 = vadd.f32 %v7517_v59, %v2657_v44  ;;  %v2655_v33 = vmul.f32 %v7498_v61, %v2545_v14 }
 0x21d   : > { %v3497_v36 = vpop.f32.mrf.mxu0 }
 0x21e   : > { %v2728_v40 = vmax.f32 %v2696_v50, 0.0  ;;  %v2658_v0 = vmul.f32 %v3497_v36, %v7498_v61  ;;  %v2694_v25 = vadd.f32 %v7517_v59, %v2655_v33 }
 0x21f   : > { %v2548_v19 = vpop.f32.mrf.mxu0 }
 0x220   : > { %v2697_v18 = vadd.f32 %v7517_v59, %v2658_v0  ;;  %v2767_v37 = vmul.f32 %v7542_v9, %v2728_v40  ;;  %v2656_v8 = vmul.f32 %v7498_v61, %v2548_v19  ;;  %v2726_v60 = vmax.f32 %v2694_v25, 0.0 }
 0x222   : > { %v2729_v57 = vmax.f32 %v2697_v18, 0.0  ;;  %v2820_v21 = vsel %vm2789_vm0, %v2767_v37, 0.0  ;;  %v2695_v16 = vadd.f32 %v7517_v59, %v2656_v8  ;;  %v2765_v17 = vmul.f32 %v7542_v9, %v2726_v60 }
 0x223   : > { %2821 = vadd.xlane.f32.xlu0 %v2820_v21 }
 0x224   : > { %v2768_v46 = vmul.f32 %v7542_v9, %v2729_v57  ;;  %v2727_v5 = vmax.f32 %v2695_v16, 0.0  ;;  %v2814_v62 = vsel %vm2789_vm0, %v2765_v17, 0.0 }
 0x226   : > { %v2823_v52 = vsel %vm2789_vm0, %v2768_v46, 0.0  ;;  %v2766_v26 = vmul.f32 %v7542_v9, %v2727_v5 }
 0x227   : > { %2824 = vadd.xlane.f32.xlu1 %v2823_v52 }
 0x228   : > { %v2817_v13 = vsel %vm2789_vm0, %v2766_v26, 0.0 }
 0x24f   : > { %v3512_v3 = vpop.f32.mrf.mxu1 }
 0x250   : > { %v2673_v53 = vmul.f32 %v3512_v3, %v7498_v61 }
 0x251   : > { %v2609_v32 = vpop.f32.mrf.mxu1 }
 0x252   : > { %v2712_v10 = vadd.f32 %v7517_v59, %v2673_v53  ;;  %v2671_v4 = vmul.f32 %v7498_v61, %v2609_v32 }
 0x253   : > { %v3513_v45 = vpop.f32.mrf.mxu1 }
 0x254   : > { %v2744_v11 = vmax.f32 %v2712_v10, 0.0  ;;  %v2710_v63 = vadd.f32 %v7517_v59, %v2671_v4  ;;  %v2674_v51 = vmul.f32 %v3513_v45, %v7498_v61 }
 0x255   : > { %v2612_v20 = vpop.f32.mrf.mxu1 }
 0x256   : > { %v2713_v35 = vadd.f32 %v7517_v59, %v2674_v51  ;;  %v2672_v34 = vmul.f32 %v7498_v61, %v2612_v20  ;;  %v2783_v28 = vmul.f32 %v7542_v9, %v2744_v11  ;;  %v2742_v6 = vmax.f32 %v2710_v63, 0.0 }
 0x258   : > { %v2745_v30 = vmax.f32 %v2713_v35, 0.0  ;;  %v2711_v55 = vadd.f32 %v7517_v59, %v2672_v34  ;;  %v2868_v15 = vsel %vm2789_vm0, %v2783_v28, 0.0  ;;  %v2781_v43 = vmul.f32 %v7542_v9, %v2742_v6 }
 0x259   : > { %2869 = vadd.xlane.f32.xlu0 %v2868_v15 }
 0x25a   : > { %v2784_v42 = vmul.f32 %v7542_v9, %v2745_v30  ;;  %v2743_v47 = vmax.f32 %v2711_v55, 0.0  ;;  %v2862_v24 = vsel %vm2789_vm0, %v2781_v43, 0.0 }
 0x25c   : > { %v2871_v41 = vsel %vm2789_vm0, %v2784_v42, 0.0  ;;  %v2782_v39 = vmul.f32 %v7542_v9, %v2743_v47 }
 0x25d   : > { %2872 = vadd.xlane.f32.xlu1 %v2871_v41  ;;  %2815 = vadd.xlane.f32.xlu0 %v2814_v62 }
 0x25e   : > { %v2865_v31 = vsel %vm2789_vm0, %v2782_v39, 0.0 }
 0x261   : > { %2818 = vadd.xlane.f32.xlu1 %v2817_v13  ;;  %2863 = vadd.xlane.f32.xlu0 %v2862_v24 }
 0x265   : > { %2866 = vadd.xlane.f32.xlu1 %v2865_v31 }
 0x26c   : > { %v2846_v23 = vpop.xlane.xlu0 %2845 }
 0x26d   : > { %v3006_v1 = vrot.slane %v2846_v23, %v7667_v58 }
 0x26f   : > { %v7661_v38 = vpop.xlane.xlu1 %2797 }
 0x270   : > { %v7663_v12 = vpop.xlane.xlu0 %2791 }
 0x273   : > { %v7665_v49 = vpop.xlane.xlu1 %2800 }
 0x274   : > { %v2840_v7 = vpop.xlane.xlu0 %2839 }
 0x275   : > { %v2997_v36 = vrot.slane %v2840_v7, %v7667_v58 }
 0x277   : > { %v2849_v56 = vpop.xlane.xlu1 %2848 }
 0x278   : > { %v3010_v27 = vrot.slane %v2849_v56, %v7669_v48  ;;  %v7673_v44 = vpop.xlane.xlu0 %2794 }
 0x27a   : > { %v3011_v14 = vsel %vm2929_vm1, %v3010_v27, %v3006_v1 }
 0x27b   : > { %v2843_v50 = vpop.xlane.xlu1 %2842 }
 0x27c   : > { %v3001_v40 = vrot.slane %v2843_v50, %v7669_v48  ;;  %v7678_v0 = vpop.xlane.xlu0 %2809 }
 0x27e   : > { %v3002_v18 = vsel %vm2929_vm1, %v3001_v40, %v2997_v36 }
 0x27f   : > { %v3080_v37 = vsel %vm3066_vm2, %v3011_v14, %v3002_v18  ;;  %v7682_v57 = vpop.xlane.xlu1 %2812 }
 0x280   : > { %v2858_v21 = vpop.xlane.xlu0 %2857 }
 0x281   : > { %v3024_v46 = vrot.slane %v2858_v21, %v7667_v58 }
 0x283   : > { %v2861_v52 = vpop.xlane.xlu1 %2860 }
 0x284   : > { %v3028_v33 = vrot.slane %v2861_v52, %v7669_v48  ;;  %v7686_v19 = vpop.xlane.xlu0 %2803 }
 0x285   : > { %v3500_v25 = vpop.f32.mrf.mxu0 }
 0x286   : > { %v2661_v3 = vmul.f32 %v3500_v25, %v7498_v61  ;;  %v3029_v8 = vsel %vm2929_vm1, %v3028_v33, %v3024_v46 }
 0x287   : > { %v2561_v53 = vpop.f32.mrf.mxu0  ;;  %v7690_v32 = vpop.xlane.xlu1 %2806 }
 0x288   : > { %v2700_v10 = vadd.f32 %v7517_v59, %v2661_v3  ;;  %v2659_v4 = vmul.f32 %v7498_v61, %v2561_v53  ;;  %v2852_v60 = vpop.xlane.xlu0 %2851 }
 0x289   : > { %v3501_v16 = vpop.f32.mrf.mxu0  ;;  %v3015_v20 = vrot.slane %v2852_v60, %v7667_v58 }
 0x28a   : > { %v2732_v45 = vmax.f32 %v2700_v10, 0.0  ;;  %v2698_v11 = vadd.f32 %v7517_v59, %v2659_v4  ;;  %v2662_v63 = vmul.f32 %v3501_v16, %v7498_v61 }
 0x28b   : > { %v2564_v51 = vpop.f32.mrf.mxu0  ;;  %v2855_v35 = vpop.xlane.xlu1 %2854 }
 0x28c   : > { %v2730_v34 = vmax.f32 %v2698_v11, 0.0  ;;  %v2701_v28 = vadd.f32 %v7517_v59, %v2662_v63  ;;  %v2660_v5 = vmul.f32 %v7498_v61, %v2564_v51  ;;  %v2771_v17 = vmul.f32 %v7542_v9, %v2732_v45 }
 0x28d   : > { %v3019_v6 = vrot.slane %v2855_v35, %v7669_v48 }
 0x28e   : > { %v2733_v30 = vmax.f32 %v2701_v28, 0.0  ;;  %v2699_v55 = vadd.f32 %v7517_v59, %v2660_v5  ;;  %v2832_v15 = vsel %vm2789_vm0, %v2771_v17, 0.0  ;;  %v2769_v42 = vmul.f32 %v7542_v9, %v2730_v34 }
 0x28f   : > { %2833 = vadd.xlane.f32.xlu0 %v2832_v15  ;;  %v3020_v26 = vsel %vm2929_vm1, %v3019_v6, %v3015_v20  ;;  %v2928_v6 = vrot.slane %v7673_v44, %v7669_v48  ;;  %v2923_v15 = vrot.slane %v7663_v12, %v7667_v58  ;;  %v2952_v12 = vrot.slane %v7678_v0, %v7667_v58 }
 0x290   : > { %v2731_v47 = vmax.f32 %v2699_v55, 0.0  ;;  %v2772_v41 = vmul.f32 %v7542_v9, %v2733_v30  ;;  %v3081_v62 = vsel %vm3068_vm3, %v3020_v26, %v3080_v37  ;;  %v2826_v24 = vsel %vm2789_vm0, %v2769_v42, 0.0 }
 0x291   : > { %v3082_v43 = vsel %vm3070_vm4, %v3029_v8, %v3081_v62  ;;  %v2943_v30 = vrot.slane %v7686_v19, %v7667_v58  ;;  %v2947_v55 = vrot.slane %v7690_v32, %v7669_v48  ;;  %v2938_v42 = vrot.slane %v7665_v49, %v7669_v48 }
 0x292   : > { %v2835_v13 = vsel %vm2789_vm0, %v2772_v41, 0.0  ;;  %v2770_v39 = vmul.f32 %v7542_v9, %v2731_v47  ;;  %v2934_v26 = vrot.slane %v7661_v38, %v7667_v58  ;;  %v2930_v47 = vsel %vm2929_vm1, %v2928_v6, %v2923_v15 }
 0x293   : > { %2836 = vadd.xlane.f32.xlu1 %v2835_v13  ;;  %2827 = vadd.xlane.f32.xlu0 %v2826_v24  ;;  %v2948_v44 = vsel %vm2929_vm1, %v2947_v55, %v2943_v30  ;;  %v2956_v49 = vrot.slane %v7682_v57, %v7669_v48 }
 0x294   : > { %v2829_v31 = vsel %vm2789_vm0, %v2770_v39, 0.0  ;;  %v2939_v32 = vsel %vm2929_vm1, %v2938_v42, %v2934_v26 }
 0x297   : > { %2830 = vadd.xlane.f32.xlu1 %v2829_v31  ;;  %v2957_v31 = vsel %vm2929_vm1, %v2956_v49, %v2952_v12 }
 0x2b0   : > { %v2825_v10 = vpop.xlane.xlu1 %2824 }
 0x2b9   : > { %v3516_v29 = vpop.f32.mrf.mxu1 }
 0x2ba   : > { %v2677_v23 = vmul.f32 %v3516_v29, %v7498_v61 }
 0x2bb   : > { %v2625_v2 = vpop.f32.mrf.mxu1 }
 0x2bc   : > { %v2716_v54 = vadd.f32 %v7517_v59, %v2677_v23  ;;  %v2675_v22 = vmul.f32 %v7498_v61, %v2625_v2  ;;  %v2974_v23 = vrot.slane %v2825_v10, %v7669_v48 }
 0x2bd   : > { %v3517_v7 = vpop.f32.mrf.mxu1 }
 0x2be   : > { %v2714_v56 = vadd.f32 %v7517_v59, %v2675_v22  ;;  %v2678_v1 = vmul.f32 %v3517_v7, %v7498_v61  ;;  %v2748_v14 = vmax.f32 %v2716_v54, 0.0 }
 0x2bf   : > { %v2628_v27 = vpop.f32.mrf.mxu1 }
 0x2c0   : > { %v2746_v50 = vmax.f32 %v2714_v56, 0.0  ;;  %v2717_v36 = vadd.f32 %v7517_v59, %v2678_v1  ;;  %v2676_v40 = vmul.f32 %v7498_v61, %v2628_v27  ;;  %v2787_v33 = vmul.f32 %v7542_v9, %v2748_v14 }
 0x2c2   : > { %v2715_v18 = vadd.f32 %v7517_v59, %v2676_v40  ;;  %v2785_v37 = vmul.f32 %v7542_v9, %v2746_v50  ;;  %v2749_v21 = vmax.f32 %v2717_v36, 0.0  ;;  %v2880_v8 = vsel %vm2789_vm0, %v2787_v33, 0.0  ;;  %v2822_v59 = vpop.xlane.xlu0 %2821 }
 0x2c3   : > { %v2970_v29 = vrot.slane %v2822_v59, %v7667_v58 }
 0x2c4   : > { %v2747_v46 = vmax.f32 %v2715_v18, 0.0  ;;  %v2874_v52 = vsel %vm2789_vm0, %v2785_v37, 0.0  ;;  %v2788_v53 = vmul.f32 %v7542_v9, %v2749_v21 }
 0x2c5   : > { %2875 = vadd.xlane.f32.xlu0 %v2874_v52  ;;  %v2975_v1 = vsel %vm2929_vm1, %v2974_v23, %v2970_v29 }
 0x2c6   : > { %v2786_v25 = vmul.f32 %v7542_v9, %v2747_v46  ;;  %v2883_v61 = vsel %vm2789_vm0, %v2788_v53, 0.0 }
 0x2c8   : > { %v2877_v3 = vsel %vm2789_vm0, %v2786_v25, 0.0 }
 0x2c9   : > { %2878 = vadd.xlane.f32.xlu1 %v2877_v3  ;;  %2881 = vadd.xlane.f32.xlu0 %v2880_v8 }
 0x2cd   : > { %2884 = vadd.xlane.f32.xlu1 %v2883_v61 }
 0x2e2   : > { %v2870_v4 = vpop.xlane.xlu0 %2869 }
 0x2e3   : > { %v3042_v60 = vrot.slane %v2870_v4, %v7667_v58 }
 0x2e6   : > { %v2873_v16 = vpop.xlane.xlu1 %2872  ;;  %v2816_v45 = vpop.xlane.xlu0 %2815 }
 0x2e7   : > { %v3046_v11 = vrot.slane %v2873_v16, %v7669_v48  ;;  %v2961_v62 = vrot.slane %v2816_v45, %v7667_v58 }
 0x2e9   : > { %v3047_v63 = vsel %vm2929_vm1, %v3046_v11, %v3042_v60 }
 0x2ea   : > { %v2819_v51 = vpop.xlane.xlu1 %2818  ;;  %v2864_v20 = vpop.xlane.xlu0 %2863 }
 0x2eb   : > { %v3033_v9 = vrot.slane %v2864_v20, %v7667_v58  ;;  %v2965_v19 = vrot.slane %v2819_v51, %v7669_v48 }
 0x2ed   : > { %v2966_v39 = vsel %vm2929_vm1, %v2965_v19, %v2961_v62 }
 0x2ee   : > { %v2867_v35 = vpop.xlane.xlu1 %2866 }
 0x2ef   : > { %v3037_v34 = vrot.slane %v2867_v35, %v7669_v48 }
 0x2f1   : > { %v3038_v28 = vsel %vm2929_vm1, %v3037_v34, %v3033_v9 }
 0x2f2   : > { %v3083_v5 = vsel %vm3072_vm5, %v3038_v28, %v3082_v43  ;;  %v3067_v43 = vsel %vm3066_vm2, %v2939_v32, %v2930_v47 }
 0x2f3   : > { %v3084_v17 = vsel %vm3074_vm6, %v3047_v63, %v3083_v5  ;;  %v3069_v38 = vsel %vm3068_vm3, %v2948_v44, %v3067_v43 }
 0x2f4   : > { %v3071_v2 = vsel %vm3070_vm4, %v2957_v31, %v3069_v38 }
 0x2f5   : > { %v3073_v57 = vsel %vm3072_vm5, %v2966_v39, %v3071_v2 }
 0x2f6   : > { %v3075_v27 = vsel %vm3074_vm6, %v2975_v1, %v3073_v57 }
 0x318   : > { %v2834_v41 = vpop.xlane.xlu0 %2833 }
 0x319   : > { %v2988_v54 = vrot.slane %v2834_v41, %v7667_v58 }
 0x31c   : > { %v2837_v13 = vpop.xlane.xlu1 %2836  ;;  %v2828_v24 = vpop.xlane.xlu0 %2827 }
 0x31d   : > { %v2979_v0 = vrot.slane %v2828_v24, %v7667_v58  ;;  %v2992_v22 = vrot.slane %v2837_v13, %v7669_v48 }
 0x31f   : > { %v2993_v50 = vsel %vm2929_vm1, %v2992_v22, %v2988_v54 }
 0x320   : > { %v2831_v7 = vpop.xlane.xlu1 %2830 }
 0x321   : > { %v2983_v56 = vrot.slane %v2831_v7, %v7669_v48 }
 0x323   : > { %v2984_v14 = vsel %vm2929_vm1, %v2983_v56, %v2979_v0 }
 0x324   : > { %v3077_v36 = vsel %vm3076_vm7, %v2984_v14, %v3075_v27 }
 0x325   : > { %v3079_v40 = vsel %vm3078_vm8, %v2993_v50, %v3077_v36 }
 0x326   : > { %3090 = vst.msk [vmem:[#allocation2] sm:$0xff] %vm3089_vm9, %v3079_v40 }
 0x34e   : > { %v2876_v18 = vpop.xlane.xlu0 %2875 }
 0x34f   : > { %v3051_v37 = vrot.slane %v2876_v18, %v7667_v58 }
 0x352   : > { %v2879_v21 = vpop.xlane.xlu1 %2878  ;;  %v2882_v46 = vpop.xlane.xlu0 %2881 }
 0x353   : > { %v3055_v52 = vrot.slane %v2879_v21, %v7669_v48  ;;  %v3060_v33 = vrot.slane %v2882_v46, %v7667_v58 }
 0x355   : > { %v3056_v25 = vsel %vm2929_vm1, %v3055_v52, %v3051_v37 }
 0x356   : > { %v2885_v3 = vpop.xlane.xlu1 %2884  ;;  %v3085_v53 = vsel %vm3076_vm7, %v3056_v25, %v3084_v17 }
 0x357   : > { %v3064_v8 = vrot.slane %v2885_v3, %v7669_v48 }
 0x359   : > { %v3065_v61 = vsel %vm2929_vm1, %v3064_v8, %v3060_v33 }
 0x35a   : > { %v3086_v59 = vsel %vm3078_vm8, %v3065_v61, %v3085_v53 }
 0x35b   : > { %3091 = vst.msk [vmem:[#allocation2 + $0x8] sm:$0xff] %vm3089_vm9, %v3086_v59 }
 0x35c PF: > { %v3094_v4 = vld [vmem:[#allocation2] sm:$0xff]  ;;  %vm3096_vm10 = vcmask 130048   ;;  %v3093_v58 = vld [vmem:[%s4106_s15 + $0x8] sm:$0xff]  ;;  %s3280_s27 = sshll.u32 %s4108_s12, 4  ;;  %vm3261_vm11 = vcmask 523264   ;;  %s8940_s25 = sand.u32 1, %s3933_s14   ;;  %s7805_s27 = int_to_ptr.vmem [resolvable:$true] %s3280_s27 }
 0x35d   : > { %v3092_v60 = vld [vmem:[%s4106_s15] sm:$0xff]  ;;  %v3179_v48 = vld [vmem:[%s7871_s9 + $0x8] sm:$0xff]  ;;  %s3434_s15 = sshll.u32 %s3945_s17, 3  ;;  %s7811_s17 = scalar_lea.sflag [#allocation4], %s8940_s25 }
 0x35e   : > { %3522 = vmatprep.mubr.msk.f32.mxu0 %vm3096_vm10, %v3092_v60  ;;  %3525 = vmatprep.subr.mxu1 %v3179_v48  ;;  %v3178_v16 = vld [vmem:[%s7871_s9] sm:$0xff]  ;;  %s3277_s21 = sadd.s32 %s3434_s15, %s4093_s22  ;;  %s3865_s22 = scalar_lea.vmem %s7805_s27, 256 }
 0x35f   : > { %3526 = vmatpush3.msra.mxu1 %v3179_v48  ;;  %s3435_s13 = sshll.u32 %s3277_s21, 7  ;;  %p3866_p1 = scmp.ne.s32.totalorder %s7805_s27, %s3865_s22 }
 0x360   : > { %3527 = vmatprep.subr.mxu1 %v3178_v16  ;;  %s7803_s19 = scalar_lea.hbm %s7872_s10, %s3435_s13  ;;  %s3959_s28 = smov [#allocation3]  }
 0x361   : > { %3528 = vmatpush3.msra.mxu1 %v3178_v16  ;;  %p3867_p2 = pnand %p3866_p1, %p4068_p3  ;;  %s3869_s23 = sshll.u32 %s3959_s28, 4  ;;  %s3870_s23 = int_to_ptr.vmem [resolvable:$false] %s3869_s23 }
 0x362   : > { %v3095_v10 = vld [vmem:[#allocation2 + $0x8] sm:$0xff]  ;;  %s3871_s24 = scalar_lea.vmem %s3870_s23, 512  ;;  %p3872_p5 = scmp.lt.s32.totalorder %s7805_s27, %s3870_s23 }
 0x363   : > { %3518 = vmatprep.subr.mxu0 %v3095_v10  ;;  %p3868_p4 = pneg %p3867_p2  ;;  %p3873_p6 = scmp.lt.s32.totalorder %s3871_s24, %s3865_s22 }
 0x364   : > { %3519 = vmatpush3.msra.mxu0 %v3095_v10 }
 0x365   : > { %3520 = vmatprep.subr.mxu0 %v3094_v4  ;;  %p3874_p7 = por %p3873_p6, %p3872_p5 }
 0x366   : > { %3521 = vmatpush3.msra.mxu0 %v3094_v4 }
 0x367   : > { %3523 = vmatmul.mubr.msk.f32.vlgmr.msra.gmra.mxu0 %vm3096_vm10, %v3093_v58  ;;  %p3875_p9 = pnand %p3874_p7, %p3868_p4 }
 0x427   : > { %v3524_v45 = vpop.f32.mrf.mxu0 }
 0x429   : > { %v3169_v11 = vpop.f32.mrf.mxu0 }
 0x42a   : > { %3529 = vmatprep.mubr.msk.f32.mxu1 %vm3096_vm10, %v3169_v11 }
 0x42b   : > { %3530 = vmatmul.mubr.msk.f32.vlgmr.msra.gmra.mxu1 %vm3096_vm10, %v3524_v45 }
 0x4eb   : > { %v3531_v63 = vpop.f32.mrf.mxu1 }
 0x4ec   : > { %3263 = vst.msk [vmem:[%s4108_s12 + $0x8] sm:$0xff] %vm3261_vm11, %v3531_v63 }
 0x4ed   : > { %v3252_v51 = vpop.f32.mrf.mxu1 }
 0x4ee   : > { %3262 = vst.msk [vmem:[%s4108_s12] sm:$0xff] %vm3261_vm11, %v3252_v51 }
 0x4ef   : > { %3878 = shalt.err (!%p3875_p9)
}
 0x4f0   : > { %s3879_s12 = scalar_lea.hbm %s7803_s19, 256  ;;  %s3883_s16 = scalar_lea.hbm %s7872_s10, 2048 }
 0x4f1   : > { %p3880_p10 = scmp.ne.s32.totalorder %s7803_s19, %s3879_s12  ;;  %p3884_p13 = scmp.lt.s32.totalorder %s7803_s19, %s7872_s10 }
 0x4f2   : > { %p3885_p0 = scmp.lt.s32.totalorder %s3883_s16, %s3879_s12 }
 0x4f3   : > { %p3881_p11 = pnand %p3880_p10, %p4068_p3 }
 0x4f4   : > { %p3886_p1 = por %p3885_p0, %p3884_p13 }
 0x4f5   : > { %p3882_p12 = pneg %p3881_p11 }
 0x4f7   : > { %p3887_p2 = pnand %p3886_p1, %p3882_p12 }
 0x4f9   : > { %3890 = shalt.err (!%p3887_p2)
}
 0x4fa   : > { %s3960_s13 = smov 128   ;;  %s3961_s30 = smov 8  }
 0x4fb   : > { %3549 = dma.vmem_to_hbm [thread:$0]  (%p4068_p3), %s7805_s27, 256, %s7803_s19, %s7811_s17, %s3960_s13, %s3960_s13, %s3961_s30  }
 0x4fc PF: > { %s8941_s29 = sld [smem:[#allocation6_spill]]  ;;  %p3555_p4 = scmp.ge.s32.totalorder %s3957_s20, 2 }
 0x4fe   : > { %p3552_p5 = pnand %p3555_p4, %p4077_p8 }
 0x500   : > { %p3553_p6 = pneg %p3552_p5 }
 0x502   : > { %s3295_s22 = sand.u32 1, %s8941_s29  }
 0x503   : > { %s3296_s28 = scalar_lea.sflag [#allocation4], %s3295_s22 }
 0x504   : > { %3924 = dma.done.wait (%p3553_p6), %s3296_s28, 256  }
 0x505   : > { %3926 = vsyncadd (%p3553_p6), %s3296_s28, 4294967040  ;;  %s23_s20 = sadd.s32 1, %s3957_s20   ;;  %s8943_s23 = sld [smem:[#allocation7_spill]] }
 0x506   : > { %p20_p7 = scmp.ge.s32.totalorder %s23_s20, 10   ;;  %s8944_s15 = sld [smem:[#allocation13_spill]] }
 0x507   : > { %s8945_s16 = sld [smem:[#allocation8_spill]]  ;;  %s8949_s13 = smov %s3933_s14 }
 0x508   : > { %s8946_s17 = sld [smem:[#allocation9_spill]]  ;;  %22 = sbr.rel (!%p20_p7) target bundleno = 5 (0x5), region = 106 }
 0x509   : > { %s8947_s18 = sld [smem:[#allocation10_spill]] }
 0x50a   : > { %s8948_s19 = sld [smem:[#allocation11_spill]] }
 0x50b   : > { %s8950_s14 = smov %s8943_s23 }
 0x50d   :  { %3301 = vsyncpa [#allocation4], 1 }
 0x50e   :  { %3303 = vsyncpa [#allocation4 + $0x1], 1 }

</bundles_post_ra>
